<compile_context>
chip_gen: v7x
topology: tpu7x:2x2x1
jax: 0.10.0
libtpu: 0.0.40
codegen_flags: <defaults>
</compile_context>

<pallas_src>
import functools

import numpy as np
import jax
import jax.numpy as jnp
from jax.experimental import pallas as pl
from jax.experimental.pallas import tpu as pltpu

# cfg.WEIGHT.* is external config not provided in the source -> deterministic
# placeholder values.
W_EQUAL_R = 1.0
W_SMOOTH = 0.1
W_RC = 0.01

# TODO(synk): `ssim` is not defined in the reference source; we assume the
# standard pytorch_ssim defaults (11x11 Gaussian window, sigma=1.5,
# padding=window//2, C1=0.01^2, C2=0.03^2, size_average=True).

_PARALLEL_1D = pltpu.CompilerParams(dimension_semantics=("parallel",))


def _round_up(x, m):
    return ((x + m - 1) // m) * m


# --------------------------------------------------------------------------
# 1) All five MSE terms in one pallas_call (lane-dense, cdiv-chunked, parallel).
# --------------------------------------------------------------------------
_MSE_CHUNK_ROWS = 1024  # 512 KiB per input block; 10 inputs x 2 bufs = 10 MiB.


def _mse5_kernel(a0, b0, a1, b1, a2, b2, a3, b3, a4, b4, o_ref,
                 *, total_rows, chunk, need_mask):
    if need_mask:
        row = (jax.lax.broadcasted_iota(jnp.int32, (chunk, 128), 0)
               + pl.program_id(0) * chunk)
        valid = row < total_rows
    parts = []
    for a_ref, b_ref in ((a0, b0), (a1, b1), (a2, b2), (a3, b3), (a4, b4)):
        d = a_ref[...] - b_ref[...]
        if need_mask:
            d = jnp.where(valid, d, 0.0)
        parts.append(jnp.sum(d * d, axis=0, keepdims=True))      # (1, 128)
    parts.append(jnp.zeros((3, 128), jnp.float32))
    o_ref[...] = jnp.concatenate(parts, axis=0)                  # (8, 128)


def _lane_dense(x):
    """Free reshape to (rows, 128); zero-pads only if size % 128 != 0."""
    flat = x.reshape(-1)
    n = flat.shape[0]
    if n % 128 != 0:
        flat = jnp.pad(flat, (0, _round_up(n, 8 * 128) - n))
    return flat.reshape(-1, 128)


def mse5(pairs):
    """pairs: 5 (a, b) tuples of identically-sized f32 arrays -> 5 scalar MSEs."""
    n_elem = pairs[0][0].size
    flats = []
    for a, b in pairs:
        assert a.size == n_elem and b.size == n_elem
        flats.append(_lane_dense(a))
        flats.append(_lane_dense(b))
    rows = flats[0].shape[0]
    chunk = min(_MSE_CHUNK_ROWS, rows)
    nchunks = pl.cdiv(rows, chunk)
    need_mask = (rows % chunk) != 0

    kern = functools.partial(_mse5_kernel, total_rows=rows, chunk=chunk,
                             need_mask=need_mask)
    out = pl.pallas_call(
        kern,
        grid=(nchunks,),
        in_specs=[pl.BlockSpec((chunk, 128), lambda i: (i, 0))] * 10,
        out_specs=pl.BlockSpec((None, 8, 128), lambda i: (i, 0, 0)),
        out_shape=jax.ShapeDtypeStruct((nchunks, 8, 128), jnp.float32),
        compiler_params=_PARALLEL_1D,
    )(*flats)
    sums = jnp.sum(out, axis=(0, 2))                              # (8,)
    inv_n = 1.0 / float(n_elem)
    return tuple(sums[k] * inv_n for k in range(5))


# --------------------------------------------------------------------------
# 2) SSIM for both (recon, target) pairs, gridded over 2*B*C planes.
#    Separable 11-tap Gaussian conv via pltpu.roll on zero-guard-padded planes
#    (cyclic wrap lands on guaranteed-zero rows/cols => exact zero padding).
# --------------------------------------------------------------------------
def _gauss11(win=11, sigma=1.5):
    xs = np.arange(win) - win // 2
    g = np.exp(-(xs.astype(np.float64) ** 2) / (2.0 * sigma ** 2))
    g = g / g.sum()
    return tuple(float(v) for v in g)


_G11 = _gauss11()


def _ssim_kernel(x_ref, y_ref, o_ref, *, valid_h, valid_w, hp, wp, c1, c2):
    x = x_ref[...]                                     # (hp, wp)
    y = y_ref[...]

    def conv1d(z, axis, size):
        # symmetric taps folded: 10 rolls + ~21 VPU ops per axis.
        acc = z * _G11[5]
        for d in range(1, 6):
            acc = acc + _G11[5 + d] * (pltpu.roll(z, d, axis)
                                       + pltpu.roll(z, size - d, axis))
        return acc

    def wconv(z):                                      # zero-padded 11x11 conv
        return conv1d(conv1d(z, 1, wp), 0, hp)

    mu_x = wconv(x)
    mu_y = wconv(y)
    sxx = wconv(x * x) - mu_x * mu_x
    syy = wconv(y * y) - mu_y * mu_y
    sxy = wconv(x * y) - mu_x * mu_y
    num = (2.0 * mu_x * mu_y + c1) * (2.0 * sxy + c2)
    den = (mu_x * mu_x + mu_y * mu_y + c1) * (sxx + syy + c2)
    r = pl.reciprocal(den, approx=True)                # EUP slot
    r = r * (2.0 - den * r)                            # one Newton step
    smap = num * r
    row = jax.lax.broadcasted_iota(jnp.int32, (hp, wp), 0)
    col = jax.lax.broadcasted_iota(jnp.int32, (hp, wp), 1)
    inside = (row < valid_h) & (col < valid_w)
    o_ref[...] = jnp.full((1, 128), jnp.sum(jnp.where(inside, smap, 0.0)),
                          dtype=jnp.float32)


def ssim_pair(x0, y0, x1, y1):
    """SSIM means for pairs (x0,y0) and (x1,y1); inputs (B,C,H,W) f32."""
    B, C, H, W = x0.shape
    BC = B * C
    hp = _round_up(H + 5, 8)       # >=5 zero guard rows for the wrap
    wp = _round_up(W + 5, 128)     # >=5 zero guard lanes for the wrap

    def planes(a):
        return a.reshape(BC, H, W)

    x_all = jnp.concatenate([planes(x0), planes(x1)], axis=0)
    y_all = jnp.concatenate([planes(y0), planes(y1)], axis=0)
    x_all = jnp.pad(x_all, ((0, 0), (0, hp - H), (0, wp - W)))
    y_all = jnp.pad(y_all, ((0, 0), (0, hp - H), (0, wp - W)))
    nplanes = 2 * BC

    # TODO(synk): for very large planes (>~1k^2) add row-striping with an
    # 11-row halo; per-plane blocks are fine at the sizes exercised here.
    kern = functools.partial(_ssim_kernel, valid_h=H, valid_w=W, hp=hp, wp=wp,
                             c1=0.01 ** 2, c2=0.03 ** 2)
    out = pl.pallas_call(
        kern,
        grid=(nplanes,),
        in_specs=[pl.BlockSpec((None, hp, wp), lambda i: (i, 0, 0))] * 2,
        out_specs=pl.BlockSpec((None, 1, 128), lambda i: (i, 0, 0)),
        out_shape=jax.ShapeDtypeStruct((nplanes, 1, 128), jnp.float32),
        compiler_params=pltpu.CompilerParams(
            dimension_semantics=("parallel",),
            vmem_limit_bytes=64 * 1024 * 1024),
    )(x_all, y_all)
    s = out[:, 0, 0]
    inv_n = 1.0 / float(B * C * H * W)
    return jnp.sum(s[:BC]) * inv_n, jnp.sum(s[BC:]) * inv_n


# --------------------------------------------------------------------------
# 3) smooth() for both (LF, HF) pairs, gridded over 2*B planes.
#    Backward-difference 2x2 gradient (pad=1) and 3x3 avg-pool (pad=1,
#    count_include_pad) via pltpu.roll on zero-guard-padded aligned planes.
# --------------------------------------------------------------------------
def _smooth_kernel(lf_ref, hf_ref, o_ref, *, hp, wp):
    p_lf = lf_ref[...]                                 # (hp, wp)
    p_hf = hf_ref[...]

    def dx(p):   # |conv2d with [[0,0],[-1,1]], pad 1| on the valid region
        return jnp.abs(p - pltpu.roll(p, 1, 1))

    def dy(p):   # |conv2d with [[0,-1],[0,1]], pad 1|
        return jnp.abs(p - pltpu.roll(p, 1, 0))

    def avg3(a):  # 3x3 avg-pool, stride 1, pad 1, count_include_pad=True
        rs = a + pltpu.roll(a, 1, 0) + pltpu.roll(a, hp - 1, 0)
        cs = rs + pltpu.roll(rs, 1, 1) + pltpu.roll(rs, wp - 1, 1)
        return cs * (1.0 / 9.0)

    sm = (dx(p_lf) * jnp.exp(-10.0 * avg3(dx(p_hf)))
          + dy(p_lf) * jnp.exp(-10.0 * avg3(dy(p_hf))))
    # sm is exactly zero outside the (h+1, w+1) valid window, so the full-array
    # sum equals the PyTorch sum over the padded conv output.
    o_ref[...] = jnp.full((1, 128), jnp.sum(sm), dtype=jnp.float32)


def _gray(x):                       # (B,3,h,w) -> (B,h,w)
    return 0.299 * x[:, 0] + 0.587 * x[:, 1] + 0.114 * x[:, 2]


def _gray_sub(x):                   # (B,3,H,W) -> (B,H//2,W//2)
    # TODO(synk): the grayscale + ::2 subsample stays as ONE fused XLA pass
    # over HF (a stride-2 lane gather has no clean in-kernel load on TPU).
    return (0.299 * x[:, 0, ::2, ::2] + 0.587 * x[:, 1, ::2, ::2]
            + 0.114 * x[:, 2, ::2, ::2])


def smooth_pair(lf0, hf0, lf1, hf1):
    """Both smooth() terms, split onto a 2*B-plane grid."""
    B, _, h, w = lf0.shape
    g_lf = jnp.concatenate([_gray(lf0), _gray(lf1)], axis=0)          # (2B,h,w)
    g_hf = jnp.concatenate([_gray_sub(hf0), _gray_sub(hf1)], axis=0)  # (2B,h,w)
    assert g_hf.shape == g_lf.shape
    hp = _round_up(h + 2, 8)       # >=2 zero guard rows (gradient + pool halo)
    wp = _round_up(w + 2, 128)
    g_lf = jnp.pad(g_lf, ((0, 0), (0, hp - h), (0, wp - w)))
    g_hf = jnp.pad(g_hf, ((0, 0), (0, hp - h), (0, wp - w)))

    kern = functools.partial(_smooth_kernel, hp=hp, wp=wp)
    out = pl.pallas_call(
        kern,
        grid=(2 * B,),
        in_specs=[pl.BlockSpec((None, hp, wp), lambda i: (i, 0, 0))] * 2,
        out_specs=pl.BlockSpec((None, 1, 128), lambda i: (i, 0, 0)),
        out_shape=jax.ShapeDtypeStruct((2 * B, 1, 128), jnp.float32),
        compiler_params=_PARALLEL_1D,
    )(g_lf, g_hf)
    s = out[:, 0, 0]
    inv_n = 1.0 / float(B * (h + 1) * (w + 1))   # PyTorch means over (h+1,w+1)
    return jnp.sum(s[:B]) * inv_n, jnp.sum(s[B:]) * inv_n


# --------------------------------------------------------------------------
# EnhanceLoss.forward
# --------------------------------------------------------------------------
def enhance_loss(preds, img, img_dark, recon_dark, recon_light):
    (hf_dark_dec, hf_light_dec, hf_dark_rec, hf_light_rec,
     lf_dark_lap, lf_light_lap) = preds

    (mse_equal_r, mse_rec_low, mse_rec_high, mse_rc_d, mse_rc_l) = mse5(
        [(hf_dark_dec, hf_light_dec),
         (recon_dark, img_dark),
         (recon_light, img),
         (hf_dark_rec, hf_dark_dec),
         (hf_light_rec, hf_light_dec)])

    ssim_low, ssim_high = ssim_pair(recon_dark, img_dark, recon_light, img)
    sm_low, sm_high = smooth_pair(lf_dark_lap, hf_dark_dec,
                                  lf_light_lap, hf_light_dec)

    losses_equal_r = mse_equal_r * W_EQUAL_R
    losses_recon_low = mse_rec_low * 1.0 + (1.0 - ssim_low)
    losses_recon_high = mse_rec_high * 1.0 + (1.0 - ssim_high)
    losses_smooth_low = sm_low * W_SMOOTH
    losses_smooth_high = sm_high * W_SMOOTH
    losses_rc = (mse_rc_d + mse_rc_l) * W_RC

    return (losses_equal_r + losses_recon_low + losses_recon_high
            + losses_rc + losses_smooth_low + losses_smooth_high)


if __name__ == "__main__":
    key = jax.random.PRNGKey(0)
    B, C, H, W = 2, 3, 16, 16
    ks = jax.random.split(key, 10)

    def rnd(k, shape=(B, C, H, W)):
        return jax.random.uniform(k, shape, dtype=jnp.float32)

    hf_dark_dec = rnd(ks[0])
    hf_light_dec = rnd(ks[1])
    hf_dark_rec = rnd(ks[2])
    hf_light_rec = rnd(ks[3])
    lf_dark_lap = rnd(ks[4], (B, C, H // 2, W // 2))
    lf_light_lap = rnd(ks[5], (B, C, H // 2, W // 2))
    img = rnd(ks[6])
    img_dark = rnd(ks[7])
    recon_dark = rnd(ks[8])
    recon_light = rnd(ks[9])

    preds = (hf_dark_dec, hf_light_dec, hf_dark_rec, hf_light_rec,
             lf_dark_lap, lf_light_lap)

    loss = jax.jit(enhance_loss)(preds, img, img_dark, recon_dark, recon_light)
    jax.block_until_ready(loss)
    print("KERNEL_OK")
</pallas_src>

<mosaic_0001>
module attributes {stable_mosaic.version = 11 : i64} {
  func.func @_mse5_kernel(%arg0: i32, %arg1: memref<12x128xf32, #tpu.memory_space<vmem>>, %arg2: memref<12x128xf32, #tpu.memory_space<vmem>>, %arg3: memref<12x128xf32, #tpu.memory_space<vmem>>, %arg4: memref<12x128xf32, #tpu.memory_space<vmem>>, %arg5: memref<12x128xf32, #tpu.memory_space<vmem>>, %arg6: memref<12x128xf32, #tpu.memory_space<vmem>>, %arg7: memref<12x128xf32, #tpu.memory_space<vmem>>, %arg8: memref<12x128xf32, #tpu.memory_space<vmem>>, %arg9: memref<12x128xf32, #tpu.memory_space<vmem>>, %arg10: memref<12x128xf32, #tpu.memory_space<vmem>>, %arg11: memref<1x8x128xf32, #tpu.memory_space<vmem>>) attributes {dimension_semantics = [#tpu.dimension_semantics<parallel>], iteration_bounds = array<i64: 1>, scalar_prefetch = 0 : i64, scratch_operands = 0 : i64, tpu.core_type = #tpu.core_type<tc>, window_params = [{transform_indices = @transform_0, window_bounds = array<i64: 12, 128>}, {transform_indices = @transform_1, window_bounds = array<i64: 12, 128>}, {transform_indices = @transform_2, window_bounds = array<i64: 12, 128>}, {transform_indices = @transform_3, window_bounds = array<i64: 12, 128>}, {transform_indices = @transform_4, window_bounds = array<i64: 12, 128>}, {transform_indices = @transform_5, window_bounds = array<i64: 12, 128>}, {transform_indices = @transform_6, window_bounds = array<i64: 12, 128>}, {transform_indices = @transform_7, window_bounds = array<i64: 12, 128>}, {transform_indices = @transform_8, window_bounds = array<i64: 12, 128>}, {transform_indices = @transform_9, window_bounds = array<i64: 12, 128>}, {transform_indices = @transform_10, window_bounds = array<i64: 1, 8, 128>}]} {
    %c0 = arith.constant 0 : index
    %c0_0 = arith.constant 0 : index
    %0 = vector.load %arg1[%c0, %c0_0] : memref<12x128xf32, #tpu.memory_space<vmem>>, vector<12x128xf32>
    %c0_1 = arith.constant 0 : index
    %c0_2 = arith.constant 0 : index
    %1 = vector.load %arg2[%c0_1, %c0_2] : memref<12x128xf32, #tpu.memory_space<vmem>>, vector<12x128xf32>
    %2 = arith.subf %0, %1 : vector<12x128xf32>
    %3 = arith.mulf %2, %2 : vector<12x128xf32>
    %cst = arith.constant dense<0.000000e+00> : vector<128xf32>
    %4 = vector.multi_reduction <add>, %3, %cst [0] : vector<12x128xf32> to vector<128xf32>
    %5 = vector.shape_cast %4 : vector<128xf32> to vector<1x128xf32>
    %c0_3 = arith.constant 0 : index
    %c0_4 = arith.constant 0 : index
    %6 = vector.load %arg3[%c0_3, %c0_4] : memref<12x128xf32, #tpu.memory_space<vmem>>, vector<12x128xf32>
    %c0_5 = arith.constant 0 : index
    %c0_6 = arith.constant 0 : index
    %7 = vector.load %arg4[%c0_5, %c0_6] : memref<12x128xf32, #tpu.memory_space<vmem>>, vector<12x128xf32>
    %8 = arith.subf %6, %7 : vector<12x128xf32>
    %9 = arith.mulf %8, %8 : vector<12x128xf32>
    %cst_7 = arith.constant dense<0.000000e+00> : vector<128xf32>
    %10 = vector.multi_reduction <add>, %9, %cst_7 [0] : vector<12x128xf32> to vector<128xf32>
    %11 = vector.shape_cast %10 : vector<128xf32> to vector<1x128xf32>
    %c0_8 = arith.constant 0 : index
    %c0_9 = arith.constant 0 : index
    %12 = vector.load %arg5[%c0_8, %c0_9] : memref<12x128xf32, #tpu.memory_space<vmem>>, vector<12x128xf32>
    %c0_10 = arith.constant 0 : index
    %c0_11 = arith.constant 0 : index
    %13 = vector.load %arg6[%c0_10, %c0_11] : memref<12x128xf32, #tpu.memory_space<vmem>>, vector<12x128xf32>
    %14 = arith.subf %12, %13 : vector<12x128xf32>
    %15 = arith.mulf %14, %14 : vector<12x128xf32>
    %cst_12 = arith.constant dense<0.000000e+00> : vector<128xf32>
    %16 = vector.multi_reduction <add>, %15, %cst_12 [0] : vector<12x128xf32> to vector<128xf32>
    %17 = vector.shape_cast %16 : vector<128xf32> to vector<1x128xf32>
    %c0_13 = arith.constant 0 : index
    %c0_14 = arith.constant 0 : index
    %18 = vector.load %arg7[%c0_13, %c0_14] : memref<12x128xf32, #tpu.memory_space<vmem>>, vector<12x128xf32>
    %c0_15 = arith.constant 0 : index
    %c0_16 = arith.constant 0 : index
    %19 = vector.load %arg8[%c0_15, %c0_16] : memref<12x128xf32, #tpu.memory_space<vmem>>, vector<12x128xf32>
    %20 = arith.subf %18, %19 : vector<12x128xf32>
    %21 = arith.mulf %20, %20 : vector<12x128xf32>
    %cst_17 = arith.constant dense<0.000000e+00> : vector<128xf32>
    %22 = vector.multi_reduction <add>, %21, %cst_17 [0] : vector<12x128xf32> to vector<128xf32>
    %23 = vector.shape_cast %22 : vector<128xf32> to vector<1x128xf32>
    %c0_18 = arith.constant 0 : index
    %c0_19 = arith.constant 0 : index
    %24 = vector.load %arg9[%c0_18, %c0_19] : memref<12x128xf32, #tpu.memory_space<vmem>>, vector<12x128xf32>
    %c0_20 = arith.constant 0 : index
    %c0_21 = arith.constant 0 : index
    %25 = vector.load %arg10[%c0_20, %c0_21] : memref<12x128xf32, #tpu.memory_space<vmem>>, vector<12x128xf32>
    %26 = arith.subf %24, %25 : vector<12x128xf32>
    %27 = arith.mulf %26, %26 : vector<12x128xf32>
    %cst_22 = arith.constant dense<0.000000e+00> : vector<128xf32>
    %28 = vector.multi_reduction <add>, %27, %cst_22 [0] : vector<12x128xf32> to vector<128xf32>
    %29 = vector.shape_cast %28 : vector<128xf32> to vector<1x128xf32>
    %cst_23 = arith.constant 0.000000e+00 : f32
    %30 = vector.broadcast %cst_23 : f32 to vector<3x128xf32>
    %31 = tpu.concatenate %5, %11, %17, %23, %29, %30 in 0 : vector<1x128xf32>, vector<1x128xf32>, vector<1x128xf32>, vector<1x128xf32>, vector<1x128xf32>, vector<3x128xf32> -> vector<8x128xf32>
    %c0_24 = arith.constant 0 : index
    %c0_25 = arith.constant 0 : index
    %c0_26 = arith.constant 0 : index
    %32 = vector.load %arg11[%c0_24, %c0_25, %c0_26] : memref<1x8x128xf32, #tpu.memory_space<vmem>>, vector<1x8x128xf32>
    %33 = vector.shape_cast %32 : vector<1x8x128xf32> to vector<8x128xf32>
    %34 = vector.shape_cast %31 : vector<8x128xf32> to vector<1x8x128xf32>
    tpu.vector_store %arg11[%c0_24, %c0_25, %c0_26], %34 {strides = array<i32>} : memref<1x8x128xf32, #tpu.memory_space<vmem>>, vector<1x8x128xf32>,
    return
  }
  func.func @transform_0(%arg0: i32) -> (i32, i32) {
    %c0_i32 = arith.constant 0 : i32
    %c0_i32_0 = arith.constant 0 : i32
    return %arg0, %c0_i32 : i32, i32
  }
  func.func @transform_1(%arg0: i32) -> (i32, i32) {
    %c0_i32 = arith.constant 0 : i32
    %c0_i32_0 = arith.constant 0 : i32
    return %arg0, %c0_i32 : i32, i32
  }
  func.func @transform_2(%arg0: i32) -> (i32, i32) {
    %c0_i32 = arith.constant 0 : i32
    %c0_i32_0 = arith.constant 0 : i32
    return %arg0, %c0_i32 : i32, i32
  }
  func.func @transform_3(%arg0: i32) -> (i32, i32) {
    %c0_i32 = arith.constant 0 : i32
    %c0_i32_0 = arith.constant 0 : i32
    return %arg0, %c0_i32 : i32, i32
  }
  func.func @transform_4(%arg0: i32) -> (i32, i32) {
    %c0_i32 = arith.constant 0 : i32
    %c0_i32_0 = arith.constant 0 : i32
    return %arg0, %c0_i32 : i32, i32
  }
  func.func @transform_5(%arg0: i32) -> (i32, i32) {
    %c0_i32 = arith.constant 0 : i32
    %c0_i32_0 = arith.constant 0 : i32
    return %arg0, %c0_i32 : i32, i32
  }
  func.func @transform_6(%arg0: i32) -> (i32, i32) {
    %c0_i32 = arith.constant 0 : i32
    %c0_i32_0 = arith.constant 0 : i32
    return %arg0, %c0_i32 : i32, i32
  }
  func.func @transform_7(%arg0: i32) -> (i32, i32) {
    %c0_i32 = arith.constant 0 : i32
    %c0_i32_0 = arith.constant 0 : i32
    return %arg0, %c0_i32 : i32, i32
  }
  func.func @transform_8(%arg0: i32) -> (i32, i32) {
    %c0_i32 = arith.constant 0 : i32
    %c0_i32_0 = arith.constant 0 : i32
    return %arg0, %c0_i32 : i32, i32
  }
  func.func @transform_9(%arg0: i32) -> (i32, i32) {
    %c0_i32 = arith.constant 0 : i32
    %c0_i32_0 = arith.constant 0 : i32
    return %arg0, %c0_i32 : i32, i32
  }
  func.func @transform_10(%arg0: i32) -> (i32, i32, i32) {
    %c0_i32 = arith.constant 0 : i32
    %c0_i32_0 = arith.constant 0 : i32
    %c0_i32_1 = arith.constant 0 : i32
    return %arg0, %c0_i32, %c0_i32_0 : i32, i32, i32
  }
}

module attributes {stable_mosaic.version = 11 : i64} {
  func.func @_ssim_kernel(%arg0: i32, %arg1: memref<1x24x128xf32, #tpu.memory_space<vmem>>, %arg2: memref<1x24x128xf32, #tpu.memory_space<vmem>>, %arg3: memref<1x1x128xf32, #tpu.memory_space<vmem>>) attributes {dimension_semantics = [#tpu.dimension_semantics<parallel>], iteration_bounds = array<i64: 12>, scalar_prefetch = 0 : i64, scratch_operands = 0 : i64, tpu.core_type = #tpu.core_type<tc>, window_params = [{transform_indices = @transform_0, window_bounds = array<i64: 1, 24, 128>}, {transform_indices = @transform_1, window_bounds = array<i64: 1, 24, 128>}, {transform_indices = @transform_2, window_bounds = array<i64: 1, 1, 128>}]} {
    %c0 = arith.constant 0 : index
    %c0_0 = arith.constant 0 : index
    %c0_1 = arith.constant 0 : index
    %0 = vector.load %arg1[%c0, %c0_0, %c0_1] : memref<1x24x128xf32, #tpu.memory_space<vmem>>, vector<1x24x128xf32>
    %1 = vector.shape_cast %0 : vector<1x24x128xf32> to vector<24x128xf32>
    %c0_2 = arith.constant 0 : index
    %c0_3 = arith.constant 0 : index
    %c0_4 = arith.constant 0 : index
    %2 = vector.load %arg2[%c0_2, %c0_3, %c0_4] : memref<1x24x128xf32, #tpu.memory_space<vmem>>, vector<1x24x128xf32>
    %3 = vector.shape_cast %2 : vector<1x24x128xf32> to vector<24x128xf32>
    %cst = arith.constant 0.266011715 : f32
    %4 = vector.broadcast %cst : f32 to vector<24x128xf32>
    %5 = arith.mulf %1, %4 : vector<24x128xf32>
    %c1_i32 = arith.constant 1 : i32
    %6 = tpu.dynamic_rotate %1 by %c1_i32 dim 1 : vector<24x128xf32>, i32 -> vector<24x128xf32>
    %c127_i32 = arith.constant 127 : i32
    %7 = tpu.dynamic_rotate %1 by %c127_i32 dim 1 : vector<24x128xf32>, i32 -> vector<24x128xf32>
    %8 = arith.addf %6, %7 : vector<24x128xf32>
    %cst_5 = arith.constant 0.213005543 : f32
    %9 = vector.broadcast %cst_5 : f32 to vector<24x128xf32>
    %10 = arith.mulf %9, %8 : vector<24x128xf32>
    %11 = arith.addf %5, %10 : vector<24x128xf32>
    %c2_i32 = arith.constant 2 : i32
    %12 = tpu.dynamic_rotate %1 by %c2_i32 dim 1 : vector<24x128xf32>, i32 -> vector<24x128xf32>
    %c126_i32 = arith.constant 126 : i32
    %13 = tpu.dynamic_rotate %1 by %c126_i32 dim 1 : vector<24x128xf32>, i32 -> vector<24x128xf32>
    %14 = arith.addf %12, %13 : vector<24x128xf32>
    %cst_6 = arith.constant 0.109360687 : f32
    %15 = vector.broadcast %cst_6 : f32 to vector<24x128xf32>
    %16 = arith.mulf %15, %14 : vector<24x128xf32>
    %17 = arith.addf %11, %16 : vector<24x128xf32>
    %c3_i32 = arith.constant 3 : i32
    %18 = tpu.dynamic_rotate %1 by %c3_i32 dim 1 : vector<24x128xf32>, i32 -> vector<24x128xf32>
    %c125_i32 = arith.constant 125 : i32
    %19 = tpu.dynamic_rotate %1 by %c125_i32 dim 1 : vector<24x128xf32>, i32 -> vector<24x128xf32>
    %20 = arith.addf %18, %19 : vector<24x128xf32>
    %cst_7 = arith.constant 0.0360007733 : f32
    %21 = vector.broadcast %cst_7 : f32 to vector<24x128xf32>
    %22 = arith.mulf %21, %20 : vector<24x128xf32>
    %23 = arith.addf %17, %22 : vector<24x128xf32>
    %c4_i32 = arith.constant 4 : i32
    %24 = tpu.dynamic_rotate %1 by %c4_i32 dim 1 : vector<24x128xf32>, i32 -> vector<24x128xf32>
    %c124_i32 = arith.constant 124 : i32
    %25 = tpu.dynamic_rotate %1 by %c124_i32 dim 1 : vector<24x128xf32>, i32 -> vector<24x128xf32>
    %26 = arith.addf %24, %25 : vector<24x128xf32>
    %cst_8 = arith.constant 0.00759875821 : f32
    %27 = vector.broadcast %cst_8 : f32 to vector<24x128xf32>
    %28 = arith.mulf %27, %26 : vector<24x128xf32>
    %29 = arith.addf %23, %28 : vector<24x128xf32>
    %c5_i32 = arith.constant 5 : i32
    %30 = tpu.dynamic_rotate %1 by %c5_i32 dim 1 : vector<24x128xf32>, i32 -> vector<24x128xf32>
    %c123_i32 = arith.constant 123 : i32
    %31 = tpu.dynamic_rotate %1 by %c123_i32 dim 1 : vector<24x128xf32>, i32 -> vector<24x128xf32>
    %32 = arith.addf %30, %31 : vector<24x128xf32>
    %cst_9 = arith.constant 0.00102838012 : f32
    %33 = vector.broadcast %cst_9 : f32 to vector<24x128xf32>
    %34 = arith.mulf %33, %32 : vector<24x128xf32>
    %35 = arith.addf %29, %34 : vector<24x128xf32>
    %cst_10 = arith.constant 0.266011715 : f32
    %36 = vector.broadcast %cst_10 : f32 to vector<24x128xf32>
    %37 = arith.mulf %35, %36 : vector<24x128xf32>
    %c1_i32_11 = arith.constant 1 : i32
    %38 = tpu.dynamic_rotate %35 by %c1_i32_11 dim 0 : vector<24x128xf32>, i32 -> vector<24x128xf32>
    %c23_i32 = arith.constant 23 : i32
    %39 = tpu.dynamic_rotate %35 by %c23_i32 dim 0 : vector<24x128xf32>, i32 -> vector<24x128xf32>
    %40 = arith.addf %38, %39 : vector<24x128xf32>
    %cst_12 = arith.constant 0.213005543 : f32
    %41 = vector.broadcast %cst_12 : f32 to vector<24x128xf32>
    %42 = arith.mulf %41, %40 : vector<24x128xf32>
    %43 = arith.addf %37, %42 : vector<24x128xf32>
    %c2_i32_13 = arith.constant 2 : i32
    %44 = tpu.dynamic_rotate %35 by %c2_i32_13 dim 0 : vector<24x128xf32>, i32 -> vector<24x128xf32>
    %c22_i32 = arith.constant 22 : i32
    %45 = tpu.dynamic_rotate %35 by %c22_i32 dim 0 : vector<24x128xf32>, i32 -> vector<24x128xf32>
    %46 = arith.addf %44, %45 : vector<24x128xf32>
    %cst_14 = arith.constant 0.109360687 : f32
    %47 = vector.broadcast %cst_14 : f32 to vector<24x128xf32>
    %48 = arith.mulf %47, %46 : vector<24x128xf32>
    %49 = arith.addf %43, %48 : vector<24x128xf32>
    %c3_i32_15 = arith.constant 3 : i32
    %50 = tpu.dynamic_rotate %35 by %c3_i32_15 dim 0 : vector<24x128xf32>, i32 -> vector<24x128xf32>
    %c21_i32 = arith.constant 21 : i32
    %51 = tpu.dynamic_rotate %35 by %c21_i32 dim 0 : vector<24x128xf32>, i32 -> vector<24x128xf32>
    %52 = arith.addf %50, %51 : vector<24x128xf32>
    %cst_16 = arith.constant 0.0360007733 : f32
    %53 = vector.broadcast %cst_16 : f32 to vector<24x128xf32>
    %54 = arith.mulf %53, %52 : vector<24x128xf32>
    %55 = arith.addf %49, %54 : vector<24x128xf32>
    %c4_i32_17 = arith.constant 4 : i32
    %56 = tpu.dynamic_rotate %35 by %c4_i32_17 dim 0 : vector<24x128xf32>, i32 -> vector<24x128xf32>
    %c20_i32 = arith.constant 20 : i32
    %57 = tpu.dynamic_rotate %35 by %c20_i32 dim 0 : vector<24x128xf32>, i32 -> vector<24x128xf32>
    %58 = arith.addf %56, %57 : vector<24x128xf32>
    %cst_18 = arith.constant 0.00759875821 : f32
    %59 = vector.broadcast %cst_18 : f32 to vector<24x128xf32>
    %60 = arith.mulf %59, %58 : vector<24x128xf32>
    %61 = arith.addf %55, %60 : vector<24x128xf32>
    %c5_i32_19 = arith.constant 5 : i32
    %62 = tpu.dynamic_rotate %35 by %c5_i32_19 dim 0 : vector<24x128xf32>, i32 -> vector<24x128xf32>
    %c19_i32 = arith.constant 19 : i32
    %63 = tpu.dynamic_rotate %35 by %c19_i32 dim 0 : vector<24x128xf32>, i32 -> vector<24x128xf32>
    %64 = arith.addf %62, %63 : vector<24x128xf32>
    %cst_20 = arith.constant 0.00102838012 : f32
    %65 = vector.broadcast %cst_20 : f32 to vector<24x128xf32>
    %66 = arith.mulf %65, %64 : vector<24x128xf32>
    %67 = arith.addf %61, %66 : vector<24x128xf32>
    %cst_21 = arith.constant 0.266011715 : f32
    %68 = vector.broadcast %cst_21 : f32 to vector<24x128xf32>
    %69 = arith.mulf %3, %68 : vector<24x128xf32>
    %c1_i32_22 = arith.constant 1 : i32
    %70 = tpu.dynamic_rotate %3 by %c1_i32_22 dim 1 : vector<24x128xf32>, i32 -> vector<24x128xf32>
    %c127_i32_23 = arith.constant 127 : i32
    %71 = tpu.dynamic_rotate %3 by %c127_i32_23 dim 1 : vector<24x128xf32>, i32 -> vector<24x128xf32>
    %72 = arith.addf %70, %71 : vector<24x128xf32>
    %cst_24 = arith.constant 0.213005543 : f32
    %73 = vector.broadcast %cst_24 : f32 to vector<24x128xf32>
    %74 = arith.mulf %73, %72 : vector<24x128xf32>
    %75 = arith.addf %69, %74 : vector<24x128xf32>
    %c2_i32_25 = arith.constant 2 : i32
    %76 = tpu.dynamic_rotate %3 by %c2_i32_25 dim 1 : vector<24x128xf32>, i32 -> vector<24x128xf32>
    %c126_i32_26 = arith.constant 126 : i32
    %77 = tpu.dynamic_rotate %3 by %c126_i32_26 dim 1 : vector<24x128xf32>, i32 -> vector<24x128xf32>
    %78 = arith.addf %76, %77 : vector<24x128xf32>
    %cst_27 = arith.constant 0.109360687 : f32
    %79 = vector.broadcast %cst_27 : f32 to vector<24x128xf32>
    %80 = arith.mulf %79, %78 : vector<24x128xf32>
    %81 = arith.addf %75, %80 : vector<24x128xf32>
    %c3_i32_28 = arith.constant 3 : i32
    %82 = tpu.dynamic_rotate %3 by %c3_i32_28 dim 1 : vector<24x128xf32>, i32 -> vector<24x128xf32>
    %c125_i32_29 = arith.constant 125 : i32
    %83 = tpu.dynamic_rotate %3 by %c125_i32_29 dim 1 : vector<24x128xf32>, i32 -> vector<24x128xf32>
    %84 = arith.addf %82, %83 : vector<24x128xf32>
    %cst_30 = arith.constant 0.0360007733 : f32
    %85 = vector.broadcast %cst_30 : f32 to vector<24x128xf32>
    %86 = arith.mulf %85, %84 : vector<24x128xf32>
    %87 = arith.addf %81, %86 : vector<24x128xf32>
    %c4_i32_31 = arith.constant 4 : i32
    %88 = tpu.dynamic_rotate %3 by %c4_i32_31 dim 1 : vector<24x128xf32>, i32 -> vector<24x128xf32>
    %c124_i32_32 = arith.constant 124 : i32
    %89 = tpu.dynamic_rotate %3 by %c124_i32_32 dim 1 : vector<24x128xf32>, i32 -> vector<24x128xf32>
    %90 = arith.addf %88, %89 : vector<24x128xf32>
    %cst_33 = arith.constant 0.00759875821 : f32
    %91 = vector.broadcast %cst_33 : f32 to vector<24x128xf32>
    %92 = arith.mulf %91, %90 : vector<24x128xf32>
    %93 = arith.addf %87, %92 : vector<24x128xf32>
    %c5_i32_34 = arith.constant 5 : i32
    %94 = tpu.dynamic_rotate %3 by %c5_i32_34 dim 1 : vector<24x128xf32>, i32 -> vector<24x128xf32>
    %c123_i32_35 = arith.constant 123 : i32
    %95 = tpu.dynamic_rotate %3 by %c123_i32_35 dim 1 : vector<24x128xf32>, i32 -> vector<24x128xf32>
    %96 = arith.addf %94, %95 : vector<24x128xf32>
    %cst_36 = arith.constant 0.00102838012 : f32
    %97 = vector.broadcast %cst_36 : f32 to vector<24x128xf32>
    %98 = arith.mulf %97, %96 : vector<24x128xf32>
    %99 = arith.addf %93, %98 : vector<24x128xf32>
    %cst_37 = arith.constant 0.266011715 : f32
    %100 = vector.broadcast %cst_37 : f32 to vector<24x128xf32>
    %101 = arith.mulf %99, %100 : vector<24x128xf32>
    %c1_i32_38 = arith.constant 1 : i32
    %102 = tpu.dynamic_rotate %99 by %c1_i32_38 dim 0 : vector<24x128xf32>, i32 -> vector<24x128xf32>
    %c23_i32_39 = arith.constant 23 : i32
    %103 = tpu.dynamic_rotate %99 by %c23_i32_39 dim 0 : vector<24x128xf32>, i32 -> vector<24x128xf32>
    %104 = arith.addf %102, %103 : vector<24x128xf32>
    %cst_40 = arith.constant 0.213005543 : f32
    %105 = vector.broadcast %cst_40 : f32 to vector<24x128xf32>
    %106 = arith.mulf %105, %104 : vector<24x128xf32>
    %107 = arith.addf %101, %106 : vector<24x128xf32>
    %c2_i32_41 = arith.constant 2 : i32
    %108 = tpu.dynamic_rotate %99 by %c2_i32_41 dim 0 : vector<24x128xf32>, i32 -> vector<24x128xf32>
    %c22_i32_42 = arith.constant 22 : i32
    %109 = tpu.dynamic_rotate %99 by %c22_i32_42 dim 0 : vector<24x128xf32>, i32 -> vector<24x128xf32>
    %110 = arith.addf %108, %109 : vector<24x128xf32>
    %cst_43 = arith.constant 0.109360687 : f32
    %111 = vector.broadcast %cst_43 : f32 to vector<24x128xf32>
    %112 = arith.mulf %111, %110 : vector<24x128xf32>
    %113 = arith.addf %107, %112 : vector<24x128xf32>
    %c3_i32_44 = arith.constant 3 : i32
    %114 = tpu.dynamic_rotate %99 by %c3_i32_44 dim 0 : vector<24x128xf32>, i32 -> vector<24x128xf32>
    %c21_i32_45 = arith.constant 21 : i32
    %115 = tpu.dynamic_rotate %99 by %c21_i32_45 dim 0 : vector<24x128xf32>, i32 -> vector<24x128xf32>
    %116 = arith.addf %114, %115 : vector<24x128xf32>
    %cst_46 = arith.constant 0.0360007733 : f32
    %117 = vector.broadcast %cst_46 : f32 to vector<24x128xf32>
    %118 = arith.mulf %117, %116 : vector<24x128xf32>
    %119 = arith.addf %113, %118 : vector<24x128xf32>
    %c4_i32_47 = arith.constant 4 : i32
    %120 = tpu.dynamic_rotate %99 by %c4_i32_47 dim 0 : vector<24x128xf32>, i32 -> vector<24x128xf32>
    %c20_i32_48 = arith.constant 20 : i32
    %121 = tpu.dynamic_rotate %99 by %c20_i32_48 dim 0 : vector<24x128xf32>, i32 -> vector<24x128xf32>
    %122 = arith.addf %120, %121 : vector<24x128xf32>
    %cst_49 = arith.constant 0.00759875821 : f32
    %123 = vector.broadcast %cst_49 : f32 to vector<24x128xf32>
    %124 = arith.mulf %123, %122 : vector<24x128xf32>
    %125 = arith.addf %119, %124 : vector<24x128xf32>
    %c5_i32_50 = arith.constant 5 : i32
    %126 = tpu.dynamic_rotate %99 by %c5_i32_50 dim 0 : vector<24x128xf32>, i32 -> vector<24x128xf32>
    %c19_i32_51 = arith.constant 19 : i32
    %127 = tpu.dynamic_rotate %99 by %c19_i32_51 dim 0 : vector<24x128xf32>, i32 -> vector<24x128xf32>
    %128 = arith.addf %126, %127 : vector<24x128xf32>
    %cst_52 = arith.constant 0.00102838012 : f32
    %129 = vector.broadcast %cst_52 : f32 to vector<24x128xf32>
    %130 = arith.mulf %129, %128 : vector<24x128xf32>
    %131 = arith.addf %125, %130 : vector<24x128xf32>
    %132 = arith.mulf %1, %1 : vector<24x128xf32>
    %cst_53 = arith.constant 0.266011715 : f32
    %133 = vector.broadcast %cst_53 : f32 to vector<24x128xf32>
    %134 = arith.mulf %132, %133 : vector<24x128xf32>
    %c1_i32_54 = arith.constant 1 : i32
    %135 = tpu.dynamic_rotate %132 by %c1_i32_54 dim 1 : vector<24x128xf32>, i32 -> vector<24x128xf32>
    %c127_i32_55 = arith.constant 127 : i32
    %136 = tpu.dynamic_rotate %132 by %c127_i32_55 dim 1 : vector<24x128xf32>, i32 -> vector<24x128xf32>
    %137 = arith.addf %135, %136 : vector<24x128xf32>
    %cst_56 = arith.constant 0.213005543 : f32
    %138 = vector.broadcast %cst_56 : f32 to vector<24x128xf32>
    %139 = arith.mulf %138, %137 : vector<24x128xf32>
    %140 = arith.addf %134, %139 : vector<24x128xf32>
    %c2_i32_57 = arith.constant 2 : i32
    %141 = tpu.dynamic_rotate %132 by %c2_i32_57 dim 1 : vector<24x128xf32>, i32 -> vector<24x128xf32>
    %c126_i32_58 = arith.constant 126 : i32
    %142 = tpu.dynamic_rotate %132 by %c126_i32_58 dim 1 : vector<24x128xf32>, i32 -> vector<24x128xf32>
    %143 = arith.addf %141, %142 : vector<24x128xf32>
    %cst_59 = arith.constant 0.109360687 : f32
    %144 = vector.broadcast %cst_59 : f32 to vector<24x128xf32>
    %145 = arith.mulf %144, %143 : vector<24x128xf32>
    %146 = arith.addf %140, %145 : vector<24x128xf32>
    %c3_i32_60 = arith.constant 3 : i32
    %147 = tpu.dynamic_rotate %132 by %c3_i32_60 dim 1 : vector<24x128xf32>, i32 -> vector<24x128xf32>
    %c125_i32_61 = arith.constant 125 : i32
    %148 = tpu.dynamic_rotate %132 by %c125_i32_61 dim 1 : vector<24x128xf32>, i32 -> vector<24x128xf32>
    %149 = arith.addf %147, %148 : vector<24x128xf32>
    %cst_62 = arith.constant 0.0360007733 : f32
    %150 = vector.broadcast %cst_62 : f32 to vector<24x128xf32>
    %151 = arith.mulf %150, %149 : vector<24x128xf32>
    %152 = arith.addf %146, %151 : vector<24x128xf32>
    %c4_i32_63 = arith.constant 4 : i32
    %153 = tpu.dynamic_rotate %132 by %c4_i32_63 dim 1 : vector<24x128xf32>, i32 -> vector<24x128xf32>
    %c124_i32_64 = arith.constant 124 : i32
    %154 = tpu.dynamic_rotate %132 by %c124_i32_64 dim 1 : vector<24x128xf32>, i32 -> vector<24x128xf32>
    %155 = arith.addf %153, %154 : vector<24x128xf32>
    %cst_65 = arith.constant 0.00759875821 : f32
    %156 = vector.broadcast %cst_65 : f32 to vector<24x128xf32>
    %157 = arith.mulf %156, %155 : vector<24x128xf32>
    %158 = arith.addf %152, %157 : vector<24x128xf32>
    %c5_i32_66 = arith.constant 5 : i32
    %159 = tpu.dynamic_rotate %132 by %c5_i32_66 dim 1 : vector<24x128xf32>, i32 -> vector<24x128xf32>
    %c123_i32_67 = arith.constant 123 : i32
    %160 = tpu.dynamic_rotate %132 by %c123_i32_67 dim 1 : vector<24x128xf32>, i32 -> vector<24x128xf32>
    %161 = arith.addf %159, %160 : vector<24x128xf32>
    %cst_68 = arith.constant 0.00102838012 : f32
    %162 = vector.broadcast %cst_68 : f32 to vector<24x128xf32>
    %163 = arith.mulf %162, %161 : vector<24x128xf32>
    %164 = arith.addf %158, %163 : vector<24x128xf32>
    %cst_69 = arith.constant 0.266011715 : f32
    %165 = vector.broadcast %cst_69 : f32 to vector<24x128xf32>
    %166 = arith.mulf %164, %165 : vector<24x128xf32>
    %c1_i32_70 = arith.constant 1 : i32
    %167 = tpu.dynamic_rotate %164 by %c1_i32_70 dim 0 : vector<24x128xf32>, i32 -> vector<24x128xf32>
    %c23_i32_71 = arith.constant 23 : i32
    %168 = tpu.dynamic_rotate %164 by %c23_i32_71 dim 0 : vector<24x128xf32>, i32 -> vector<24x128xf32>
    %169 = arith.addf %167, %168 : vector<24x128xf32>
    %cst_72 = arith.constant 0.213005543 : f32
    %170 = vector.broadcast %cst_72 : f32 to vector<24x128xf32>
    %171 = arith.mulf %170, %169 : vector<24x128xf32>
    %172 = arith.addf %166, %171 : vector<24x128xf32>
    %c2_i32_73 = arith.constant 2 : i32
    %173 = tpu.dynamic_rotate %164 by %c2_i32_73 dim 0 : vector<24x128xf32>, i32 -> vector<24x128xf32>
    %c22_i32_74 = arith.constant 22 : i32
    %174 = tpu.dynamic_rotate %164 by %c22_i32_74 dim 0 : vector<24x128xf32>, i32 -> vector<24x128xf32>
    %175 = arith.addf %173, %174 : vector<24x128xf32>
    %cst_75 = arith.constant 0.109360687 : f32
    %176 = vector.broadcast %cst_75 : f32 to vector<24x128xf32>
    %177 = arith.mulf %176, %175 : vector<24x128xf32>
    %178 = arith.addf %172, %177 : vector<24x128xf32>
    %c3_i32_76 = arith.constant 3 : i32
    %179 = tpu.dynamic_rotate %164 by %c3_i32_76 dim 0 : vector<24x128xf32>, i32 -> vector<24x128xf32>
    %c21_i32_77 = arith.constant 21 : i32
    %180 = tpu.dynamic_rotate %164 by %c21_i32_77 dim 0 : vector<24x128xf32>, i32 -> vector<24x128xf32>
    %181 = arith.addf %179, %180 : vector<24x128xf32>
    %cst_78 = arith.constant 0.0360007733 : f32
    %182 = vector.broadcast %cst_78 : f32 to vector<24x128xf32>
    %183 = arith.mulf %182, %181 : vector<24x128xf32>
    %184 = arith.addf %178, %183 : vector<24x128xf32>
    %c4_i32_79 = arith.constant 4 : i32
    %185 = tpu.dynamic_rotate %164 by %c4_i32_79 dim 0 : vector<24x128xf32>, i32 -> vector<24x128xf32>
    %c20_i32_80 = arith.constant 20 : i32
    %186 = tpu.dynamic_rotate %164 by %c20_i32_80 dim 0 : vector<24x128xf32>, i32 -> vector<24x128xf32>
    %187 = arith.addf %185, %186 : vector<24x128xf32>
    %cst_81 = arith.constant 0.00759875821 : f32
    %188 = vector.broadcast %cst_81 : f32 to vector<24x128xf32>
    %189 = arith.mulf %188, %187 : vector<24x128xf32>
    %190 = arith.addf %184, %189 : vector<24x128xf32>
    %c5_i32_82 = arith.constant 5 : i32
    %191 = tpu.dynamic_rotate %164 by %c5_i32_82 dim 0 : vector<24x128xf32>, i32 -> vector<24x128xf32>
    %c19_i32_83 = arith.constant 19 : i32
    %192 = tpu.dynamic_rotate %164 by %c19_i32_83 dim 0 : vector<24x128xf32>, i32 -> vector<24x128xf32>
    %193 = arith.addf %191, %192 : vector<24x128xf32>
    %cst_84 = arith.constant 0.00102838012 : f32
    %194 = vector.broadcast %cst_84 : f32 to vector<24x128xf32>
    %195 = arith.mulf %194, %193 : vector<24x128xf32>
    %196 = arith.addf %190, %195 : vector<24x128xf32>
    %197 = arith.mulf %67, %67 : vector<24x128xf32>
    %198 = arith.subf %196, %197 : vector<24x128xf32>
    %199 = arith.mulf %3, %3 : vector<24x128xf32>
    %cst_85 = arith.constant 0.266011715 : f32
    %200 = vector.broadcast %cst_85 : f32 to vector<24x128xf32>
    %201 = arith.mulf %199, %200 : vector<24x128xf32>
    %c1_i32_86 = arith.constant 1 : i32
    %202 = tpu.dynamic_rotate %199 by %c1_i32_86 dim 1 : vector<24x128xf32>, i32 -> vector<24x128xf32>
    %c127_i32_87 = arith.constant 127 : i32
    %203 = tpu.dynamic_rotate %199 by %c127_i32_87 dim 1 : vector<24x128xf32>, i32 -> vector<24x128xf32>
    %204 = arith.addf %202, %203 : vector<24x128xf32>
    %cst_88 = arith.constant 0.213005543 : f32
    %205 = vector.broadcast %cst_88 : f32 to vector<24x128xf32>
    %206 = arith.mulf %205, %204 : vector<24x128xf32>
    %207 = arith.addf %201, %206 : vector<24x128xf32>
    %c2_i32_89 = arith.constant 2 : i32
    %208 = tpu.dynamic_rotate %199 by %c2_i32_89 dim 1 : vector<24x128xf32>, i32 -> vector<24x128xf32>
    %c126_i32_90 = arith.constant 126 : i32
    %209 = tpu.dynamic_rotate %199 by %c126_i32_90 dim 1 : vector<24x128xf32>, i32 -> vector<24x128xf32>
    %210 = arith.addf %208, %209 : vector<24x128xf32>
    %cst_91 = arith.constant 0.109360687 : f32
    %211 = vector.broadcast %cst_91 : f32 to vector<24x128xf32>
    %212 = arith.mulf %211, %210 : vector<24x128xf32>
    %213 = arith.addf %207, %212 : vector<24x128xf32>
    %c3_i32_92 = arith.constant 3 : i32
    %214 = tpu.dynamic_rotate %199 by %c3_i32_92 dim 1 : vector<24x128xf32>, i32 -> vector<24x128xf32>
    %c125_i32_93 = arith.constant 125 : i32
    %215 = tpu.dynamic_rotate %199 by %c125_i32_93 dim 1 : vector<24x128xf32>, i32 -> vector<24x128xf32>
    %216 = arith.addf %214, %215 : vector<24x128xf32>
    %cst_94 = arith.constant 0.0360007733 : f32
    %217 = vector.broadcast %cst_94 : f32 to vector<24x128xf32>
    %218 = arith.mulf %217, %216 : vector<24x128xf32>
    %219 = arith.addf %213, %218 : vector<24x128xf32>
    %c4_i32_95 = arith.constant 4 : i32
    %220 = tpu.dynamic_rotate %199 by %c4_i32_95 dim 1 : vector<24x128xf32>, i32 -> vector<24x128xf32>
    %c124_i32_96 = arith.constant 124 : i32
    %221 = tpu.dynamic_rotate %199 by %c124_i32_96 dim 1 : vector<24x128xf32>, i32 -> vector<24x128xf32>
    %222 = arith.addf %220, %221 : vector<24x128xf32>
    %cst_97 = arith.constant 0.00759875821 : f32
    %223 = vector.broadcast %cst_97 : f32 to vector<24x128xf32>
    %224 = arith.mulf %223, %222 : vector<24x128xf32>
    %225 = arith.addf %219, %224 : vector<24x128xf32>
    %c5_i32_98 = arith.constant 5 : i32
    %226 = tpu.dynamic_rotate %199 by %c5_i32_98 dim 1 : vector<24x128xf32>, i32 -> vector<24x128xf32>
    %c123_i32_99 = arith.constant 123 : i32
    %227 = tpu.dynamic_rotate %199 by %c123_i32_99 dim 1 : vector<24x128xf32>, i32 -> vector<24x128xf32>
    %228 = arith.addf %226, %227 : vector<24x128xf32>
    %cst_100 = arith.constant 0.00102838012 : f32
    %229 = vector.broadcast %cst_100 : f32 to vector<24x128xf32>
    %230 = arith.mulf %229, %228 : vector<24x128xf32>
    %231 = arith.addf %225, %230 : vector<24x128xf32>
    %cst_101 = arith.constant 0.266011715 : f32
    %232 = vector.broadcast %cst_101 : f32 to vector<24x128xf32>
    %233 = arith.mulf %231, %232 : vector<24x128xf32>
    %c1_i32_102 = arith.constant 1 : i32
    %234 = tpu.dynamic_rotate %231 by %c1_i32_102 dim 0 : vector<24x128xf32>, i32 -> vector<24x128xf32>
    %c23_i32_103 = arith.constant 23 : i32
    %235 = tpu.dynamic_rotate %231 by %c23_i32_103 dim 0 : vector<24x128xf32>, i32 -> vector<24x128xf32>
    %236 = arith.addf %234, %235 : vector<24x128xf32>
    %cst_104 = arith.constant 0.213005543 : f32
    %237 = vector.broadcast %cst_104 : f32 to vector<24x128xf32>
    %238 = arith.mulf %237, %236 : vector<24x128xf32>
    %239 = arith.addf %233, %238 : vector<24x128xf32>
    %c2_i32_105 = arith.constant 2 : i32
    %240 = tpu.dynamic_rotate %231 by %c2_i32_105 dim 0 : vector<24x128xf32>, i32 -> vector<24x128xf32>
    %c22_i32_106 = arith.constant 22 : i32
    %241 = tpu.dynamic_rotate %231 by %c22_i32_106 dim 0 : vector<24x128xf32>, i32 -> vector<24x128xf32>
    %242 = arith.addf %240, %241 : vector<24x128xf32>
    %cst_107 = arith.constant 0.109360687 : f32
    %243 = vector.broadcast %cst_107 : f32 to vector<24x128xf32>
    %244 = arith.mulf %243, %242 : vector<24x128xf32>
    %245 = arith.addf %239, %244 : vector<24x128xf32>
    %c3_i32_108 = arith.constant 3 : i32
    %246 = tpu.dynamic_rotate %231 by %c3_i32_108 dim 0 : vector<24x128xf32>, i32 -> vector<24x128xf32>
    %c21_i32_109 = arith.constant 21 : i32
    %247 = tpu.dynamic_rotate %231 by %c21_i32_109 dim 0 : vector<24x128xf32>, i32 -> vector<24x128xf32>
    %248 = arith.addf %246, %247 : vector<24x128xf32>
    %cst_110 = arith.constant 0.0360007733 : f32
    %249 = vector.broadcast %cst_110 : f32 to vector<24x128xf32>
    %250 = arith.mulf %249, %248 : vector<24x128xf32>
    %251 = arith.addf %245, %250 : vector<24x128xf32>
    %c4_i32_111 = arith.constant 4 : i32
    %252 = tpu.dynamic_rotate %231 by %c4_i32_111 dim 0 : vector<24x128xf32>, i32 -> vector<24x128xf32>
    %c20_i32_112 = arith.constant 20 : i32
    %253 = tpu.dynamic_rotate %231 by %c20_i32_112 dim 0 : vector<24x128xf32>, i32 -> vector<24x128xf32>
    %254 = arith.addf %252, %253 : vector<24x128xf32>
    %cst_113 = arith.constant 0.00759875821 : f32
    %255 = vector.broadcast %cst_113 : f32 to vector<24x128xf32>
    %256 = arith.mulf %255, %254 : vector<24x128xf32>
    %257 = arith.addf %251, %256 : vector<24x128xf32>
    %c5_i32_114 = arith.constant 5 : i32
    %258 = tpu.dynamic_rotate %231 by %c5_i32_114 dim 0 : vector<24x128xf32>, i32 -> vector<24x128xf32>
    %c19_i32_115 = arith.constant 19 : i32
    %259 = tpu.dynamic_rotate %231 by %c19_i32_115 dim 0 : vector<24x128xf32>, i32 -> vector<24x128xf32>
    %260 = arith.addf %258, %259 : vector<24x128xf32>
    %cst_116 = arith.constant 0.00102838012 : f32
    %261 = vector.broadcast %cst_116 : f32 to vector<24x128xf32>
    %262 = arith.mulf %261, %260 : vector<24x128xf32>
    %263 = arith.addf %257, %262 : vector<24x128xf32>
    %264 = arith.mulf %131, %131 : vector<24x128xf32>
    %265 = arith.subf %263, %264 : vector<24x128xf32>
    %266 = arith.mulf %1, %3 : vector<24x128xf32>
    %cst_117 = arith.constant 0.266011715 : f32
    %267 = vector.broadcast %cst_117 : f32 to vector<24x128xf32>
    %268 = arith.mulf %266, %267 : vector<24x128xf32>
    %c1_i32_118 = arith.constant 1 : i32
    %269 = tpu.dynamic_rotate %266 by %c1_i32_118 dim 1 : vector<24x128xf32>, i32 -> vector<24x128xf32>
    %c127_i32_119 = arith.constant 127 : i32
    %270 = tpu.dynamic_rotate %266 by %c127_i32_119 dim 1 : vector<24x128xf32>, i32 -> vector<24x128xf32>
    %271 = arith.addf %269, %270 : vector<24x128xf32>
    %cst_120 = arith.constant 0.213005543 : f32
    %272 = vector.broadcast %cst_120 : f32 to vector<24x128xf32>
    %273 = arith.mulf %272, %271 : vector<24x128xf32>
    %274 = arith.addf %268, %273 : vector<24x128xf32>
    %c2_i32_121 = arith.constant 2 : i32
    %275 = tpu.dynamic_rotate %266 by %c2_i32_121 dim 1 : vector<24x128xf32>, i32 -> vector<24x128xf32>
    %c126_i32_122 = arith.constant 126 : i32
    %276 = tpu.dynamic_rotate %266 by %c126_i32_122 dim 1 : vector<24x128xf32>, i32 -> vector<24x128xf32>
    %277 = arith.addf %275, %276 : vector<24x128xf32>
    %cst_123 = arith.constant 0.109360687 : f32
    %278 = vector.broadcast %cst_123 : f32 to vector<24x128xf32>
    %279 = arith.mulf %278, %277 : vector<24x128xf32>
    %280 = arith.addf %274, %279 : vector<24x128xf32>
    %c3_i32_124 = arith.constant 3 : i32
    %281 = tpu.dynamic_rotate %266 by %c3_i32_124 dim 1 : vector<24x128xf32>, i32 -> vector<24x128xf32>
    %c125_i32_125 = arith.constant 125 : i32
    %282 = tpu.dynamic_rotate %266 by %c125_i32_125 dim 1 : vector<24x128xf32>, i32 -> vector<24x128xf32>
    %283 = arith.addf %281, %282 : vector<24x128xf32>
    %cst_126 = arith.constant 0.0360007733 : f32
    %284 = vector.broadcast %cst_126 : f32 to vector<24x128xf32>
    %285 = arith.mulf %284, %283 : vector<24x128xf32>
    %286 = arith.addf %280, %285 : vector<24x128xf32>
    %c4_i32_127 = arith.constant 4 : i32
    %287 = tpu.dynamic_rotate %266 by %c4_i32_127 dim 1 : vector<24x128xf32>, i32 -> vector<24x128xf32>
    %c124_i32_128 = arith.constant 124 : i32
    %288 = tpu.dynamic_rotate %266 by %c124_i32_128 dim 1 : vector<24x128xf32>, i32 -> vector<24x128xf32>
    %289 = arith.addf %287, %288 : vector<24x128xf32>
    %cst_129 = arith.constant 0.00759875821 : f32
    %290 = vector.broadcast %cst_129 : f32 to vector<24x128xf32>
    %291 = arith.mulf %290, %289 : vector<24x128xf32>
    %292 = arith.addf %286, %291 : vector<24x128xf32>
    %c5_i32_130 = arith.constant 5 : i32
    %293 = tpu.dynamic_rotate %266 by %c5_i32_130 dim 1 : vector<24x128xf32>, i32 -> vector<24x128xf32>
    %c123_i32_131 = arith.constant 123 : i32
    %294 = tpu.dynamic_rotate %266 by %c123_i32_131 dim 1 : vector<24x128xf32>, i32 -> vector<24x128xf32>
    %295 = arith.addf %293, %294 : vector<24x128xf32>
    %cst_132 = arith.constant 0.00102838012 : f32
    %296 = vector.broadcast %cst_132 : f32 to vector<24x128xf32>
    %297 = arith.mulf %296, %295 : vector<24x128xf32>
    %298 = arith.addf %292, %297 : vector<24x128xf32>
    %cst_133 = arith.constant 0.266011715 : f32
    %299 = vector.broadcast %cst_133 : f32 to vector<24x128xf32>
    %300 = arith.mulf %298, %299 : vector<24x128xf32>
    %c1_i32_134 = arith.constant 1 : i32
    %301 = tpu.dynamic_rotate %298 by %c1_i32_134 dim 0 : vector<24x128xf32>, i32 -> vector<24x128xf32>
    %c23_i32_135 = arith.constant 23 : i32
    %302 = tpu.dynamic_rotate %298 by %c23_i32_135 dim 0 : vector<24x128xf32>, i32 -> vector<24x128xf32>
    %303 = arith.addf %301, %302 : vector<24x128xf32>
    %cst_136 = arith.constant 0.213005543 : f32
    %304 = vector.broadcast %cst_136 : f32 to vector<24x128xf32>
    %305 = arith.mulf %304, %303 : vector<24x128xf32>
    %306 = arith.addf %300, %305 : vector<24x128xf32>
    %c2_i32_137 = arith.constant 2 : i32
    %307 = tpu.dynamic_rotate %298 by %c2_i32_137 dim 0 : vector<24x128xf32>, i32 -> vector<24x128xf32>
    %c22_i32_138 = arith.constant 22 : i32
    %308 = tpu.dynamic_rotate %298 by %c22_i32_138 dim 0 : vector<24x128xf32>, i32 -> vector<24x128xf32>
    %309 = arith.addf %307, %308 : vector<24x128xf32>
    %cst_139 = arith.constant 0.109360687 : f32
    %310 = vector.broadcast %cst_139 : f32 to vector<24x128xf32>
    %311 = arith.mulf %310, %309 : vector<24x128xf32>
    %312 = arith.addf %306, %311 : vector<24x128xf32>
    %c3_i32_140 = arith.constant 3 : i32
    %313 = tpu.dynamic_rotate %298 by %c3_i32_140 dim 0 : vector<24x128xf32>, i32 -> vector<24x128xf32>
    %c21_i32_141 = arith.constant 21 : i32
    %314 = tpu.dynamic_rotate %298 by %c21_i32_141 dim 0 : vector<24x128xf32>, i32 -> vector<24x128xf32>
    %315 = arith.addf %313, %314 : vector<24x128xf32>
    %cst_142 = arith.constant 0.0360007733 : f32
    %316 = vector.broadcast %cst_142 : f32 to vector<24x128xf32>
    %317 = arith.mulf %316, %315 : vector<24x128xf32>
    %318 = arith.addf %312, %317 : vector<24x128xf32>
    %c4_i32_143 = arith.constant 4 : i32
    %319 = tpu.dynamic_rotate %298 by %c4_i32_143 dim 0 : vector<24x128xf32>, i32 -> vector<24x128xf32>
    %c20_i32_144 = arith.constant 20 : i32
    %320 = tpu.dynamic_rotate %298 by %c20_i32_144 dim 0 : vector<24x128xf32>, i32 -> vector<24x128xf32>
    %321 = arith.addf %319, %320 : vector<24x128xf32>
    %cst_145 = arith.constant 0.00759875821 : f32
    %322 = vector.broadcast %cst_145 : f32 to vector<24x128xf32>
    %323 = arith.mulf %322, %321 : vector<24x128xf32>
    %324 = arith.addf %318, %323 : vector<24x128xf32>
    %c5_i32_146 = arith.constant 5 : i32
    %325 = tpu.dynamic_rotate %298 by %c5_i32_146 dim 0 : vector<24x128xf32>, i32 -> vector<24x128xf32>
    %c19_i32_147 = arith.constant 19 : i32
    %326 = tpu.dynamic_rotate %298 by %c19_i32_147 dim 0 : vector<24x128xf32>, i32 -> vector<24x128xf32>
    %327 = arith.addf %325, %326 : vector<24x128xf32>
    %cst_148 = arith.constant 0.00102838012 : f32
    %328 = vector.broadcast %cst_148 : f32 to vector<24x128xf32>
    %329 = arith.mulf %328, %327 : vector<24x128xf32>
    %330 = arith.addf %324, %329 : vector<24x128xf32>
    %331 = arith.mulf %67, %131 : vector<24x128xf32>
    %332 = arith.subf %330, %331 : vector<24x128xf32>
    %cst_149 = arith.constant 2.000000e+00 : f32
    %333 = vector.broadcast %cst_149 : f32 to vector<24x128xf32>
    %334 = arith.mulf %333, %67 : vector<24x128xf32>
    %335 = arith.mulf %334, %131 : vector<24x128xf32>
    %cst_150 = arith.constant 9.99999974E-5 : f32
    %336 = vector.broadcast %cst_150 : f32 to vector<24x128xf32>
    %337 = arith.addf %335, %336 : vector<24x128xf32>
    %cst_151 = arith.constant 2.000000e+00 : f32
    %338 = vector.broadcast %cst_151 : f32 to vector<24x128xf32>
    %339 = arith.mulf %338, %332 : vector<24x128xf32>
    %cst_152 = arith.constant 8.99999984E-4 : f32
    %340 = vector.broadcast %cst_152 : f32 to vector<24x128xf32>
    %341 = arith.addf %339, %340 : vector<24x128xf32>
    %342 = arith.mulf %337, %341 : vector<24x128xf32>
    %343 = arith.mulf %67, %67 : vector<24x128xf32>
    %344 = arith.mulf %131, %131 : vector<24x128xf32>
    %345 = arith.addf %343, %344 : vector<24x128xf32>
    %cst_153 = arith.constant 9.99999974E-5 : f32
    %346 = vector.broadcast %cst_153 : f32 to vector<24x128xf32>
    %347 = arith.addf %345, %346 : vector<24x128xf32>
    %348 = arith.addf %198, %265 : vector<24x128xf32>
    %cst_154 = arith.constant 8.99999984E-4 : f32
    %349 = vector.broadcast %cst_154 : f32 to vector<24x128xf32>
    %350 = arith.addf %348, %349 : vector<24x128xf32>
    %351 = arith.mulf %347, %350 : vector<24x128xf32>
    %352 = tpu.reciprocal %351 {approx = true} : vector<24x128xf32> -> vector<24x128xf32>
    %353 = arith.mulf %351, %352 : vector<24x128xf32>
    %cst_155 = arith.constant 2.000000e+00 : f32
    %354 = vector.broadcast %cst_155 : f32 to vector<24x128xf32>
    %355 = arith.subf %354, %353 : vector<24x128xf32>
    %356 = arith.mulf %352, %355 : vector<24x128xf32>
    %357 = arith.mulf %342, %356 : vector<24x128xf32>
    %358 = tpu.iota {dimensions = array<i32: 0>} : vector<24x128xi32>
    %359 = tpu.iota {dimensions = array<i32: 1>} : vector<24x128xi32>
    %c16_i32 = arith.constant 16 : i32
    %360 = vector.broadcast %c16_i32 : i32 to vector<24x128xi32>
    %361 = arith.cmpi slt, %358, %360 : vector<24x128xi32>
    %c16_i32_156 = arith.constant 16 : i32
    %362 = vector.broadcast %c16_i32_156 : i32 to vector<24x128xi32>
    %363 = arith.cmpi slt, %359, %362 : vector<24x128xi32>
    %364 = arith.andi %361, %363 : vector<24x128xi1>
    %cst_157 = arith.constant 0.000000e+00 : f32
    %365 = vector.broadcast %cst_157 : f32 to vector<24x128xf32>
    %366 = arith.select %364, %357, %365 : vector<24x128xi1>, vector<24x128xf32>
    %367 = vector.shape_cast %366 : vector<24x128xf32> to vector<1x24x128xf32>
    %cst_158 = arith.constant dense<0.000000e+00> : vector<1xf32>
    %368 = vector.multi_reduction <add>, %367, %cst_158 [1, 2] : vector<1x24x128xf32> to vector<1xf32>
    %369 = vector.shape_cast %368 : vector<1xf32> to vector<1x1x1xf32>
    %370 = vector.extract %369[0, 0, 0] : f32 from vector<1x1x1xf32>
    %371 = vector.broadcast %370 : f32 to vector<1x128xf32>
    %c0_159 = arith.constant 0 : index
    %c0_160 = arith.constant 0 : index
    %c0_161 = arith.constant 0 : index
    %372 = vector.load %arg3[%c0_159, %c0_160, %c0_161] : memref<1x1x128xf32, #tpu.memory_space<vmem>>, vector<1x1x128xf32>
    %373 = vector.shape_cast %372 : vector<1x1x128xf32> to vector<1x128xf32>
    %374 = vector.shape_cast %371 : vector<1x128xf32> to vector<1x1x128xf32>
    tpu.vector_store %arg3[%c0_159, %c0_160, %c0_161], %374 {strides = array<i32>} : memref<1x1x128xf32, #tpu.memory_space<vmem>>, vector<1x1x128xf32>,
    return
  }
  func.func @transform_0(%arg0: i32) -> (i32, i32, i32) {
    %c0_i32 = arith.constant 0 : i32
    %c0_i32_0 = arith.constant 0 : i32
    %c0_i32_1 = arith.constant 0 : i32
    return %arg0, %c0_i32, %c0_i32_0 : i32, i32, i32
  }
  func.func @transform_1(%arg0: i32) -> (i32, i32, i32) {
    %c0_i32 = arith.constant 0 : i32
    %c0_i32_0 = arith.constant 0 : i32
    %c0_i32_1 = arith.constant 0 : i32
    return %arg0, %c0_i32, %c0_i32_0 : i32, i32, i32
  }
  func.func @transform_2(%arg0: i32) -> (i32, i32, i32) {
    %c0_i32 = arith.constant 0 : i32
    %c0_i32_0 = arith.constant 0 : i32
    %c0_i32_1 = arith.constant 0 : i32
    return %arg0, %c0_i32, %c0_i32_0 : i32, i32, i32
  }
}

module attributes {stable_mosaic.version = 11 : i64} {
  func.func @_smooth_kernel(%arg0: i32, %arg1: memref<1x16x128xf32, #tpu.memory_space<vmem>>, %arg2: memref<1x16x128xf32, #tpu.memory_space<vmem>>, %arg3: memref<1x1x128xf32, #tpu.memory_space<vmem>>) attributes {dimension_semantics = [#tpu.dimension_semantics<parallel>], iteration_bounds = array<i64: 4>, scalar_prefetch = 0 : i64, scratch_operands = 0 : i64, tpu.core_type = #tpu.core_type<tc>, window_params = [{transform_indices = @transform_0, window_bounds = array<i64: 1, 16, 128>}, {transform_indices = @transform_1, window_bounds = array<i64: 1, 16, 128>}, {transform_indices = @transform_2, window_bounds = array<i64: 1, 1, 128>}]} {
    %c0 = arith.constant 0 : index
    %c0_0 = arith.constant 0 : index
    %c0_1 = arith.constant 0 : index
    %0 = vector.load %arg1[%c0, %c0_0, %c0_1] : memref<1x16x128xf32, #tpu.memory_space<vmem>>, vector<1x16x128xf32>
    %1 = vector.shape_cast %0 : vector<1x16x128xf32> to vector<16x128xf32>
    %c0_2 = arith.constant 0 : index
    %c0_3 = arith.constant 0 : index
    %c0_4 = arith.constant 0 : index
    %2 = vector.load %arg2[%c0_2, %c0_3, %c0_4] : memref<1x16x128xf32, #tpu.memory_space<vmem>>, vector<1x16x128xf32>
    %3 = vector.shape_cast %2 : vector<1x16x128xf32> to vector<16x128xf32>
    %c1_i32 = arith.constant 1 : i32
    %4 = tpu.dynamic_rotate %1 by %c1_i32 dim 1 : vector<16x128xf32>, i32 -> vector<16x128xf32>
    %5 = arith.subf %1, %4 : vector<16x128xf32>
    %6 = math.absf %5 : vector<16x128xf32>
    %c1_i32_5 = arith.constant 1 : i32
    %7 = tpu.dynamic_rotate %3 by %c1_i32_5 dim 1 : vector<16x128xf32>, i32 -> vector<16x128xf32>
    %8 = arith.subf %3, %7 : vector<16x128xf32>
    %9 = math.absf %8 : vector<16x128xf32>
    %c1_i32_6 = arith.constant 1 : i32
    %10 = tpu.dynamic_rotate %9 by %c1_i32_6 dim 0 : vector<16x128xf32>, i32 -> vector<16x128xf32>
    %11 = arith.addf %9, %10 : vector<16x128xf32>
    %c15_i32 = arith.constant 15 : i32
    %12 = tpu.dynamic_rotate %9 by %c15_i32 dim 0 : vector<16x128xf32>, i32 -> vector<16x128xf32>
    %13 = arith.addf %11, %12 : vector<16x128xf32>
    %c1_i32_7 = arith.constant 1 : i32
    %14 = tpu.dynamic_rotate %13 by %c1_i32_7 dim 1 : vector<16x128xf32>, i32 -> vector<16x128xf32>
    %15 = arith.addf %13, %14 : vector<16x128xf32>
    %c127_i32 = arith.constant 127 : i32
    %16 = tpu.dynamic_rotate %13 by %c127_i32 dim 1 : vector<16x128xf32>, i32 -> vector<16x128xf32>
    %17 = arith.addf %15, %16 : vector<16x128xf32>
    %cst = arith.constant 0.111111112 : f32
    %18 = vector.broadcast %cst : f32 to vector<16x128xf32>
    %19 = arith.mulf %17, %18 : vector<16x128xf32>
    %cst_8 = arith.constant -1.000000e+01 : f32
    %20 = vector.broadcast %cst_8 : f32 to vector<16x128xf32>
    %21 = arith.mulf %20, %19 : vector<16x128xf32>
    %22 = math.exp %21 : vector<16x128xf32>
    %23 = arith.mulf %6, %22 : vector<16x128xf32>
    %c1_i32_9 = arith.constant 1 : i32
    %24 = tpu.dynamic_rotate %1 by %c1_i32_9 dim 0 : vector<16x128xf32>, i32 -> vector<16x128xf32>
    %25 = arith.subf %1, %24 : vector<16x128xf32>
    %26 = math.absf %25 : vector<16x128xf32>
    %c1_i32_10 = arith.constant 1 : i32
    %27 = tpu.dynamic_rotate %3 by %c1_i32_10 dim 0 : vector<16x128xf32>, i32 -> vector<16x128xf32>
    %28 = arith.subf %3, %27 : vector<16x128xf32>
    %29 = math.absf %28 : vector<16x128xf32>
    %c1_i32_11 = arith.constant 1 : i32
    %30 = tpu.dynamic_rotate %29 by %c1_i32_11 dim 0 : vector<16x128xf32>, i32 -> vector<16x128xf32>
    %31 = arith.addf %29, %30 : vector<16x128xf32>
    %c15_i32_12 = arith.constant 15 : i32
    %32 = tpu.dynamic_rotate %29 by %c15_i32_12 dim 0 : vector<16x128xf32>, i32 -> vector<16x128xf32>
    %33 = arith.addf %31, %32 : vector<16x128xf32>
    %c1_i32_13 = arith.constant 1 : i32
    %34 = tpu.dynamic_rotate %33 by %c1_i32_13 dim 1 : vector<16x128xf32>, i32 -> vector<16x128xf32>
    %35 = arith.addf %33, %34 : vector<16x128xf32>
    %c127_i32_14 = arith.constant 127 : i32
    %36 = tpu.dynamic_rotate %33 by %c127_i32_14 dim 1 : vector<16x128xf32>, i32 -> vector<16x128xf32>
    %37 = arith.addf %35, %36 : vector<16x128xf32>
    %cst_15 = arith.constant 0.111111112 : f32
    %38 = vector.broadcast %cst_15 : f32 to vector<16x128xf32>
    %39 = arith.mulf %37, %38 : vector<16x128xf32>
    %cst_16 = arith.constant -1.000000e+01 : f32
    %40 = vector.broadcast %cst_16 : f32 to vector<16x128xf32>
    %41 = arith.mulf %40, %39 : vector<16x128xf32>
    %42 = math.exp %41 : vector<16x128xf32>
    %43 = arith.mulf %26, %42 : vector<16x128xf32>
    %44 = arith.addf %23, %43 : vector<16x128xf32>
    %45 = vector.shape_cast %44 : vector<16x128xf32> to vector<1x16x128xf32>
    %cst_17 = arith.constant dense<0.000000e+00> : vector<1xf32>
    %46 = vector.multi_reduction <add>, %45, %cst_17 [1, 2] : vector<1x16x128xf32> to vector<1xf32>
    %47 = vector.shape_cast %46 : vector<1xf32> to vector<1x1x1xf32>
    %48 = vector.extract %47[0, 0, 0] : f32 from vector<1x1x1xf32>
    %49 = vector.broadcast %48 : f32 to vector<1x128xf32>
    %c0_18 = arith.constant 0 : index
    %c0_19 = arith.constant 0 : index
    %c0_20 = arith.constant 0 : index
    %50 = vector.load %arg3[%c0_18, %c0_19, %c0_20] : memref<1x1x128xf32, #tpu.memory_space<vmem>>, vector<1x1x128xf32>
    %51 = vector.shape_cast %50 : vector<1x1x128xf32> to vector<1x128xf32>
    %52 = vector.shape_cast %49 : vector<1x128xf32> to vector<1x1x128xf32>
    tpu.vector_store %arg3[%c0_18, %c0_19, %c0_20], %52 {strides = array<i32>} : memref<1x1x128xf32, #tpu.memory_space<vmem>>, vector<1x1x128xf32>,
    return
  }
  func.func @transform_0(%arg0: i32) -> (i32, i32, i32) {
    %c0_i32 = arith.constant 0 : i32
    %c0_i32_0 = arith.constant 0 : i32
    %c0_i32_1 = arith.constant 0 : i32
    return %arg0, %c0_i32, %c0_i32_0 : i32, i32, i32
  }
  func.func @transform_1(%arg0: i32) -> (i32, i32, i32) {
    %c0_i32 = arith.constant 0 : i32
    %c0_i32_0 = arith.constant 0 : i32
    %c0_i32_1 = arith.constant 0 : i32
    return %arg0, %c0_i32, %c0_i32_0 : i32, i32, i32
  }
  func.func @transform_2(%arg0: i32) -> (i32, i32, i32) {
    %c0_i32 = arith.constant 0 : i32
    %c0_i32_0 = arith.constant 0 : i32
    %c0_i32_1 = arith.constant 0 : i32
    return %arg0, %c0_i32, %c0_i32_0 : i32, i32, i32
  }
}

</mosaic_0001>

<bundles_post_ra>
// kernel: enhance_loss.3
= control target key start
LH: loop header
LB: loop body
LE: loop exit
PB: predicated region body
PF: predicated region fallthrough
CT: control target
= control target key end

     0   :  { %vm43_vm0 = vcmask 1043456   ;;  %vm116_vm1 = vcmask 1040384   ;;  %vm118_vm2 = vcmask 1041408   ;;  %vm120_vm3 = vcmask 1042432   ;;  %s254_s0 = inlined_call_operand.vmem [shape: f32[12,128], index: 0, kind: input, shape index: {}, may-alias: {0,7}]   ;;  %s255_s1 = inlined_call_operand.vmem [shape: f32[12,128], index: 1, kind: input, shape index: {}, may-alias: {1,9}]   ;;  %s256_s2 = inlined_call_operand.vmem [shape: f32[12,128], index: 2, kind: input, shape index: {}]   ;;  %s257_s3 = inlined_call_operand.vmem [shape: f32[12,128], index: 3, kind: input, shape index: {}]   ;;  %s258_s4 = inlined_call_operand.vmem [shape: f32[12,128], index: 4, kind: input, shape index: {}]   ;;  %s259_s5 = inlined_call_operand.vmem [shape: f32[12,128], index: 5, kind: input, shape index: {}]   ;;  %s260_s6 = inlined_call_operand.vmem [shape: f32[12,128], index: 6, kind: input, shape index: {}]   ;;  %s261_s7 = inlined_call_operand.vmem [shape: f32[12,128], index: 7, kind: input, shape index: {}, may-alias: {0,7}]   ;;  %s262_s8 = inlined_call_operand.vmem [shape: f32[12,128], index: 8, kind: input, shape index: {}]   ;;  %s263_s9 = inlined_call_operand.vmem [shape: f32[12,128], index: 9, kind: input, shape index: {}, may-alias: {1,9}]   ;;  %s264_s10 = inlined_call_operand.vmem [shape: f32[1,8,128], index: 10, kind: output, shape index: {}]  }
   0x1   :  { %v35_v0 = vld [vmem:[%s254_s0] sm:$0xff]  ;;  %v36_v1 = vld [vmem:[%s254_s0 + $0x8] sm:$0xf]  ;;  %vm123_vm4 = vcmask 1044480  }
   0x2   :  { %v37_v2 = vld [vmem:[%s255_s1] sm:$0xff]  ;;  %v38_v3 = vld [vmem:[%s255_s1 + $0x8] sm:$0xf] }
   0x3   :  { %v39_v4 = vsub.f32 %v35_v0, %v37_v2  ;;  %v52_v5 = vld [vmem:[%s256_s2] sm:$0xff]  ;;  %v53_v6 = vld [vmem:[%s256_s2 + $0x8] sm:$0xf]  ;;  %v40_v7 = vsub.f32 %v36_v1, %v38_v3 }
   0x4   :  { %v54_v8 = vld [vmem:[%s257_s3] sm:$0xff]  ;;  %v55_v9 = vld [vmem:[%s257_s3 + $0x8] sm:$0xf] }
   0x5   :  { %v68_v10 = vld [vmem:[%s258_s4] sm:$0xff]  ;;  %v41_v11 = vmul.f32 %v39_v4, %v39_v4  ;;  %v56_v12 = vsub.f32 %v52_v5, %v54_v8  ;;  %v57_v13 = vsub.f32 %v53_v6, %v55_v9  ;;  %v69_v14 = vld [vmem:[%s258_s4 + $0x8] sm:$0xf]  ;;  %v42_v17 = vmul.f32 %v40_v7, %v40_v7 }
   0x6   :  { %v70_v15 = vld [vmem:[%s259_s5] sm:$0xff]  ;;  %v71_v16 = vld [vmem:[%s259_s5 + $0x8] sm:$0xf] }
   0x7   :  { %v72_v18 = vsub.f32 %v68_v10, %v70_v15  ;;  %v73_v19 = vsub.f32 %v69_v14, %v71_v16  ;;  %v84_v20 = vld [vmem:[%s260_s6] sm:$0xff]  ;;  %v85_v21 = vld [vmem:[%s260_s6 + $0x8] sm:$0xf]  ;;  %v58_v23 = vmul.f32 %v56_v12, %v56_v12  ;;  %v59_v24 = vmul.f32 %v57_v13, %v57_v13 }
   0x8   :  { %v86_v22 = vld [vmem:[%s261_s7] sm:$0xff]  ;;  %v87_v25 = vld [vmem:[%s261_s7 + $0x8] sm:$0xf]  ;;  %v44_v29 = vsel %vm43_vm0, %v42_v17, 0.0 }
   0x9   :  { %v88_v26 = vsub.f32 %v84_v20, %v86_v22  ;;  %v100_v27 = vld [vmem:[%s262_s8] sm:$0xff]  ;;  %v101_v28 = vld [vmem:[%s262_s8 + $0x8] sm:$0xf]  ;;  %v74_v30 = vmul.f32 %v72_v18, %v72_v18  ;;  %v75_v31 = vmul.f32 %v73_v19, %v73_v19  ;;  %v89_v32 = vsub.f32 %v85_v21, %v87_v25 }
   0xa   :  { %v102_v33 = vld [vmem:[%s263_s9] sm:$0xff]  ;;  %v103_v34 = vld [vmem:[%s263_s9 + $0x8] sm:$0xf]  ;;  %v45_v35 = vadd.f32 %v44_v29, %v41_v11  ;;  %v60_v36 = vsel %vm43_vm0, %v59_v24, 0.0 }
   0xb   :  { %v90_v37 = vmul.f32 %v88_v26, %v88_v26  ;;  %v104_v38 = vsub.f32 %v100_v27, %v102_v33  ;;  %v61_v39 = vadd.f32 %v60_v36, %v58_v23  ;;  %v76_v40 = vsel %vm43_vm0, %v75_v31, 0.0 }
   0xc   :  { %v91_v41 = vmul.f32 %v89_v32, %v89_v32  ;;  %v105_v42 = vsub.f32 %v101_v28, %v103_v34  ;;  %v46_v43 = vrot.slane %v45_v35, 4  ;;  %v77_v44 = vadd.f32 %v76_v40, %v74_v30 }
   0xd   :  { %v106_v45 = vmul.f32 %v104_v38, %v104_v38  ;;  %v62_v46 = vrot.slane %v61_v39, 4 }
   0xe   :  { %v92_v47 = vsel %vm43_vm0, %v91_v41, 0.0  ;;  %v107_v48 = vmul.f32 %v105_v42, %v105_v42  ;;  %v47_v49 = vadd.f32 %v46_v43, %v45_v35  ;;  %v78_v50 = vrot.slane %v77_v44, 4 }
   0xf   :  { %v93_v51 = vadd.f32 %v92_v47, %v90_v37  ;;  %v63_v52 = vadd.f32 %v62_v46, %v61_v39 }
  0x10   :  { %v108_v53 = vsel %vm43_vm0, %v107_v48, 0.0  ;;  %v48_v54 = vrot.slane %v47_v49, 2  ;;  %v79_v55 = vadd.f32 %v78_v50, %v77_v44 }
  0x11   :  { %v94_v56 = vrot.slane %v93_v51, 4  ;;  %v109_v57 = vadd.f32 %v108_v53, %v106_v45  ;;  %v64_v58 = vrot.slane %v63_v52, 2 }
  0x12   :  { %v49_v59 = vadd.f32 %v48_v54, %v47_v49  ;;  %v80_v60 = vrot.slane %v79_v55, 2 }
  0x13   :  { %v95_v61 = vadd.f32 %v94_v56, %v93_v51  ;;  %v110_v62 = vrot.slane %v109_v57, 4  ;;  %v65_v63 = vadd.f32 %v64_v58, %v63_v52 }
  0x14   :  { %v50_v0 = vrot.slane %v49_v59, 1  ;;  %v81_v1 = vadd.f32 %v80_v60, %v79_v55 }
  0x15   :  { %v96_v2 = vrot.slane %v95_v61, 2  ;;  %v111_v3 = vadd.f32 %v110_v62, %v109_v57  ;;  %v66_v4 = vrot.slane %v65_v63, 1 }
  0x16   :  { %v51_v5 = vadd.f32 %v50_v0, %v49_v59  ;;  %v82_v6 = vrot.slane %v81_v1, 1 }
  0x17   :  { %v97_v7 = vadd.f32 %v96_v2, %v95_v61  ;;  %v112_v8 = vrot.slane %v111_v3, 2  ;;  %v67_v9 = vadd.f32 %v66_v4, %v65_v63 }
  0x18   :  { %v83_v10 = vadd.f32 %v82_v6, %v81_v1 }
  0x19   :  { %v98_v11 = vrot.slane %v97_v7, 1  ;;  %v113_v12 = vadd.f32 %v112_v8, %v111_v3  ;;  %v117_v13 = vsel %vm116_vm1, %v51_v5, %v67_v9 }
  0x1a   :  { %v119_v16 = vsel %vm118_vm2, %v117_v13, %v83_v10 }
  0x1b   :  { %v99_v14 = vadd.f32 %v98_v11, %v97_v7  ;;  %v114_v15 = vrot.slane %v113_v12, 1 }
  0x1d   :  { %v115_v17 = vadd.f32 %v114_v15, %v113_v12  ;;  %v121_v18 = vsel %vm120_vm3, %v119_v16, %v99_v14 }
  0x1f   :  { %v122_v19 = vsel %vm43_vm0, %v121_v18, %v115_v17 }
  0x20   :  { %v124_v20 = vsel %vm123_vm4, %v122_v19, 0.0 }
  0x21   :  { %125 = vst [vmem:[%s264_s10] sm:$0xff] %v124_v20 }

// kernel: enhance_loss.4
= control target key start
LH: loop header
LB: loop body
LE: loop exit
PB: predicated region body
PF: predicated region fallthrough
CT: control target
= control target key end

     0   :  { %7 = vsyncpa [#allocation3], 0  ;;  %s2927_s0 = inlined_call_operand.hbm [shape: f32[12,24,128], index: 0, kind: input, shape index: {}]   ;;  %s2928_s1 = inlined_call_operand.hbm [shape: f32[12,24,128], index: 1, kind: input, shape index: {}]   ;;  %s2929_s2 = inlined_call_operand.hbm [shape: f32[12,1,128], index: 2, kind: output, shape index: {}]  }
   0x1   :  { %9 = vsyncpa [#allocation3 + $0x1], 0 }
   0x2   :  { %10 = vsyncpa [#allocation6], 0 }
   0x3   :  { %12 = vsyncpa [#allocation6 + $0x1], 0 }
   0x4   :  { %13 = vsyncpa [#allocation4], 0 }
   0x5   :  { %15 = vsyncpa [#allocation4 + $0x1], 0  ;;  %s1655_s9 = smov 0   ;;  %s1657_s10 = smov 0  }
   0x6   :  { %s1659_s11 = smov 0   ;;  %s1661_s12 = smov 0  }
   0x7 LB: > { %s1676_s13 = sadd.s32 4294967295, %s1623_s12   ;;  %s1410_s14 = sadd.s32 4294967294, %s1623_s12   ;;  %s1623_s12 = sphi %s1661_s12, %s2990_s12   ;;  %s1619_s11 = sphi %s1659_s11, %s2989_s11   ;;  %s1615_s10 = sphi %s1657_s10, %s2988_s10   ;;  %s1611_s9 = sphi %s1655_s9, %s2987_s9  }
   0x8   : > { %s1680_s15 = sadd.s32 1, %s1623_s12   ;;  %s28_s16 = sadd.s32 1, %s1619_s11 }
   0x9   : > { %s25_s17 = ssub.s32 %s1623_s12, %s1680_s15  ;;  %p35_p0 = scmp.ne.s32.totalorder %s1619_s11, %s1615_s10 }
   0xa   : > { %p26_p1 = scmp.eq.s32.totalorder %s25_s17, 0  ;;  %p36_p2 = scmp.eq.s32.totalorder %s1623_s12, 0 }
   0xb   : > { %p41_p3 = scmp.ne.s32.totalorder %s1615_s10, %s1611_s9  ;;  %p42_p4 = scmp.eq.s32.totalorder %s1676_s13, 0 }
   0xc   : > { %s1692_s18 = scalar_select %p26_p1, %s1619_s11, %s28_s16  }
   0xd   : > { %p37_p5 = por %p36_p2, %p35_p0  ;;  %p1694_p6 = por %p42_p4, %p41_p3 }
   0xe   : > { %p91_p7 = scmp.eq.s32.totalorder %s1676_s13, 11  ;;  %p97_p8 = scmp.eq.s32.totalorder %s1410_s14, 11 }
   0xf   : > { %s2933_s19 = scalar_select %p1694_p6, 1, 0 }
  0x10   : > { %p1443_p9 = scmp.lt.s32.totalorder %s1623_s12, 12  ;;  %p1700_p10 = por %p91_p7, %p35_p0 }
  0x11   : > { %p1704_p11 = por %p97_p8, %p41_p3  ;;  %s1709_s22 = sand.u32 1, %s1619_s11  }
  0x12   : > { %s2934_s20 = scalar_select %p1700_p10, 1, 0 }
  0x13   : > { %s2935_s21 = scalar_select %p1704_p11, 1, 0 }
  0x14   : > { %s1420_s23 = smul.u32 384, %s1623_s12  ;;  %p1720_p12 = pnand %p1443_p9, %p37_p5 }
  0x15   : > { %s1419_s24 = smul.u32 24, %s1709_s22  ;;  %s118_s3 = scalar_lea.sflag [#allocation3], %s1709_s22 }
  0x16   : > { %s1718_s27 = scalar_lea.hbm %s2927_s0, %s1420_s23  ;;  %p1495_p0 = pneg %p1720_p12 }
  0x17   : > { %s121_s29 = scalar_lea.vmem [#allocation2], %s1419_s24  ;;  %s1493_s4 = scalar_lea.hbm %s1718_s27, 384 }
  0x18   : > { %s128_s30 = sshll.u32 %s121_s29, 4  ;;  %p1494_p13 = scmp.ne.s32.totalorder %s1718_s27, %s1493_s4  ;;  %s1726_s30 = int_to_ptr.vmem [resolvable:$true] %s128_s30 }
  0x19   : > { %s1498_s7 = scalar_lea.hbm %s2927_s0, 4608  ;;  %p1499_p3 = scmp.lt.u32.totalorder %s1718_s27, %s2927_s0 }
  0x1a   : > { %p1496_p1 = pnand %p1495_p0, %p1494_p13  ;;  %p1500_p4 = scmp.lt.u32.totalorder %s1498_s7, %s1493_s4 }
  0x1b   : > { %p1502_p7 = scmp.lt.u32.totalorder %s1493_s4, %s1718_s27 }
  0x1c   : > { %p1497_p2 = pneg %p1496_p1  ;;  %p1501_p5 = por %p1500_p4, %p1499_p3 }
  0x1e   : > { %p1503_p8 = por %p1502_p7, %p1501_p5 }
  0x20   : > { %p1504_p9 = pnand %p1503_p8, %p1497_p2 }
  0x22   : > { %1507 = shalt.err (!%p1504_p9)
}
  0x23   : > { %s1508_s16 = scalar_lea.vmem %s1726_s30, 384  ;;  %s1625_s17 = smov [#allocation2]  }
  0x24   : > { %p1509_p13 = scmp.ne.s32.totalorder %s1726_s30, %s1508_s16  ;;  %s1513_s25 = sshll.u32 %s1625_s17, 4  ;;  %s1514_s25 = int_to_ptr.vmem [resolvable:$false] %s1513_s25 }
  0x25   : > { %s1515_s26 = scalar_lea.vmem %s1514_s25, 768  ;;  %p1516_p10 = scmp.lt.s32.totalorder %s1726_s30, %s1514_s25 }
  0x26   : > { %p1511_p1 = pnand %p1509_p13, %p1495_p0  ;;  %p1517_p3 = scmp.lt.s32.totalorder %s1515_s26, %s1508_s16 }
  0x28   : > { %p1512_p11 = pneg %p1511_p1  ;;  %p1518_p4 = por %p1517_p3, %p1516_p10 }
  0x2a   : > { %p1519_p5 = pnand %p1518_p4, %p1512_p11 }
  0x2c   : > { %1522 = shalt.err (!%p1519_p5)
}
  0x2d   : > { %s1626_s29 = smov 128   ;;  %s1627_s4 = smov 8  }
  0x2e   : > { %1435 = dma.hbm_to_vmem [thread:$0]  (!%p1720_p12), %s1718_s27, 384, %s1726_s30, %s118_s3, %s1626_s29, %s1626_s29, %s1627_s4  }
  0x2f   : > { %p1415_p10 = scmp.ge.s32.totalorder %s1623_s12, 1  ;;  %p157_p11 = scmp.lt.s32.totalorder %s1623_s12, 13 }
  0x30   : > { %s1770_s8 = scalar_lea.hbm %s2928_s1, %s1420_s23  ;;  %s142_s14 = scalar_lea.vmem [#allocation5], %s1419_s24 }
  0x31   : > { %p1761_p2 = pnand %p1415_p10, %p157_p11  ;;  %s149_s16 = sshll.u32 %s142_s14, 4  ;;  %s1774_s16 = int_to_ptr.vmem [resolvable:$true] %s149_s16 }
  0x32   : > { %s139_s27 = scalar_lea.sflag [#allocation6], %s1709_s22  ;;  %s1523_s30 = scalar_lea.hbm %s1770_s8, 384 }
  0x33   : > { %p1524_p7 = scmp.ne.s32.totalorder %s1770_s8, %s1523_s30  ;;  %s1528_s23 = scalar_lea.hbm %s2928_s1, 4608 }
  0x34   : > { %p1529_p13 = scmp.lt.u32.totalorder %s1770_s8, %s2928_s1  ;;  %p1530_p1 = scmp.lt.u32.totalorder %s1528_s23, %s1523_s30 }
  0x35   : > { %p1526_p8 = pnand %p1524_p7, %p1495_p0  ;;  %p1532_p4 = scmp.lt.u32.totalorder %s1523_s30, %s1770_s8 }
  0x36   : > { %p1531_p3 = por %p1530_p1, %p1529_p13 }
  0x37   : > { %p1527_p9 = pneg %p1526_p8 }
  0x38   : > { %p1533_p5 = por %p1532_p4, %p1531_p3 }
  0x3a   : > { %p1534_p10 = pnand %p1533_p5, %p1527_p9 }
  0x3c   : > { %1537 = shalt.err (!%p1534_p10)
}
  0x3d   : > { %s1538_s24 = scalar_lea.vmem %s1774_s16, 384  ;;  %s1628_s6 = smov [#allocation5]  }
  0x3e   : > { %p1539_p11 = scmp.ne.s32.totalorder %s1774_s16, %s1538_s24  ;;  %s1543_s7 = sshll.u32 %s1628_s6, 4  ;;  %s1544_s7 = int_to_ptr.vmem [resolvable:$false] %s1543_s7 }
  0x3f   : > { %s1545_s14 = scalar_lea.vmem %s1544_s7, 768  ;;  %p1546_p6 = scmp.lt.s32.totalorder %s1774_s16, %s1544_s7 }
  0x40   : > { %p1541_p7 = pnand %p1539_p11, %p1495_p0  ;;  %p1547_p13 = scmp.lt.s32.totalorder %s1545_s14, %s1538_s24 }
  0x42   : > { %p1542_p8 = pneg %p1541_p7  ;;  %p1548_p1 = por %p1547_p13, %p1546_p6 }
  0x44   : > { %p1549_p3 = pnand %p1548_p1, %p1542_p8 }
  0x46   : > { %1552 = shalt.err (!%p1549_p3)
}
  0x47   : > { %1438 = dma.hbm_to_vmem [thread:$0]  (!%p1720_p12), %s1770_s8, 384, %s1774_s16, %s139_s27, %s1626_s29, %s1626_s29, %s1627_s4  }
  0x48   : > { %161 = sbr.rel (%p1761_p2) target bundleno = 757 (0x2f5), region = 28 }
  0x4f   : > { %s1808_s30 = sand.u32 1, %s1615_s10   ;;  %p2938_p6 = scmp.ne.s32.totalorder %s2933_s19, 0 }
  0x50   : > { %s1423_s3 = smul.u32 24, %s1808_s30  ;;  %s164_s17 = scalar_lea.sflag [#allocation3], %s1808_s30 }
  0x52   : > { %s167_s28 = scalar_lea.vmem [#allocation2], %s1423_s3 }
  0x53   : > { %1598 = dma.done.wait (%p2938_p6), %s164_s17, 384  }
  0x54   : > { %1600 = vsyncadd (%p2938_p6), %s164_s17, 4294966912  ;;  %s173_s22 = scalar_lea.sflag [#allocation6], %s1808_s30  ;;  %s1817_s29 = scalar_lea.vmem [#allocation5], %s1423_s3 }
  0x55   : > { %1602 = dma.done.wait (%p2938_p6), %s173_s22, 384  }
  0x56   : > { %1604 = vsyncadd (%p2938_p6), %s173_s22, 4294966912  ;;  %v1823_v0 = vld [vmem:[%s167_s28 + $0x10] sm:$0xff]  ;;  %v1825_v1 = vld [vmem:[%s167_s28] sm:$0xff]  ;;  %s1629_s4 = smov 1   ;;  %s1630_s5 = smov 127  }
  0x57   : > { %214 = vrot.lane.b32.xlu1 %v1823_v0, %s1629_s4  ;;  %210 = vrot.lane.b32.xlu0 %v1825_v1, %s1629_s4  ;;  %v1831_v2 = vld [vmem:[%s167_s28 + $0x8] sm:$0xff]  ;;  %s1631_s19 = smov 2   ;;  %s1632_s8 = smov 126   ;;  %v1890_v3 = vld [vmem:[%s1817_s29 + $0x8] sm:$0xff]  ;;  %v1928_v7 = vmul.f32 %v1825_v1, %v1825_v1  ;;  %v1936_v8 = vmul.f32 %v1823_v0, %v1823_v0 }
  0x58   : > { %s1633_s16 = smov 3   ;;  %s1634_s27 = smov 125   ;;  %v1893_v4 = vld [vmem:[%s1817_s29] sm:$0xff]  ;;  %v1900_v5 = vld [vmem:[%s1817_s29 + $0x10] sm:$0xff]  ;;  %v1924_v6 = vmul.f32 %v1831_v2, %v1831_v2  ;;  %v1948_v9 = vmul.f32 %v1890_v3, %v1890_v3 }
  0x59   : > { %s1635_s23 = smov 4   ;;  %s1636_s25 = smov 124   ;;  %v1952_v10 = vmul.f32 %v1893_v4, %v1893_v4  ;;  %v1960_v11 = vmul.f32 %v1900_v5, %v1900_v5 }
  0x5a   : > { %s1637_s26 = smov 5   ;;  %s1638_s24 = smov 123   ;;  %2939 = vst [vmem:[#allocation11_spill] sm:$0xff] %v1948_v9 }
  0x5b   : > { %216 = vrot.lane.b32.xlu1 %v1825_v1, %s1630_s5  ;;  %212 = vrot.lane.b32.xlu0 %v1831_v2, %s1629_s4  ;;  %s200_s6 = scalar_lea.vmem [#allocation7], %s1808_s30  ;;  %s1416_s14 = sshll.u32 %s1676_s13, 4 }
  0x5c   : > { %s1321_s7 = sshll.u32 %s200_s6, 4  ;;  %s2886_s22 = scalar_lea.hbm %s2929_s2, %s1416_s14  ;;  %s2881_s7 = int_to_ptr.vmem [resolvable:$true] %s1321_s7 }
  0x5d   : > { %s1309_s29 = scalar_lea.sflag [#allocation4], %s1808_s30  ;;  %p2985_p0 = scmp.ne.s32.totalorder %s2934_s20, 0 }
  0x5e   : > { %s1639_s13 = smov [#allocation7]  }
  0x5f   : > { %220 = vrot.lane.b32.xlu1 %v1823_v0, %s1630_s5  ;;  %218 = vrot.lane.b32.xlu0 %v1831_v2, %s1630_s5 }
  0x63   : > { %233 = vrot.lane.b32.xlu1 %v1831_v2, %s1631_s19  ;;  %231 = vrot.lane.b32.xlu0 %v1825_v1, %s1631_s19 }
  0x67   : > { %237 = vrot.lane.b32.xlu1 %v1825_v1, %s1632_s8  ;;  %235 = vrot.lane.b32.xlu0 %v1823_v0, %s1631_s19 }
  0x6b   : > { %241 = vrot.lane.b32.xlu1 %v1823_v0, %s1632_s8  ;;  %239 = vrot.lane.b32.xlu0 %v1831_v2, %s1632_s8 }
  0x6f   : > { %254 = vrot.lane.b32.xlu1 %v1831_v2, %s1633_s16  ;;  %252 = vrot.lane.b32.xlu0 %v1825_v1, %s1633_s16 }
  0x73   : > { %258 = vrot.lane.b32.xlu1 %v1825_v1, %s1634_s27  ;;  %256 = vrot.lane.b32.xlu0 %v1823_v0, %s1633_s16 }
  0x77   : > { %262 = vrot.lane.b32.xlu1 %v1823_v0, %s1634_s27  ;;  %260 = vrot.lane.b32.xlu0 %v1831_v2, %s1634_s27 }
  0x7b   : > { %275 = vrot.lane.b32.xlu1 %v1831_v2, %s1635_s23  ;;  %273 = vrot.lane.b32.xlu0 %v1825_v1, %s1635_s23 }
  0x7f   : > { %279 = vrot.lane.b32.xlu1 %v1825_v1, %s1636_s25  ;;  %277 = vrot.lane.b32.xlu0 %v1823_v0, %s1635_s23 }
  0x83   : > { %283 = vrot.lane.b32.xlu1 %v1823_v0, %s1636_s25  ;;  %281 = vrot.lane.b32.xlu0 %v1831_v2, %s1636_s25 }
  0x87   : > { %296 = vrot.lane.b32.xlu1 %v1831_v2, %s1637_s26  ;;  %294 = vrot.lane.b32.xlu0 %v1825_v1, %s1637_s26 }
  0x8b   : > { %300 = vrot.lane.b32.xlu1 %v1825_v1, %s1638_s24  ;;  %298 = vrot.lane.b32.xlu0 %v1823_v0, %s1637_s26 }
  0x8f   : > { %304 = vrot.lane.b32.xlu1 %v1823_v0, %s1638_s24  ;;  %302 = vrot.lane.b32.xlu0 %v1831_v2, %s1638_s24 }
  0x93   : > { %419 = vrot.lane.b32.xlu1 %v1890_v3, %s1629_s4  ;;  %417 = vrot.lane.b32.xlu0 %v1893_v4, %s1629_s4 }
  0x97   : > { %423 = vrot.lane.b32.xlu1 %v1893_v4, %s1630_s5  ;;  %421 = vrot.lane.b32.xlu0 %v1900_v5, %s1629_s4 }
  0x9b   : > { %427 = vrot.lane.b32.xlu1 %v1900_v5, %s1630_s5  ;;  %425 = vrot.lane.b32.xlu0 %v1890_v3, %s1630_s5 }
  0x9f   : > { %440 = vrot.lane.b32.xlu1 %v1890_v3, %s1631_s19  ;;  %438 = vrot.lane.b32.xlu0 %v1893_v4, %s1631_s19 }
  0xa3   : > { %444 = vrot.lane.b32.xlu1 %v1893_v4, %s1632_s8  ;;  %442 = vrot.lane.b32.xlu0 %v1900_v5, %s1631_s19 }
  0xa7   : > { %448 = vrot.lane.b32.xlu1 %v1900_v5, %s1632_s8  ;;  %446 = vrot.lane.b32.xlu0 %v1890_v3, %s1632_s8 }
  0xab   : > { %620 = vrot.lane.b32.xlu1 %v1924_v6, %s1629_s4  ;;  %618 = vrot.lane.b32.xlu0 %v1928_v7, %s1629_s4 }
  0xaf   : > { %624 = vrot.lane.b32.xlu1 %v1928_v7, %s1630_s5  ;;  %622 = vrot.lane.b32.xlu0 %v1936_v8, %s1629_s4 }
  0xb3   : > { %628 = vrot.lane.b32.xlu1 %v1936_v8, %s1630_s5  ;;  %626 = vrot.lane.b32.xlu0 %v1924_v6, %s1630_s5 }
  0xb7   : > { %827 = vrot.lane.b32.xlu1 %v1948_v9, %s1629_s4  ;;  %825 = vrot.lane.b32.xlu0 %v1952_v10, %s1629_s4 }
  0xbb   : > { %831 = vrot.lane.b32.xlu1 %v1952_v10, %s1630_s5  ;;  %829 = vrot.lane.b32.xlu0 %v1960_v11, %s1629_s4 }
  0xbf   : > { %835 = vrot.lane.b32.xlu1 %v1960_v11, %s1630_s5  ;;  %833 = vrot.lane.b32.xlu0 %v1948_v9, %s1630_s5 }
  0xc3   : > { %461 = vrot.lane.b32.xlu1 %v1890_v3, %s1633_s16  ;;  %459 = vrot.lane.b32.xlu0 %v1893_v4, %s1633_s16 }
  0xc7   : > { %465 = vrot.lane.b32.xlu1 %v1893_v4, %s1634_s27  ;;  %463 = vrot.lane.b32.xlu0 %v1900_v5, %s1633_s16 }
  0xc9   : > { %v1978_v12 = vpop.permute.xlu1 %214  ;;  %v1980_v13 = vpop.permute.xlu0 %210 }
  0xcb   : > { %469 = vrot.lane.b32.xlu1 %v1900_v5, %s1634_s27  ;;  %467 = vrot.lane.b32.xlu0 %v1890_v3, %s1634_s27 }
  0xcd   : > { %v1986_v14 = vpop.permute.xlu1 %216  ;;  %v1988_v15 = vpop.permute.xlu0 %212 }
  0xcf   : > { %641 = vrot.lane.b32.xlu1 %v1924_v6, %s1631_s19  ;;  %639 = vrot.lane.b32.xlu0 %v1928_v7, %s1631_s19 }
  0xd1   : > { %v1994_v16 = vpop.permute.xlu1 %220  ;;  %v1996_v17 = vpop.permute.xlu0 %218 }
  0xd3   : > { %645 = vrot.lane.b32.xlu1 %v1928_v7, %s1632_s8  ;;  %643 = vrot.lane.b32.xlu0 %v1936_v8, %s1631_s19 }
  0xd5   : > { %v2002_v18 = vpop.permute.xlu1 %233  ;;  %v2004_v19 = vpop.permute.xlu0 %231 }
  0xd6   : > { %2940 = vst [vmem:[#allocation12_spill] sm:$0xff] %v2002_v18 }
  0xd7   : > { %649 = vrot.lane.b32.xlu1 %v1936_v8, %s1632_s8  ;;  %647 = vrot.lane.b32.xlu0 %v1924_v6, %s1632_s8 }
  0xd9   : > { %v2010_v20 = vpop.permute.xlu1 %237  ;;  %v2012_v21 = vpop.permute.xlu0 %235 }
  0xdb   : > { %848 = vrot.lane.b32.xlu1 %v1948_v9, %s1631_s19  ;;  %846 = vrot.lane.b32.xlu0 %v1952_v10, %s1631_s19 }
  0xdd   : > { %v2018_v22 = vpop.permute.xlu1 %241  ;;  %v2020_v23 = vpop.permute.xlu0 %239 }
  0xde   : > { %2941 = vst [vmem:[#allocation13_spill] sm:$0xff] %v2020_v23 }
  0xdf   : > { %852 = vrot.lane.b32.xlu1 %v1952_v10, %s1632_s8  ;;  %850 = vrot.lane.b32.xlu0 %v1960_v11, %s1631_s19 }
  0xe1   : > { %v2026_v24 = vpop.permute.xlu1 %254  ;;  %v2028_v25 = vpop.permute.xlu0 %252 }
  0xe2   : > { %2942 = vst [vmem:[#allocation14_spill] sm:$0xff] %v2026_v24  ;;  %2943 = vst [vmem:[#allocation15_spill] sm:$0xff] %v2028_v25 }
  0xe3   : > { %856 = vrot.lane.b32.xlu1 %v1960_v11, %s1632_s8  ;;  %854 = vrot.lane.b32.xlu0 %v1948_v9, %s1632_s8 }
  0xe5   : > { %v2034_v26 = vpop.permute.xlu1 %258  ;;  %v2036_v27 = vpop.permute.xlu0 %256 }
  0xe6   : > { %2944 = vst [vmem:[#allocation16_spill] sm:$0xff] %v2034_v26  ;;  %2945 = vst [vmem:[#allocation17_spill] sm:$0xff] %v2036_v27 }
  0xe7   : > { %482 = vrot.lane.b32.xlu1 %v1890_v3, %s1635_s23  ;;  %480 = vrot.lane.b32.xlu0 %v1893_v4, %s1635_s23 }
  0xe9   : > { %v2042_v28 = vpop.permute.xlu1 %262  ;;  %v2044_v29 = vpop.permute.xlu0 %260 }
  0xea   : > { %2946 = vst [vmem:[#allocation18_spill] sm:$0xff] %v2042_v28  ;;  %2947 = vst [vmem:[#allocation19_spill] sm:$0xff] %v2044_v29  ;;  %v2228_v29 = vmul.f32 %v1900_v5, %v1823_v0 }
  0xeb   : > { %486 = vrot.lane.b32.xlu1 %v1893_v4, %s1636_s25  ;;  %484 = vrot.lane.b32.xlu0 %v1900_v5, %s1635_s23 }
  0xed   : > { %v2050_v30 = vpop.permute.xlu1 %275  ;;  %v2052_v31 = vpop.permute.xlu0 %273 }
  0xee   : > { %2948 = vst [vmem:[#allocation20_spill] sm:$0xff] %v2050_v30  ;;  %2949 = vst [vmem:[#allocation21_spill] sm:$0xff] %v2052_v31 }
  0xef   : > { %490 = vrot.lane.b32.xlu1 %v1900_v5, %s1636_s25  ;;  %488 = vrot.lane.b32.xlu0 %v1890_v3, %s1636_s25 }
  0xf1   : > { %v2058_v32 = vpop.permute.xlu1 %279  ;;  %v2060_v33 = vpop.permute.xlu0 %277 }
  0xf2   : > { %2950 = vst [vmem:[#allocation22_spill] sm:$0xff] %v2058_v32  ;;  %2951 = vst [vmem:[#allocation23_spill] sm:$0xff] %v2060_v33 }
  0xf3   : > { %662 = vrot.lane.b32.xlu1 %v1924_v6, %s1633_s16  ;;  %660 = vrot.lane.b32.xlu0 %v1928_v7, %s1633_s16 }
  0xf5   : > { %v2066_v34 = vpop.permute.xlu1 %283  ;;  %v2068_v35 = vpop.permute.xlu0 %281 }
  0xf6   : > { %2952 = vst [vmem:[#allocation24_spill] sm:$0xff] %v2066_v34  ;;  %2953 = vst [vmem:[#allocation25_spill] sm:$0xff] %v2068_v35 }
  0xf7   : > { %666 = vrot.lane.b32.xlu1 %v1928_v7, %s1634_s27  ;;  %664 = vrot.lane.b32.xlu0 %v1936_v8, %s1633_s16 }
  0xf9   : > { %v2074_v36 = vpop.permute.xlu1 %296  ;;  %v2076_v37 = vpop.permute.xlu0 %294 }
  0xfa   : > { %2954 = vst [vmem:[#allocation26_spill] sm:$0xff] %v2074_v36  ;;  %2955 = vst [vmem:[#allocation27_spill] sm:$0xff] %v2076_v37 }
  0xfb   : > { %670 = vrot.lane.b32.xlu1 %v1936_v8, %s1634_s27  ;;  %668 = vrot.lane.b32.xlu0 %v1924_v6, %s1634_s27 }
  0xfd   : > { %v2082_v38 = vpop.permute.xlu1 %300  ;;  %v2084_v39 = vpop.permute.xlu0 %298 }
  0xfe   : > { %2956 = vst [vmem:[#allocation28_spill] sm:$0xff] %v2082_v38  ;;  %2957 = vst [vmem:[#allocation29_spill] sm:$0xff] %v2084_v39 }
  0xff   : > { %869 = vrot.lane.b32.xlu1 %v1948_v9, %s1633_s16  ;;  %867 = vrot.lane.b32.xlu0 %v1952_v10, %s1633_s16 }
 0x101   : > { %v2090_v40 = vpop.permute.xlu1 %304  ;;  %v2092_v41 = vpop.permute.xlu0 %302 }
 0x102   : > { %2958 = vst [vmem:[#allocation30_spill] sm:$0xff] %v2090_v40  ;;  %2959 = vst [vmem:[#allocation31_spill] sm:$0xff] %v2092_v41 }
 0x103   : > { %873 = vrot.lane.b32.xlu1 %v1952_v10, %s1634_s27  ;;  %871 = vrot.lane.b32.xlu0 %v1960_v11, %s1633_s16 }
 0x105   : > { %v2098_v42 = vpop.permute.xlu1 %419  ;;  %v2100_v43 = vpop.permute.xlu0 %417 }
 0x107   : > { %877 = vrot.lane.b32.xlu1 %v1960_v11, %s1634_s27  ;;  %875 = vrot.lane.b32.xlu0 %v1948_v9, %s1634_s27 }
 0x109   : > { %v2106_v44 = vpop.permute.xlu1 %423  ;;  %v2108_v45 = vpop.permute.xlu0 %421 }
 0x10b   : > { %503 = vrot.lane.b32.xlu1 %v1890_v3, %s1637_s26  ;;  %501 = vrot.lane.b32.xlu0 %v1893_v4, %s1637_s26 }
 0x10d   : > { %v2114_v46 = vpop.permute.xlu1 %427  ;;  %v2116_v47 = vpop.permute.xlu0 %425 }
 0x10f   : > { %507 = vrot.lane.b32.xlu1 %v1893_v4, %s1638_s24  ;;  %505 = vrot.lane.b32.xlu0 %v1900_v5, %s1637_s26 }
 0x111   : > { %v2122_v48 = vpop.permute.xlu1 %440  ;;  %v2124_v49 = vpop.permute.xlu0 %438 }
 0x113   : > { %511 = vrot.lane.b32.xlu1 %v1900_v5, %s1638_s24  ;;  %509 = vrot.lane.b32.xlu0 %v1890_v3, %s1638_s24 }
 0x115   : > { %v2130_v50 = vpop.permute.xlu1 %444  ;;  %v2132_v51 = vpop.permute.xlu0 %442 }
 0x117   : > { %683 = vrot.lane.b32.xlu1 %v1924_v6, %s1635_s23  ;;  %681 = vrot.lane.b32.xlu0 %v1928_v7, %s1635_s23 }
 0x119   : > { %v2138_v52 = vpop.permute.xlu1 %448  ;;  %v2140_v53 = vpop.permute.xlu0 %446 }
 0x11b   : > { %687 = vrot.lane.b32.xlu1 %v1928_v7, %s1636_s25  ;;  %685 = vrot.lane.b32.xlu0 %v1936_v8, %s1635_s23 }
 0x11d   : > { %v2146_v54 = vpop.permute.xlu1 %620  ;;  %v2148_v55 = vpop.permute.xlu0 %618 }
 0x11f   : > { %691 = vrot.lane.b32.xlu1 %v1936_v8, %s1636_s25  ;;  %689 = vrot.lane.b32.xlu0 %v1924_v6, %s1636_s25 }
 0x121   : > { %v2154_v56 = vpop.permute.xlu1 %624  ;;  %v2156_v57 = vpop.permute.xlu0 %622 }
 0x123   : > { %890 = vrot.lane.b32.xlu1 %v1948_v9, %s1635_s23  ;;  %888 = vrot.lane.b32.xlu0 %v1952_v10, %s1635_s23 }
 0x125   : > { %v2162_v58 = vpop.permute.xlu1 %628  ;;  %v2164_v59 = vpop.permute.xlu0 %626 }
 0x127   : > { %894 = vrot.lane.b32.xlu1 %v1952_v10, %s1636_s25  ;;  %892 = vrot.lane.b32.xlu0 %v1960_v11, %s1635_s23 }
 0x129   : > { %v2170_v60 = vpop.permute.xlu1 %827  ;;  %v2172_v61 = vpop.permute.xlu0 %825 }
 0x12b   : > { %898 = vrot.lane.b32.xlu1 %v1960_v11, %s1636_s25  ;;  %896 = vrot.lane.b32.xlu0 %v1948_v9, %s1636_s25 }
 0x12d   : > { %v2178_v62 = vpop.permute.xlu1 %831  ;;  %v830_v63 = vpop.permute.xlu0 %829 }
 0x12f   : > { %704 = vrot.lane.b32.xlu1 %v1924_v6, %s1637_s26  ;;  %702 = vrot.lane.b32.xlu0 %v1928_v7, %s1637_s26 }
 0x131   : > { %v836_v41 = vpop.permute.xlu1 %835  ;;  %v2184_v36 = vpop.permute.xlu0 %833 }
 0x132   : > { %2960 = vst [vmem:[#allocation32_spill] sm:$0xff] %v2184_v36  ;;  %v839_v27 = vadd.f32 %v836_v41, %v830_v63  ;;  %v450_v41 = vadd.f32 %v2130_v50, %v2124_v49 }
 0x133   : > { %708 = vrot.lane.b32.xlu1 %v1928_v7, %s1638_s24  ;;  %706 = vrot.lane.b32.xlu0 %v1936_v8, %s1637_s26 }
 0x134   : > { %v842_v23 = vmul.f32 0.21300554, %v839_v27 }
 0x135   : > { %v462_v38 = vpop.permute.xlu1 %461  ;;  %v460_v37 = vpop.permute.xlu0 %459 }
 0x137   : > { %712 = vrot.lane.b32.xlu1 %v1936_v8, %s1638_s24  ;;  %710 = vrot.lane.b32.xlu0 %v1924_v6, %s1638_s24 }
 0x139   : > { %v466_v40 = vpop.permute.xlu1 %465  ;;  %v464_v39 = vpop.permute.xlu0 %463 }
 0x13a   : > { %v2194_v35 = vadd.f32 %v466_v40, %v460_v37 }
 0x13b   : > { %911 = vrot.lane.b32.xlu1 %v1948_v9, %s1637_s26  ;;  %909 = vrot.lane.b32.xlu0 %v1952_v10, %s1637_s26 }
 0x13d   : > { %v470_v30 = vpop.permute.xlu1 %469  ;;  %v468_v32 = vpop.permute.xlu0 %467 }
 0x13e   : > { %v2200_v31 = vadd.f32 %v470_v30, %v464_v39  ;;  %v2202_v34 = vadd.f32 %v468_v32, %v462_v38  ;;  %v2214_v30 = vmul.f32 %v1890_v3, %v1831_v2  ;;  %v2218_v32 = vmul.f32 %v1893_v4, %v1825_v1 }
 0x13f   : > { %915 = vrot.lane.b32.xlu1 %v1952_v10, %s1638_s24  ;;  %913 = vrot.lane.b32.xlu0 %v1960_v11, %s1637_s26 }
 0x141   : > { %v642_v37 = vpop.permute.xlu1 %641  ;;  %v640_v40 = vpop.permute.xlu0 %639 }
 0x143   : > { %919 = vrot.lane.b32.xlu1 %v1960_v11, %s1638_s24  ;;  %917 = vrot.lane.b32.xlu0 %v1948_v9, %s1638_s24 }
 0x145   : > { %v646_v38 = vpop.permute.xlu1 %645  ;;  %v644_v39 = vpop.permute.xlu0 %643 }
 0x146   : > { %v2220_v33 = vadd.f32 %v646_v38, %v640_v40 }
 0x147   : > { %1034 = vrot.lane.b32.xlu1 %v2214_v30, %s1629_s4  ;;  %1032 = vrot.lane.b32.xlu0 %v2218_v32, %s1629_s4 }
 0x149   : > { %v650_v24 = vpop.permute.xlu1 %649  ;;  %v648_v26 = vpop.permute.xlu0 %647 }
 0x14a   : > { %v2230_v25 = vadd.f32 %v650_v24, %v644_v39  ;;  %v2232_v28 = vadd.f32 %v648_v26, %v642_v37  ;;  %v429_v26 = vadd.f32 %v2106_v44, %v2100_v43  ;;  %v824_v37 = vmul.f32 0.26601171, %v1960_v11 }
 0x14b   : > { %1038 = vrot.lane.b32.xlu1 %v2218_v32, %s1630_s5  ;;  %1036 = vrot.lane.b32.xlu0 %v2228_v29, %s1629_s4  ;;  %v414_v11 = vmul.f32 0.26601171, %v1893_v4  ;;  %s1553_s4 = scalar_lea.vmem %s2881_s7, 16 }
 0x14c   : > { %v432_v27 = vmul.f32 0.21300554, %v429_v26  ;;  %v845_v43 = vadd.f32 %v842_v23, %v824_v37  ;;  %p1554_p12 = scmp.ne.s32.totalorder %s2881_s7, %s1553_s4 }
 0x14d   : > { %v849_v40 = vpop.permute.xlu1 %848  ;;  %v847_v38 = vpop.permute.xlu0 %846 }
 0x14e   : > { %v435_v23 = vadd.f32 %v432_v27, %v414_v11  ;;  %p1555_p2 = pnand %p1554_p12, %p2985_p0 }
 0x14f   : > { %1042 = vrot.lane.b32.xlu1 %v2228_v29, %s1630_s5  ;;  %1040 = vrot.lane.b32.xlu0 %v2214_v30, %s1630_s5  ;;  %s1557_s5 = sshll.u32 %s1639_s13, 4  ;;  %s1558_s5 = int_to_ptr.vmem [resolvable:$false] %s1557_s5 }
 0x150   : > { %p1556_p9 = pneg %p1555_p2  ;;  %p1560_p4 = scmp.lt.s32.totalorder %s2881_s7, %s1558_s5 }
 0x151   : > { %v853_v9 = vpop.permute.xlu1 %852  ;;  %v851_v24 = vpop.permute.xlu0 %850 }
 0x152   : > { %v2242_v39 = vadd.f32 %v853_v9, %v847_v38  ;;  %v431_v38 = vadd.f32 %v2114_v46, %v2108_v45 }
 0x153   : > { %1055 = vrot.lane.b32.xlu1 %v2214_v30, %s1631_s19  ;;  %1053 = vrot.lane.b32.xlu0 %v2218_v32, %s1631_s19 }
 0x154   : > { %2961 = vst [vmem:[#allocation33_spill] sm:$0xff] %v2242_v39  ;;  %v430_v39 = vadd.f32 %v2116_v47, %v2098_v42  ;;  %v416_v42 = vmul.f32 0.26601171, %v1900_v5  ;;  %v453_v47 = vmul.f32 0.10936069, %v450_v41 }
 0x155   : > { %v857_v18 = vpop.permute.xlu1 %856  ;;  %v855_v36 = vpop.permute.xlu0 %854  ;;  %v434_v50 = vmul.f32 0.21300554, %v431_v38 }
 0x156   : > { %v860_v63 = vadd.f32 %v857_v18, %v851_v24  ;;  %v2253_v9 = vadd.f32 %v855_v36, %v849_v40  ;;  %v452_v18 = vadd.f32 %v2138_v52, %v2132_v51  ;;  %v451_v36 = vadd.f32 %v2140_v53, %v2122_v48 }
 0x157   : > { %1059 = vrot.lane.b32.xlu1 %v2218_v32, %s1632_s8  ;;  %1057 = vrot.lane.b32.xlu0 %v2228_v29, %s1631_s19  ;;  %v415_v40 = vmul.f32 0.26601171, %v1890_v3  ;;  %v433_v4 = vmul.f32 0.21300554, %v430_v39  ;;  %v474_v48 = vmul.f32 0.036000773, %v2194_v35  ;;  %v456_v24 = vadd.f32 %v453_v47, %v435_v23 }
 0x158   : > { %v863_v44 = vmul.f32 0.10936069, %v860_v63  ;;  %v455_v51 = vmul.f32 0.10936069, %v452_v18  ;;  %v454_v52 = vmul.f32 0.10936069, %v451_v36  ;;  %v437_v37 = vadd.f32 %v434_v50, %v416_v42 }
 0x159   : > { %v483_v45 = vpop.permute.xlu1 %482  ;;  %v481_v46 = vpop.permute.xlu0 %480  ;;  %v436_v41 = vadd.f32 %v433_v4, %v415_v40  ;;  %v477_v3 = vadd.f32 %v474_v48, %v456_v24  ;;  %v476_v39 = vmul.f32 0.036000773, %v2200_v31  ;;  %v475_v63 = vmul.f32 0.036000773, %v2202_v34  ;;  %s1559_s19 = scalar_lea.vmem %s1558_s5, 32 }
 0x15a   : > { %v2269_v49 = vadd.f32 %v863_v44, %v845_v43  ;;  %v458_v38 = vadd.f32 %v455_v51, %v437_v37  ;;  %v630_v44 = vadd.f32 %v2154_v56, %v2148_v55  ;;  %v632_v50 = vadd.f32 %v2162_v58, %v2156_v57  ;;  %p1561_p5 = scmp.lt.s32.totalorder %s1559_s19, %s1553_s4 }
 0x15b   : > { %1063 = vrot.lane.b32.xlu1 %v2228_v29, %s1632_s8  ;;  %1061 = vrot.lane.b32.xlu0 %v2214_v30, %s1632_s8  ;;  %v457_v11 = vadd.f32 %v454_v52, %v436_v41  ;;  %v631_v55 = vadd.f32 %v2164_v59, %v2146_v54  ;;  %v617_v57 = vmul.f32 0.26601171, %v1936_v8  ;;  %v654_v58 = vmul.f32 0.10936069, %v2220_v33 }
 0x15c   : > { %v479_v31 = vadd.f32 %v476_v39, %v458_v38  ;;  %v633_v4 = vmul.f32 0.21300554, %v630_v44  ;;  %v635_v54 = vmul.f32 0.21300554, %v632_v50  ;;  %v616_v59 = vmul.f32 0.26601171, %v1924_v6  ;;  %p1562_p10 = por %p1561_p5, %p1560_p4 }
 0x15d   : > { %v487_v53 = vpop.permute.xlu1 %486  ;;  %v485_v5 = vpop.permute.xlu0 %484  ;;  %v478_v34 = vadd.f32 %v475_v63, %v457_v11  ;;  %v634_v51 = vmul.f32 0.21300554, %v631_v55  ;;  %v207_v24 = vmul.f32 0.26601171, %v1825_v1  ;;  %v656_v33 = vmul.f32 0.10936069, %v2230_v25 }
 0x15e   : > { %v492_v26 = vadd.f32 %v487_v53, %v481_v46  ;;  %v655_v6 = vmul.f32 0.10936069, %v2232_v28  ;;  %v224_v41 = vadd.f32 %v1994_v16, %v1978_v12  ;;  %v223_v1 = vadd.f32 %v1996_v17, %v1988_v15  ;;  %v2966_v55 = vld [vmem:[#allocation33_spill] sm:$0xff]  ;;  %p1563_p11 = pnand %p1562_p10, %p1556_p9 }
 0x15f   : > { %1076 = vrot.lane.b32.xlu1 %v2214_v30, %s1633_s16  ;;  %1074 = vrot.lane.b32.xlu0 %v2218_v32, %s1633_s16  ;;  %v837_v63 = vadd.f32 %v2178_v62, %v2172_v61  ;;  %v209_v28 = vmul.f32 0.26601171, %v1823_v0  ;;  %v208_v11 = vmul.f32 0.26601171, %v1831_v2  ;;  %v245_v12 = vadd.f32 %v2018_v22, %v2012_v21 }
 0x160   : > { %v495_v35 = vmul.f32 0.007598758, %v492_v26  ;;  %v222_v26 = vadd.f32 %v1986_v14, %v1980_v13  ;;  %v637_v13 = vadd.f32 %v634_v51, %v616_v59  ;;  %v822_v15 = vmul.f32 0.26601171, %v1952_v10  ;;  %v2962_v10 = vld [vmem:[#allocation32_spill] sm:$0xff] }
 0x161   : > { %v491_v27 = vpop.permute.xlu1 %490  ;;  %v489_v43 = vpop.permute.xlu0 %488  ;;  %v226_v0 = vmul.f32 0.21300554, %v223_v1  ;;  %v243_v2 = vadd.f32 %v2010_v20, %v2004_v19  ;;  %v840_v22 = vmul.f32 0.21300554, %v837_v63  ;;  %v248_v19 = vmul.f32 0.10936069, %v245_v12 }
 0x162   : > { %v2285_v18 = vadd.f32 %v495_v35, %v477_v3  ;;  %v494_v36 = vadd.f32 %v491_v27, %v485_v5  ;;  %v493_v46 = vadd.f32 %v489_v43, %v483_v45  ;;  %v615_v45 = vmul.f32 0.26601171, %v1928_v7  ;;  %v2965_v20 = vld [vmem:[#allocation11_spill] sm:$0xff] }
 0x163   : > { %1080 = vrot.lane.b32.xlu1 %v2218_v32, %s1634_s27  ;;  %1078 = vrot.lane.b32.xlu0 %v2228_v29, %s1633_s16  ;;  %v638_v3 = vadd.f32 %v635_v54, %v617_v57  ;;  %v658_v17 = vadd.f32 %v655_v6, %v637_v13  ;;  %v225_v27 = vmul.f32 0.21300554, %v222_v26  ;;  %v227_v43 = vmul.f32 0.21300554, %v224_v41  ;;  %v2967_v57 = vld [vmem:[#allocation17_spill] sm:$0xff]  ;;  %v2972_v41 = vld [vmem:[#allocation19_spill] sm:$0xff] }
 0x164   : > { %v497_v42 = vmul.f32 0.007598758, %v494_v36  ;;  %v496_v47 = vmul.f32 0.007598758, %v493_v46  ;;  %v636_v53 = vadd.f32 %v633_v4, %v615_v45  ;;  %v838_v36 = vadd.f32 %v2962_v10, %v2170_v60 }
 0x165   : > { %v663_v56 = vpop.permute.xlu1 %662  ;;  %v661_v40 = vpop.permute.xlu0 %660  ;;  %v659_v16 = vadd.f32 %v656_v33, %v638_v3  ;;  %v823_v50 = vmul.f32 0.26601171, %v2965_v20  ;;  %v228_v60 = vadd.f32 %v225_v27, %v207_v24  ;;  %v230_v45 = vadd.f32 %v227_v43, %v209_v28  ;;  %v2970_v33 = vld [vmem:[#allocation16_spill] sm:$0xff]  ;;  %v2973_v3 = vld [vmem:[#allocation23_spill] sm:$0xff]  ;;  %v2975_v28 = vld [vmem:[#allocation21_spill] sm:$0xff] }
 0x166   : > { %v2296_v23 = vadd.f32 %v497_v42, %v479_v31  ;;  %v2298_v48 = vadd.f32 %v496_v47, %v478_v34  ;;  %v657_v8 = vadd.f32 %v654_v58, %v636_v53  ;;  %v2963_v34 = vld [vmem:[#allocation12_spill] sm:$0xff]  ;;  %v2964_v42 = vld [vmem:[#allocation13_spill] sm:$0xff]  ;;  %v229_v4 = vadd.f32 %v226_v0, %v208_v11  ;;  %v2968_v58 = vld [vmem:[#allocation18_spill] sm:$0xff] }
 0x167   : > { %1084 = vrot.lane.b32.xlu1 %v2228_v29, %s1634_s27  ;;  %1082 = vrot.lane.b32.xlu0 %v2214_v30, %s1634_s27  ;;  %v244_v47 = vadd.f32 %v2964_v42, %v2963_v34  ;;  %v266_v54 = vadd.f32 %v2968_v58, %v2967_v57  ;;  %v841_v53 = vmul.f32 0.21300554, %v838_v36  ;;  %v2974_v24 = vld [vmem:[#allocation24_spill] sm:$0xff]  ;;  %v862_v63 = vmul.f32 0.10936069, %v2253_v9  ;;  %v2976_v11 = vld [vmem:[#allocation22_spill] sm:$0xff] }
 0x168   : > { %v287_v13 = vadd.f32 %v2974_v24, %v2973_v3  ;;  %v285_v12 = vadd.f32 %v2976_v11, %v2975_v28  ;;  %v2981_v42 = vld [vmem:[#allocation27_spill] sm:$0xff]  ;;  %v2983_v20 = vld [vmem:[#allocation26_spill] sm:$0xff] }
 0x169   : > { %v667_v7 = vpop.permute.xlu1 %666  ;;  %v665_v52 = vpop.permute.xlu0 %664  ;;  %v247_v26 = vmul.f32 0.10936069, %v244_v47  ;;  %v2982_v47 = vld [vmem:[#allocation28_spill] sm:$0xff] }
 0x16a   : > { %v672_v5 = vadd.f32 %v667_v7, %v661_v40  ;;  %v321_v40 = vlaneseq  ;;  %v246_v7 = vmul.f32 0.10936069, %v243_v2  ;;  %v844_v2 = vadd.f32 %v841_v53, %v823_v50 }
 0x16b   : > { %1097 = vrot.lane.b32.xlu1 %v2214_v30, %s1635_s23  ;;  %1095 = vrot.lane.b32.xlu0 %v2218_v32, %s1635_s23  ;;  %v290_v34 = vmul.f32 0.007598758, %v287_v13  ;;  %v250_v53 = vadd.f32 %v247_v26, %v229_v4 }
 0x16c   : > { %v675_v37 = vmul.f32 0.036000773, %v672_v5  ;;  %v865_v50 = vadd.f32 %v862_v63, %v844_v2  ;;  %v249_v58 = vadd.f32 %v246_v7, %v228_v60 }
 0x16d   : > { %v671_v14 = vpop.permute.xlu1 %670  ;;  %v669_v39 = vpop.permute.xlu0 %668 }
 0x16e   : > { %v2322_v35 = vadd.f32 %v675_v37, %v657_v8  ;;  %v674_v38 = vadd.f32 %v671_v14, %v665_v52  ;;  %v673_v25 = vadd.f32 %v669_v39, %v663_v56  ;;  %v861_v56 = vmul.f32 0.10936069, %v2966_v55  ;;  %v2969_v8 = vld [vmem:[#allocation15_spill] sm:$0xff]  ;;  %v2971_v37 = vld [vmem:[#allocation14_spill] sm:$0xff] }
 0x16f   : > { %1101 = vrot.lane.b32.xlu1 %v2218_v32, %s1636_s25  ;;  %1099 = vrot.lane.b32.xlu0 %v2228_v29, %s1635_s23  ;;  %v843_v52 = vadd.f32 %v840_v22, %v822_v15  ;;  %v264_v6 = vadd.f32 %v2970_v33, %v2969_v8  ;;  %v265_v1 = vadd.f32 %v2972_v41, %v2971_v37  ;;  %v2977_v15 = vld [vmem:[#allocation20_spill] sm:$0xff]  ;;  %v2984_v55 = vld [vmem:[#allocation31_spill] sm:$0xff] }
 0x170   : > { %v677_v61 = vmul.f32 0.036000773, %v674_v38  ;;  %v676_v62 = vmul.f32 0.036000773, %v673_v25  ;;  %v251_v14 = vadd.f32 %v248_v19, %v230_v45  ;;  %v269_v25 = vmul.f32 0.036000773, %v266_v54 }
 0x171   : > { %v870_v44 = vpop.permute.xlu1 %869  ;;  %v868_v21 = vpop.permute.xlu0 %867  ;;  %v864_v39 = vadd.f32 %v861_v56, %v843_v52  ;;  %v267_v36 = vmul.f32 0.036000773, %v264_v6  ;;  %v268_v9 = vmul.f32 0.036000773, %v265_v1  ;;  %v306_v19 = vadd.f32 %v2982_v47, %v2981_v42 }
 0x172   : > { %v2337_v46 = vadd.f32 %v677_v61, %v659_v16  ;;  %v2339_v31 = vadd.f32 %v676_v62, %v658_v17  ;;  %v2978_v16 = vld [vmem:[#allocation25_spill] sm:$0xff]  ;;  %v2980_v62 = vld [vmem:[#allocation30_spill] sm:$0xff]  ;;  %v307_v56 = vadd.f32 %v2984_v55, %v2983_v20  ;;  %v288_v54 = vmul.f32 0.007598758, %v285_v12 }
 0x173   : > { %1105 = vrot.lane.b32.xlu1 %v2228_v29, %s1636_s25  ;;  %1103 = vrot.lane.b32.xlu0 %v2214_v30, %s1636_s25  ;;  %v286_v17 = vadd.f32 %v2978_v16, %v2977_v15  ;;  %v2979_v61 = vld [vmem:[#allocation29_spill] sm:$0xff]  ;;  %v270_v6 = vadd.f32 %v267_v36, %v249_v58  ;;  %v309_v41 = vmul.f32 0.0010283801, %v306_v19  ;;  %v271_v60 = vadd.f32 %v268_v9, %v250_v53 }
 0x174   : > { %v308_v27 = vadd.f32 %v2980_v62, %v2979_v61  ;;  %v310_v7 = vmul.f32 0.0010283801, %v307_v56 }
 0x175   : > { %v874_v59 = vpop.permute.xlu1 %873  ;;  %v872_v51 = vpop.permute.xlu0 %871  ;;  %v291_v1 = vadd.f32 %v288_v54, %v270_v6 }
 0x176   : > { %v879_v5 = vadd.f32 %v874_v59, %v868_v21  ;;  %v311_v59 = vmul.f32 0.0010283801, %v308_v27 }
 0x177   : > { %1118 = vrot.lane.b32.xlu1 %v2214_v30, %s1637_s26  ;;  %1116 = vrot.lane.b32.xlu0 %v2218_v32, %s1637_s26 }
 0x178   : > { %v882_v38 = vmul.f32 0.036000773, %v879_v5  ;;  %v289_v5 = vmul.f32 0.007598758, %v286_v17 }
 0x179   : > { %v878_v43 = vpop.permute.xlu1 %877  ;;  %v876_v0 = vpop.permute.xlu0 %875 }
 0x17a   : > { %v2368_v21 = vadd.f32 %v882_v38, %v864_v39  ;;  %v881_v22 = vadd.f32 %v878_v43, %v872_v51  ;;  %v880_v10 = vadd.f32 %v876_v0, %v870_v44  ;;  %v272_v44 = vadd.f32 %v269_v25, %v251_v14 }
 0x17b   : > { %1122 = vrot.lane.b32.xlu1 %v2218_v32, %s1638_s24  ;;  %1120 = vrot.lane.b32.xlu0 %v2228_v29, %s1637_s26  ;;  %v292_v24 = vadd.f32 %v289_v5, %v271_v60  ;;  %v2392_v14 = vadd.f32 %v309_v41, %v291_v1 }
 0x17c   : > { %v884_v45 = vmul.f32 0.036000773, %v881_v22  ;;  %v883_v57 = vmul.f32 0.036000773, %v880_v10  ;;  %v293_v37 = vadd.f32 %v290_v34, %v272_v44 }
 0x17d   : > { %v504_v51 = vpop.permute.xlu1 %503  ;;  %v502_v52 = vpop.permute.xlu0 %501  ;;  %v2394_v39 = vadd.f32 %v310_v7, %v292_v24  ;;  %v318_v17 = vrot.slane %v2392_v14, 7  ;;  %v327_v61 = vrot.slane %v2392_v14, 1  ;;  %v343_v62 = vrot.slane %v2392_v14, 6 }
 0x17e   : > { %v2379_v8 = vadd.f32 %v884_v45, %v2269_v49  ;;  %v2381_v33 = vadd.f32 %v883_v57, %v865_v50  ;;  %v2387_v3 = vadd.f32 %v311_v59, %v293_v37  ;;  %v2390_v49 = vshrl.u32 %v321_v40, 7 }
 0x17f   : > { %1126 = vrot.lane.b32.xlu1 %v2228_v29, %s1638_s24  ;;  %1124 = vrot.lane.b32.xlu0 %v2214_v30, %s1638_s24  ;;  %v319_v0 = vrot.slane %v2394_v39, 7  ;;  %v328_v36 = vrot.slane %v2394_v39, 1 }
 0x180   : > { %v320_v38 = vrot.slane %v2387_v3, 7  ;;  %vm323_vm0 = vcmp.lt.s32.totalorder %v2390_v49, 1  ;;  %vm330_vm1 = vcmp.lt.s32.totalorder %v2390_v49, 7  ;;  %vm346_vm2 = vcmp.lt.s32.totalorder %v2390_v49, 2 }
 0x181   : > { %v508_v4 = vpop.permute.xlu1 %507  ;;  %v506_v26 = vpop.permute.xlu0 %505  ;;  %v329_v16 = vrot.slane %v2387_v3, 1  ;;  %vm353_vm3 = vcmp.lt.s32.totalorder %v2390_v49, 6  ;;  %v345_v27 = vrot.slane %v2387_v3, 6  ;;  %vm369_vm4 = vcmp.lt.s32.totalorder %v2390_v49, 3 }
 0x182   : > { %v513_v13 = vadd.f32 %v508_v4, %v502_v52  ;;  %v2414_v10 = vsel %vm323_vm0, %v320_v38, %v318_v17  ;;  %vm376_vm5 = vcmp.lt.s32.totalorder %v2390_v49, 5  ;;  %vm392_vm6 = vcmp.lt.s32.totalorder %v2390_v49, 4 }
 0x184   : > { %v516_v63 = vmul.f32 0.0010283801, %v513_v13 }
 0x185   : > { %v512_v25 = vpop.permute.xlu1 %511  ;;  %v510_v28 = vpop.permute.xlu0 %509 }
 0x186   : > { %v2399_v11 = vadd.f32 %v516_v63, %v2285_v18  ;;  %v515_v12 = vadd.f32 %v512_v25, %v506_v26  ;;  %v514_v15 = vadd.f32 %v510_v28, %v504_v51 }
 0x188   : > { %v518_v18 = vmul.f32 0.0010283801, %v515_v12  ;;  %v517_v43 = vmul.f32 0.0010283801, %v514_v15  ;;  %v522_v9 = vmul.f32 0.26601171, %v2399_v11 }
 0x189   : > { %v684_v2 = vpop.permute.xlu1 %683  ;;  %v682_v22 = vpop.permute.xlu0 %681  ;;  %v525_v34 = vrot.slane %v2399_v11, 7  ;;  %v531_v19 = vrot.slane %v2399_v11, 1  ;;  %v546_v20 = vrot.slane %v2399_v11, 6  ;;  %v552_v55 = vrot.slane %v2399_v11, 2 }
 0x18a   : > { %v2420_v42 = vadd.f32 %v518_v18, %v2296_v23  ;;  %v2423_v47 = vadd.f32 %v517_v43, %v2298_v48  ;;  %v567_v56 = vrot.slane %v2399_v11, 5  ;;  %v573_v50 = vrot.slane %v2399_v11, 3 }
 0x18b   : > { %v588_v45 = vrot.slane %v2399_v11, 4 }
 0x18c   : > { %v527_v23 = vrot.slane %v2420_v42, 7  ;;  %v533_v57 = vrot.slane %v2420_v42, 1  ;;  %v548_v48 = vrot.slane %v2420_v42, 6  ;;  %v554_v58 = vrot.slane %v2420_v42, 2 }
 0x18d   : > { %v688_v44 = vpop.permute.xlu1 %687  ;;  %v686_v54 = vpop.permute.xlu0 %685  ;;  %v523_v59 = vmul.f32 0.26601171, %v2423_v47  ;;  %v526_v51 = vrot.slane %v2423_v47, 7  ;;  %v532_v52 = vrot.slane %v2423_v47, 1  ;;  %v547_v53 = vrot.slane %v2423_v47, 6 }
 0x18e   : > { %v693_v5 = vadd.f32 %v688_v44, %v682_v22  ;;  %v530_v6 = vsel %vm323_vm0, %v527_v23, %v525_v34  ;;  %v551_v37 = vsel %vm346_vm2, %v548_v48, %v546_v20  ;;  %v553_v41 = vrot.slane %v2423_v47, 2 }
 0x18f   : > { %v529_v60 = vsel %vm323_vm0, %v525_v34, %v526_v51  ;;  %v534_v7 = vsel %vm330_vm1, %v532_v52, %v533_v57  ;;  %v535_v1 = vsel %vm330_vm1, %v531_v19, %v532_v52  ;;  %v550_v4 = vsel %vm346_vm2, %v546_v20, %v547_v53 }
 0x190   : > { %v696_v26 = vmul.f32 0.007598758, %v693_v5  ;;  %v537_v24 = vadd.f32 %v535_v1, %v530_v6  ;;  %v538_v13 = vadd.f32 %v534_v7, %v529_v60  ;;  %v555_v63 = vsel %vm353_vm3, %v553_v41, %v554_v58 }
 0x191   : > { %v692_v38 = vpop.permute.xlu1 %691  ;;  %v690_v25 = vpop.permute.xlu0 %689  ;;  %v556_v28 = vsel %vm353_vm3, %v552_v55, %v553_v41  ;;  %v559_v12 = vadd.f32 %v555_v63, %v550_v4  ;;  %v568_v15 = vrot.slane %v2423_v47, 5  ;;  %v569_v18 = vrot.slane %v2420_v42, 5 }
 0x192   : > { %v2462_v43 = vadd.f32 %v696_v26, %v2322_v35  ;;  %v695_v22 = vadd.f32 %v692_v38, %v686_v54  ;;  %v694_v34 = vadd.f32 %v690_v25, %v684_v2  ;;  %v540_v19 = vmul.f32 0.21300554, %v537_v24 }
 0x193   : > { %v541_v20 = vmul.f32 0.21300554, %v538_v13  ;;  %v558_v23 = vadd.f32 %v556_v28, %v551_v37  ;;  %v562_v57 = vmul.f32 0.10936069, %v559_v12  ;;  %v570_v48 = vsel %vm369_vm4, %v568_v15, %v569_v18 }
 0x194   : > { %v698_v58 = vmul.f32 0.007598758, %v695_v22  ;;  %v697_v44 = vmul.f32 0.007598758, %v694_v34  ;;  %v543_v55 = vadd.f32 %v540_v19, %v522_v9  ;;  %v571_v51 = vsel %vm369_vm4, %v567_v56, %v568_v15 }
 0x195   : > { %v891_v52 = vpop.permute.xlu1 %890  ;;  %v889_v53 = vpop.permute.xlu0 %888  ;;  %v544_v5 = vadd.f32 %v541_v20, %v523_v59  ;;  %v561_v35 = vmul.f32 0.10936069, %v558_v23  ;;  %v572_v2 = vsel %vm369_vm4, %v569_v18, %v567_v56  ;;  %v574_v54 = vrot.slane %v2423_v47, 3 }
 0x196   : > { %v2472_v6 = vadd.f32 %v698_v58, %v2337_v46  ;;  %v2475_v37 = vadd.f32 %v697_v44, %v2339_v31  ;;  %v575_v9 = vrot.slane %v2420_v42, 3  ;;  %v589_v41 = vrot.slane %v2423_v47, 4 }
 0x197   : > { %v564_v60 = vadd.f32 %v561_v35, %v543_v55  ;;  %v565_v7 = vadd.f32 %v562_v57, %v544_v5  ;;  %v577_v59 = vsel %vm376_vm5, %v573_v50, %v574_v54  ;;  %v590_v1 = vrot.slane %v2420_v42, 4 }
 0x198   : > { %v576_v56 = vsel %vm376_vm5, %v574_v54, %v575_v9  ;;  %v578_v46 = vsel %vm376_vm5, %v575_v9, %v573_v50  ;;  %v579_v4 = vadd.f32 %v577_v59, %v572_v2  ;;  %v592_v31 = vsel %vm392_vm6, %v588_v45, %v589_v41 }
 0x199   : > { %v895_v47 = vpop.permute.xlu1 %894  ;;  %v893_v26 = vpop.permute.xlu0 %892  ;;  %v580_v24 = vadd.f32 %v576_v56, %v571_v51  ;;  %v591_v13 = vsel %vm392_vm6, %v589_v41, %v590_v1  ;;  %v593_v42 = vsel %vm392_vm6, %v590_v1, %v588_v45  ;;  %v603_v63 = vadd.f32 %v578_v46, %v571_v51 }
 0x19a   : > { %v900_v38 = vadd.f32 %v895_v47, %v889_v53  ;;  %v582_v50 = vmul.f32 0.036000773, %v579_v4  ;;  %v594_v25 = vadd.f32 %v593_v42, %v592_v31  ;;  %v595_v28 = vadd.f32 %v592_v31, %v591_v13 }
 0x19b   : > { %v325_v12 = vsel %vm323_vm0, %v318_v17, %v319_v0  ;;  %v351_v15 = vrot.slane %v2394_v39, 2  ;;  %v583_v18 = vmul.f32 0.036000773, %v580_v24  ;;  %v604_v22 = vadd.f32 %v577_v59, %v570_v48 }
 0x19c   : > { %v903_v11 = vmul.f32 0.007598758, %v900_v38  ;;  %v331_v45 = vsel %vm330_vm1, %v328_v36, %v329_v16  ;;  %v585_v34 = vadd.f32 %v582_v50, %v564_v60  ;;  %v597_v19 = vmul.f32 0.007598758, %v594_v25 }
 0x19d   : > { %v899_v20 = vpop.permute.xlu1 %898  ;;  %v897_v23 = vpop.permute.xlu0 %896  ;;  %v332_v17 = vsel %vm330_vm1, %v327_v61, %v328_v36  ;;  %v586_v0 = vadd.f32 %v583_v18, %v565_v7  ;;  %v598_v57 = vmul.f32 0.007598758, %v595_v28  ;;  %v606_v48 = vmul.f32 0.0010283801, %v603_v63 }
 0x19e   : > { %v2516_v58 = vadd.f32 %v903_v11, %v2368_v21  ;;  %v902_v44 = vadd.f32 %v899_v20, %v893_v26  ;;  %v901_v55 = vadd.f32 %v897_v23, %v891_v52  ;;  %v600_v16 = vadd.f32 %v597_v19, %v585_v34 }
 0x19f   : > { %v352_v51 = vrot.slane %v2387_v3, 2  ;;  %v350_v53 = vrot.slane %v2392_v14, 2  ;;  %v601_v5 = vadd.f32 %v598_v57, %v586_v0  ;;  %v607_v35 = vmul.f32 0.0010283801, %v604_v22 }
 0x1a0   : > { %v905_v2 = vmul.f32 0.007598758, %v902_v44  ;;  %v904_v54 = vmul.f32 0.007598758, %v901_v55  ;;  %v344_v9 = vrot.slane %v2394_v39, 6  ;;  %v2521_v61 = vadd.f32 %v606_v48, %v600_v16 }
 0x1a1   : > { %v705_v36 = vpop.permute.xlu1 %704  ;;  %v703_v41 = vpop.permute.xlu0 %702  ;;  %v334_v21 = vadd.f32 %v332_v17, %v2414_v10  ;;  %v335_v60 = vadd.f32 %v331_v45, %v325_v12  ;;  %v2524_v7 = vadd.f32 %v607_v35, %v601_v5  ;;  %v349_v1 = vsel %vm346_vm2, %v345_v27, %v343_v62 }
 0x1a2   : > { %v2527_v52 = vadd.f32 %v905_v2, %v2379_v8  ;;  %v2530_v59 = vadd.f32 %v904_v54, %v2381_v33  ;;  %v355_v56 = vsel %vm353_vm3, %v350_v53, %v351_v15  ;;  %v348_v10 = vsel %vm346_vm2, %v343_v62, %v344_v9 }
 0x1a3   : > { %v354_v8 = vsel %vm353_vm3, %v351_v15, %v352_v51  ;;  %v367_v33 = vrot.slane %v2394_v39, 5  ;;  %v337_v31 = vmul.f32 0.21300554, %v334_v21  ;;  %v338_v47 = vmul.f32 0.21300554, %v335_v60 }
 0x1a4   : > { %v357_v26 = vadd.f32 %v355_v56, %v349_v1  ;;  %v368_v27 = vrot.slane %v2387_v3, 5  ;;  %v366_v13 = vrot.slane %v2392_v14, 5  ;;  %v374_v42 = vrot.slane %v2394_v39, 3 }
 0x1a5   : > { %v709_v46 = vpop.permute.xlu1 %708  ;;  %v707_v4 = vpop.permute.xlu0 %706  ;;  %v315_v63 = vmul.f32 0.26601171, %v2392_v14  ;;  %v316_v62 = vmul.f32 0.26601171, %v2394_v39  ;;  %v358_v38 = vadd.f32 %v354_v8, %v348_v10  ;;  %v375_v50 = vrot.slane %v2387_v3, 3 }
 0x1a6   : > { %v714_v24 = vadd.f32 %v709_v46, %v703_v41  ;;  %v371_v28 = vsel %vm369_vm4, %v366_v13, %v367_v33  ;;  %v373_v12 = vrot.slane %v2392_v14, 3  ;;  %v360_v45 = vmul.f32 0.10936069, %v357_v26 }
 0x1a7   : > { %v340_v22 = vadd.f32 %v337_v31, %v315_v63  ;;  %v341_v11 = vadd.f32 %v338_v47, %v316_v62  ;;  %v372_v34 = vsel %vm369_vm4, %v368_v27, %v366_v13  ;;  %v390_v17 = vrot.slane %v2394_v39, 4 }
 0x1a8   : > { %v717_v25 = vmul.f32 0.0010283801, %v714_v24  ;;  %v2560_v23 = vsel %vm376_vm5, %v373_v12, %v374_v42  ;;  %v361_v57 = vmul.f32 0.10936069, %v358_v38  ;;  %v377_v48 = vsel %vm376_vm5, %v374_v42, %v375_v50 }
 0x1a9   : > { %v713_v15 = vpop.permute.xlu1 %712  ;;  %v711_v18 = vpop.permute.xlu0 %710  ;;  %v391_v44 = vrot.slane %v2387_v3, 4  ;;  %v379_v51 = vsel %vm376_vm5, %v375_v50, %v373_v12  ;;  %v389_v53 = vrot.slane %v2392_v14, 4  ;;  %v2572_v2 = vadd.f32 %v360_v45, %v340_v22 }
 0x1aa   : > { %v716_v19 = vadd.f32 %v713_v15, %v707_v4  ;;  %v715_v20 = vadd.f32 %v711_v18, %v705_v36  ;;  %v2564_v0 = vadd.f32 %v717_v25, %v2462_v43  ;;  %v2574_v39 = vadd.f32 %v361_v57, %v341_v11 }
 0x1ab   : > { %v2578_v43 = vsel %vm369_vm4, %v367_v33, %v368_v27  ;;  %v2581_v54 = vadd.f32 %v2560_v23, %v372_v34  ;;  %v2589_v14 = vadd.f32 %v377_v48, %v371_v28  ;;  %v2593_v36 = vsel %vm392_vm6, %v389_v53, %v390_v17 }
 0x1ac   : > { %v719_v55 = vmul.f32 0.0010283801, %v716_v19  ;;  %v718_v16 = vmul.f32 0.0010283801, %v715_v20  ;;  %v726_v41 = vrot.slane %v2564_v0, 7  ;;  %v2598_v21 = vsel %vm392_vm6, %v390_v17, %v391_v44 }
 0x1ad   : > { %v912_v5 = vpop.permute.xlu1 %911  ;;  %v910_v35 = vpop.permute.xlu0 %909  ;;  %v2602_v60 = vsel %vm392_vm6, %v391_v44, %v389_v53  ;;  %v723_v31 = vmul.f32 0.26601171, %v2564_v0  ;;  %v747_v47 = vrot.slane %v2564_v0, 6  ;;  %v753_v13 = vrot.slane %v2564_v0, 2 }
 0x1ae   : > { %v2584_v3 = vadd.f32 %v719_v55, %v2472_v6  ;;  %v2587_v9 = vadd.f32 %v718_v16, %v2475_v37  ;;  %v2604_v6 = vadd.f32 %v379_v51, %v371_v28  ;;  %v732_v37 = vrot.slane %v2564_v0, 1 }
 0x1b0   : > { %v728_v1 = vrot.slane %v2584_v3, 7  ;;  %v734_v56 = vrot.slane %v2584_v3, 1  ;;  %v749_v10 = vrot.slane %v2584_v3, 6  ;;  %v755_v8 = vrot.slane %v2584_v3, 2 }
 0x1b1   : > { %v727_v33 = vrot.slane %v2587_v9, 7  ;;  %v916_v46 = vpop.permute.xlu1 %915  ;;  %v914_v4 = vpop.permute.xlu0 %913  ;;  %v770_v26 = vrot.slane %v2584_v3, 5  ;;  %v733_v27 = vrot.slane %v2587_v9, 1  ;;  %v748_v63 = vrot.slane %v2587_v9, 6 }
 0x1b2   : > { %v731_v24 = vsel %vm323_vm0, %v728_v1, %v726_v41  ;;  %v752_v62 = vsel %vm346_vm2, %v749_v10, %v747_v47  ;;  %v754_v38 = vrot.slane %v2587_v9, 2  ;;  %v921_v50 = vadd.f32 %v916_v46, %v910_v35 }
 0x1b3   : > { %v730_v42 = vsel %vm323_vm0, %v726_v41, %v727_v33  ;;  %v724_v25 = vmul.f32 0.26601171, %v2587_v9  ;;  %v735_v28 = vsel %vm330_vm1, %v733_v27, %v734_v56  ;;  %v736_v12 = vsel %vm330_vm1, %v732_v37, %v733_v27 }
 0x1b4   : > { %v738_v22 = vadd.f32 %v736_v12, %v731_v24  ;;  %v739_v11 = vadd.f32 %v735_v28, %v730_v42  ;;  %v751_v45 = vsel %vm346_vm2, %v747_v47, %v748_v63  ;;  %v756_v34 = vsel %vm353_vm3, %v754_v38, %v755_v8 }
 0x1b5   : > { %v920_v15 = vpop.permute.xlu1 %919  ;;  %v918_v18 = vpop.permute.xlu0 %917  ;;  %v757_v17 = vsel %vm353_vm3, %v753_v13, %v754_v38  ;;  %v769_v57 = vrot.slane %v2587_v9, 5  ;;  %v760_v16 = vadd.f32 %v756_v34, %v751_v45  ;;  %v776_v51 = vrot.slane %v2584_v3, 3 }
 0x1b6   : > { %v923_v19 = vadd.f32 %v920_v15, %v914_v4  ;;  %v922_v20 = vadd.f32 %v918_v18, %v912_v5  ;;  %v741_v48 = vmul.f32 0.21300554, %v738_v22  ;;  %v742_v44 = vmul.f32 0.21300554, %v739_v11 }
 0x1b7   : > { %v759_v55 = vadd.f32 %v757_v17, %v752_v62  ;;  %v768_v41 = vrot.slane %v2564_v0, 5  ;;  %v763_v8 = vmul.f32 0.10936069, %v760_v16  ;;  %v924_v33 = vmul.f32 0.0010283801, %v921_v50 }
 0x1b8   : > { %v926_v53 = vmul.f32 0.0010283801, %v923_v19  ;;  %v925_v35 = vmul.f32 0.0010283801, %v922_v20  ;;  %v744_v5 = vadd.f32 %v741_v48, %v723_v31  ;;  %v745_v56 = vadd.f32 %v742_v44, %v724_v25 }
 0x1b9   : > { %v2639_v37 = vpop.permute.xlu1 %1034  ;;  %v2641_v1 = vpop.permute.xlu0 %1032  ;;  %v762_v10 = vmul.f32 0.10936069, %v759_v55  ;;  %v771_v4 = vsel %vm369_vm4, %v769_v57, %v770_v26  ;;  %v772_v47 = vsel %vm369_vm4, %v768_v41, %v769_v57  ;;  %v773_v13 = vsel %vm369_vm4, %v770_v26, %v768_v41 }
 0x1ba   : > { %v2644_v46 = vadd.f32 %v926_v53, %v2527_v52  ;;  %v766_v24 = vadd.f32 %v763_v8, %v745_v56  ;;  %v775_v31 = vrot.slane %v2587_v9, 3  ;;  %v791_v42 = vrot.slane %v2584_v3, 4 }
 0x1bb   : > { %v765_v27 = vadd.f32 %v762_v10, %v744_v5  ;;  %v2655_v63 = vadd.f32 %v925_v35, %v2530_v59  ;;  %v383_v52 = vmul.f32 0.036000773, %v2581_v54  ;;  %v774_v62 = vrot.slane %v2564_v0, 3 }
 0x1bc   : > { %v2664_v25 = vmul.f32 0.036000773, %v2589_v14  ;;  %v2668_v26 = vadd.f32 %v2602_v60, %v2593_v36  ;;  %v2672_v3 = vadd.f32 %v2593_v36, %v2598_v21  ;;  %v789_v59 = vrot.slane %v2564_v0, 4 }
 0x1bd   : > { %v2659_v38 = vpop.permute.xlu1 %1038  ;;  %v2661_v50 = vpop.permute.xlu0 %1036  ;;  %v2676_v54 = vadd.f32 %v924_v33, %v2516_v58  ;;  %v935_v28 = vrot.slane %v2644_v46, 7  ;;  %v777_v12 = vsel %vm376_vm5, %v775_v31, %v776_v51  ;;  %v778_v14 = vsel %vm376_vm5, %v774_v62, %v775_v31 }
 0x1be   : > { %v779_v60 = vsel %vm376_vm5, %v776_v51, %v774_v62  ;;  %v780_v15 = vadd.f32 %v778_v14, %v773_v13  ;;  %v781_v18 = vadd.f32 %v777_v12, %v772_v47  ;;  %v790_v36 = vrot.slane %v2587_v9, 4 }
 0x1bf   : > { %v934_v0 = vrot.slane %v2655_v63, 7  ;;  %v794_v58 = vsel %vm392_vm6, %v791_v42, %v789_v59  ;;  %v804_v21 = vadd.f32 %v779_v60, %v772_v47  ;;  %v805_v22 = vadd.f32 %v778_v14, %v771_v4 }
 0x1c0   : > { %v783_v34 = vmul.f32 0.036000773, %v780_v15  ;;  %v784_v19 = vmul.f32 0.036000773, %v781_v18  ;;  %v792_v20 = vsel %vm392_vm6, %v790_v36, %v791_v42  ;;  %v793_v17 = vsel %vm392_vm6, %v789_v59, %v790_v36 }
 0x1c1   : > { %v2689_v11 = vpop.permute.xlu1 %1042  ;;  %v2691_v45 = vpop.permute.xlu0 %1040  ;;  %v933_v9 = vrot.slane %v2676_v54, 7  ;;  %v941_v57 = vrot.slane %v2644_v46, 1  ;;  %v406_v48 = vadd.f32 %v2560_v23, %v2578_v43  ;;  %v795_v44 = vadd.f32 %v794_v58, %v793_v17 }
 0x1c2   : > { %v940_v55 = vrot.slane %v2655_v63, 1  ;;  %v786_v16 = vadd.f32 %v783_v34, %v765_v27  ;;  %v787_v51 = vadd.f32 %v784_v19, %v766_v24  ;;  %v796_v53 = vadd.f32 %v793_v17, %v792_v20 }
 0x1c3   : > { %v939_v35 = vrot.slane %v2676_v54, 1  ;;  %v2704_v41 = vmul.f32 0.0010283801, %v2604_v6  ;;  %v798_v5 = vmul.f32 0.007598758, %v795_v44  ;;  %v937_v56 = vsel %vm323_vm0, %v933_v9, %v934_v0 }
 0x1c4   : > { %v956_v10 = vrot.slane %v2644_v46, 6  ;;  %v962_v8 = vrot.slane %v2644_v46, 2  ;;  %v799_v33 = vmul.f32 0.007598758, %v796_v53  ;;  %v938_v4 = vsel %vm323_vm0, %v935_v28, %v933_v9 }
 0x1c5   : > { %v2710_v23 = vpop.permute.xlu1 %1055  ;;  %v2712_v43 = vpop.permute.xlu0 %1053  ;;  %v801_v47 = vadd.f32 %v798_v5, %v786_v16  ;;  %v807_v27 = vmul.f32 0.0010283801, %v804_v21  ;;  %v808_v6 = vmul.f32 0.0010283801, %v805_v22  ;;  %v930_v24 = vmul.f32 0.26601171, %v2676_v54 }
 0x1c6   : > { %v802_v13 = vadd.f32 %v799_v33, %v787_v51  ;;  %v942_v31 = vsel %vm330_vm1, %v940_v55, %v941_v57  ;;  %v943_v42 = vsel %vm330_vm1, %v939_v35, %v940_v55  ;;  %v954_v62 = vrot.slane %v2676_v54, 6 }
 0x1c7   : > { %v2722_v59 = vadd.f32 %v807_v27, %v801_v47  ;;  %v945_v12 = vadd.f32 %v943_v42, %v938_v4  ;;  %v946_v14 = vadd.f32 %v942_v31, %v937_v56  ;;  %v955_v28 = vrot.slane %v2655_v63, 6 }
 0x1c8   : > { %v2729_v18 = vadd.f32 %v808_v6, %v802_v13  ;;  %v959_v36 = vsel %vm346_vm2, %v956_v10, %v954_v62  ;;  %v960_v0 = vrot.slane %v2676_v54, 2  ;;  %v961_v58 = vrot.slane %v2655_v63, 2 }
 0x1c9   : > { %v2725_v60 = vpop.permute.xlu1 %1059  ;;  %v2727_v15 = vpop.permute.xlu0 %1057  ;;  %v386_v21 = vadd.f32 %v383_v52, %v2572_v2  ;;  %v931_v22 = vmul.f32 0.26601171, %v2655_v63  ;;  %v948_v34 = vmul.f32 0.21300554, %v945_v12  ;;  %v949_v19 = vmul.f32 0.21300554, %v946_v14 }
 0x1ca   : > { %v977_v20 = vrot.slane %v2644_v46, 5  ;;  %v958_v17 = vsel %vm346_vm2, %v954_v62, %v955_v28  ;;  %v963_v9 = vsel %vm353_vm3, %v961_v58, %v962_v8  ;;  %v964_v57 = vsel %vm353_vm3, %v960_v0, %v961_v58 }
 0x1cb   : > { %v399_v44 = vmul.f32 0.007598758, %v2668_v26  ;;  %v951_v55 = vadd.f32 %v948_v34, %v930_v24  ;;  %v952_v16 = vadd.f32 %v949_v19, %v931_v22  ;;  %v966_v2 = vadd.f32 %v964_v57, %v959_v36 }
 0x1cc   : > { %v983_v52 = vrot.slane %v2644_v46, 3  ;;  %v967_v35 = vadd.f32 %v963_v9, %v958_v17  ;;  %v975_v5 = vrot.slane %v2676_v54, 5  ;;  %v976_v56 = vrot.slane %v2655_v63, 5 }
 0x1cd   : > { %v2746_v51 = vpop.permute.xlu1 %1063  ;;  %v2748_v53 = vpop.permute.xlu0 %1061  ;;  %v998_v10 = vrot.slane %v2644_v46, 4  ;;  %v387_v8 = vadd.f32 %v2664_v25, %v2574_v39  ;;  %v969_v26 = vmul.f32 0.10936069, %v966_v2  ;;  %v981_v33 = vrot.slane %v2676_v54, 3 }
 0x1ce   : > { %v970_v4 = vmul.f32 0.10936069, %v967_v35  ;;  %v978_v47 = vsel %vm369_vm4, %v976_v56, %v977_v20  ;;  %v979_v27 = vsel %vm369_vm4, %v975_v5, %v976_v56  ;;  %v980_v6 = vsel %vm369_vm4, %v977_v20, %v975_v5 }
 0x1cf   : > { %v400_v24 = vmul.f32 0.007598758, %v2672_v3  ;;  %v409_v13 = vmul.f32 0.0010283801, %v406_v48  ;;  %v972_v46 = vadd.f32 %v969_v26, %v951_v55  ;;  %v982_v31 = vrot.slane %v2655_v63, 3 }
 0x1d0   : > { %v973_v42 = vadd.f32 %v970_v4, %v952_v16  ;;  %v986_v62 = vsel %vm376_vm5, %v983_v52, %v981_v33  ;;  %v996_v12 = vrot.slane %v2676_v54, 4  ;;  %v997_v14 = vrot.slane %v2655_v63, 4 }
 0x1d1   : > { %v2764_v39 = vpop.permute.xlu1 %1076  ;;  %v2766_v25 = vpop.permute.xlu0 %1074  ;;  %v402_v28 = vadd.f32 %v399_v44, %v386_v21  ;;  %v403_v36 = vadd.f32 %v400_v24, %v387_v8  ;;  %v984_v3 = vsel %vm376_vm5, %v982_v31, %v983_v52  ;;  %v985_v48 = vsel %vm376_vm5, %v981_v33, %v982_v31 }
 0x1d2   : > { %v987_v0 = vadd.f32 %v985_v48, %v980_v6  ;;  %v988_v58 = vadd.f32 %v984_v3, %v979_v27  ;;  %v999_v22 = vsel %vm392_vm6, %v997_v14, %v998_v10  ;;  %v1000_v34 = vsel %vm392_vm6, %v996_v12, %v997_v14 }
 0x1d3   : > { %v1001_v54 = vsel %vm392_vm6, %v998_v10, %v996_v12  ;;  %v1003_v63 = vadd.f32 %v1000_v34, %v999_v22  ;;  %v1011_v21 = vadd.f32 %v986_v62, %v979_v27  ;;  %v1012_v19 = vadd.f32 %v985_v48, %v978_v47 }
 0x1d4   : > { %v990_v9 = vmul.f32 0.036000773, %v987_v0  ;;  %v991_v57 = vmul.f32 0.036000773, %v988_v58  ;;  %v1002_v44 = vadd.f32 %v1001_v54, %v1000_v34  ;;  %v2783_v55 = vadd.f32 %v2704_v41, %v402_v28 }
 0x1d5   : > { %v1081_v20 = vpop.permute.xlu1 %1080  ;;  %v1079_v17 = vpop.permute.xlu0 %1078  ;;  %v2785_v16 = vadd.f32 %v409_v13, %v403_v36  ;;  %v1006_v5 = vmul.f32 0.007598758, %v1003_v63  ;;  %v1020_v56 = vmul.f32 %v2521_v61, %v2521_v61  ;;  %v1021_v10 = vmul.f32 %v2524_v7, %v2524_v7 }
 0x1d6   : > { %v993_v2 = vadd.f32 %v990_v9, %v972_v46  ;;  %v994_v52 = vadd.f32 %v991_v57, %v973_v42  ;;  %v1005_v35 = vmul.f32 0.007598758, %v1002_v44  ;;  %v1014_v47 = vmul.f32 0.0010283801, %v1011_v21 }
 0x1d7   : > { %v1015_v27 = vmul.f32 0.0010283801, %v1012_v19  ;;  %v813_v41 = vmul.f32 %v2783_v55, %v2783_v55  ;;  %v814_v6 = vmul.f32 %v2785_v16, %v2785_v16  ;;  %v1044_v21 = vadd.f32 %v2659_v38, %v2641_v1 }
 0x1d8   : > { %v1008_v33 = vadd.f32 %v1005_v35, %v993_v2  ;;  %v1009_v4 = vadd.f32 %v1006_v5, %v994_v52  ;;  %v1045_v57 = vadd.f32 %v2691_v45, %v2639_v37  ;;  %v1029_v52 = vmul.f32 0.26601171, %v2218_v32 }
 0x1d9   : > { %v1085_v8 = vpop.permute.xlu1 %1084  ;;  %v1083_v26 = vpop.permute.xlu0 %1082  ;;  %v1251_v46 = vadd.f32 %v1020_v56, %v813_v41  ;;  %v1252_v31 = vadd.f32 %v1021_v10, %v814_v6  ;;  %v816_v12 = vsub.f32 %v2722_v59, %v813_v41  ;;  %v817_v14 = vsub.f32 %v2729_v18, %v814_v6 }
 0x1da   : > { %v1017_v24 = vadd.f32 %v1014_v47, %v1008_v33  ;;  %v1018_v13 = vadd.f32 %v1015_v27, %v1009_v4  ;;  %v1065_v59 = vadd.f32 %v2725_v60, %v2712_v43  ;;  %v1046_v18 = vadd.f32 %v2689_v11, %v2661_v50 }
 0x1db   : > { %v1254_v0 = vadd.f32 0.0001, %v1251_v46  ;;  %v1255_v34 = vadd.f32 0.0001, %v1252_v31  ;;  %v1047_v35 = vmul.f32 0.21300554, %v1044_v21  ;;  %v1086_v1 = vadd.f32 %v1081_v20, %v2766_v25 }
 0x1dc   : > { %v1023_v28 = vsub.f32 %v1017_v24, %v1020_v56  ;;  %v1024_v36 = vsub.f32 %v1018_v13, %v1021_v10  ;;  %v1067_v38 = vadd.f32 %v2746_v51, %v2727_v15  ;;  %v1066_v5 = vadd.f32 %v2748_v53, %v2710_v23 }
 0x1dd   : > { %v1098_v42 = vpop.permute.xlu1 %1097  ;;  %v1096_v62 = vpop.permute.xlu0 %1095  ;;  %v1031_v43 = vmul.f32 0.26601171, %v2228_v29  ;;  %v1068_v60 = vmul.f32 0.10936069, %v1065_v59  ;;  %v1049_v11 = vmul.f32 0.21300554, %v1046_v18  ;;  %v1088_v56 = vadd.f32 %v1085_v8, %v1079_v17 }
 0x1de   : > { %v1257_v3 = vadd.f32 %v1023_v28, %v816_v12  ;;  %v1258_v48 = vadd.f32 %v1024_v36, %v817_v14  ;;  %v1030_v37 = vmul.f32 0.26601171, %v2214_v30  ;;  %v1048_v45 = vmul.f32 0.21300554, %v1045_v57 }
 0x1df   : > { %v1050_v33 = vadd.f32 %v1047_v35, %v1029_v52  ;;  %v1089_v4 = vmul.f32 0.036000773, %v1086_v1  ;;  %v1087_v25 = vadd.f32 %v1083_v26, %v2764_v39  ;;  %v1070_v20 = vmul.f32 0.10936069, %v1067_v38 }
 0x1e0   : > { %v1260_v54 = vadd.f32 0.0009, %v1257_v3  ;;  %v1261_v63 = vadd.f32 0.0009, %v1258_v48  ;;  %v1069_v15 = vmul.f32 0.10936069, %v1066_v5  ;;  %v1052_v29 = vadd.f32 %v1049_v11, %v1031_v43 }
 0x1e1   : > { %v1102_v58 = vpop.permute.xlu1 %1101  ;;  %v1100_v22 = vpop.permute.xlu0 %1099  ;;  %v1071_v51 = vadd.f32 %v1068_v60, %v1050_v33  ;;  %v1051_v27 = vadd.f32 %v1048_v45, %v1030_v37  ;;  %v1091_v41 = vmul.f32 0.036000773, %v1088_v56  ;;  %v1090_v13 = vmul.f32 0.036000773, %v1087_v25 }
 0x1e2   : > { %v2799_v19 = vmul.f32 %v1260_v54, %v1254_v0  ;;  %v2801_v9 = vmul.f32 %v1261_v63, %v1255_v34  ;;  %v1107_v50 = vadd.f32 %v1102_v58, %v1096_v62  ;;  %v1073_v8 = vadd.f32 %v1070_v20, %v1052_v29 }
 0x1e3   : > { %v1092_v30 = vadd.f32 %v1089_v4, %v1071_v51  ;;  %v1072_v46 = vadd.f32 %v1069_v15, %v1051_v27  ;;  %v1234_v49 = vmul.f32 2.0, %v2785_v16 }
 0x1e4   : > { %v1110_v47 = vmul.f32 0.007598758, %v1107_v50  ;;  %v1094_v26 = vadd.f32 %v1091_v41, %v1073_v8  ;;  %1489 = vrcp.f32 %v2799_v19 }
 0x1e5   : > { %v1106_v44 = vpop.permute.xlu1 %1105  ;;  %v1104_v2 = vpop.permute.xlu0 %1103  ;;  %v1093_v36 = vadd.f32 %v1090_v13, %v1072_v46  ;;  %1491 = vrcp.f32 %v2801_v9 }
 0x1e6   : > { %v1109_v23 = vadd.f32 %v1106_v44, %v1100_v22  ;;  %v1108_v53 = vadd.f32 %v1104_v2, %v1098_v42  ;;  %v1113_v31 = vadd.f32 %v1110_v47, %v1092_v30 }
 0x1e8   : > { %v1112_v62 = vmul.f32 0.007598758, %v1109_v23  ;;  %v1111_v12 = vmul.f32 0.007598758, %v1108_v53 }
 0x1e9   : > { %v1119_v10 = vpop.permute.xlu1 %1118  ;;  %v1117_v32 = vpop.permute.xlu0 %1116 }
 0x1ea   : > { %v1115_v0 = vadd.f32 %v1112_v62, %v1094_v26  ;;  %v1114_v58 = vadd.f32 %v1111_v12, %v1093_v36 }
 0x1ed   : > { %v1123_v6 = vpop.permute.xlu1 %1122  ;;  %v1121_v24 = vpop.permute.xlu0 %1120 }
 0x1ee   : > { %v1128_v17 = vadd.f32 %v1123_v6, %v1117_v32  ;;  %v2846_v53 = vpop.eup %1489 }
 0x1ef   : > { %v1492_v8 = vpop.eup %1491 }
 0x1f0   : > { %v1131_v39 = vmul.f32 0.0010283801, %v1128_v17 }
 0x1f1   : > { %v1127_v14 = vpop.permute.xlu1 %1126  ;;  %v1125_v28 = vpop.permute.xlu0 %1124 }
 0x1f2   : > { %v2818_v3 = vadd.f32 %v1131_v39, %v1113_v31  ;;  %v1130_v42 = vadd.f32 %v1127_v14, %v1121_v24  ;;  %v1129_v48 = vadd.f32 %v1125_v28, %v1119_v10 }
 0x1f4   : > { %v1133_v22 = vmul.f32 0.0010283801, %v1130_v42  ;;  %v1132_v34 = vmul.f32 0.0010283801, %v1129_v48  ;;  %v1137_v54 = vmul.f32 0.26601171, %v2818_v3 }
 0x1f5   : > { %v1140_v63 = vrot.slane %v2818_v3, 7  ;;  %v1146_v18 = vrot.slane %v2818_v3, 1  ;;  %v1161_v57 = vrot.slane %v2818_v3, 6  ;;  %v1167_v44 = vrot.slane %v2818_v3, 2 }
 0x1f6   : > { %v1136_v21 = vadd.f32 %v1133_v22, %v1115_v0  ;;  %v1135_v59 = vadd.f32 %v1132_v34, %v1114_v58  ;;  %v1182_v2 = vrot.slane %v2818_v3, 5  ;;  %v1188_v52 = vrot.slane %v2818_v3, 3 }
 0x1f7   : > { %v1203_v35 = vrot.slane %v2818_v3, 4 }
 0x1f8   : > { %v1142_v1 = vrot.slane %v1136_v21, 7  ;;  %v1148_v38 = vrot.slane %v1136_v21, 1  ;;  %v1163_v5 = vrot.slane %v1136_v21, 6  ;;  %v1169_v43 = vrot.slane %v1136_v21, 2 }
 0x1f9   : > { %v1138_v60 = vmul.f32 0.26601171, %v1135_v59  ;;  %v1141_v50 = vrot.slane %v1135_v59, 7  ;;  %v1147_v11 = vrot.slane %v1135_v59, 1  ;;  %v1162_v37 = vrot.slane %v1135_v59, 6 }
 0x1fa   : > { %v1145_v45 = vsel %vm323_vm0, %v1142_v1, %v1140_v63  ;;  %v1166_v56 = vsel %vm346_vm2, %v1163_v5, %v1161_v57  ;;  %v1168_v10 = vrot.slane %v1135_v59, 2  ;;  %v1183_v32 = vrot.slane %v1135_v59, 5 }
 0x1fb   : > { %v1144_v33 = vsel %vm323_vm0, %v1140_v63, %v1141_v50  ;;  %v1149_v4 = vsel %vm330_vm1, %v1147_v11, %v1148_v38  ;;  %v1150_v25 = vsel %vm330_vm1, %v1146_v18, %v1147_v11  ;;  %v1165_v20 = vsel %vm346_vm2, %v1161_v57, %v1162_v37 }
 0x1fc   : > { %v1152_v15 = vadd.f32 %v1150_v25, %v1145_v45  ;;  %v1153_v51 = vadd.f32 %v1149_v4, %v1144_v33  ;;  %v1170_v47 = vsel %vm353_vm3, %v1168_v10, %v1169_v43  ;;  %v1171_v23 = vsel %vm353_vm3, %v1167_v44, %v1168_v10 }
 0x1fd   : > { %v1173_v29 = vadd.f32 %v1171_v23, %v1166_v56  ;;  %v1174_v27 = vadd.f32 %v1170_v47, %v1165_v20  ;;  %v1184_v41 = vrot.slane %v1136_v21, 5  ;;  %v1186_v6 = vsel %vm369_vm4, %v1182_v2, %v1183_v32 }
 0x1fe   : > { %v1155_v24 = vmul.f32 0.21300554, %v1152_v15  ;;  %v1156_v30 = vmul.f32 0.21300554, %v1153_v51  ;;  %v1189_v13 = vrot.slane %v1135_v59, 3  ;;  %v1190_v17 = vrot.slane %v1136_v21, 3 }
 0x1ff   : > { %v1176_v46 = vmul.f32 0.10936069, %v1173_v29  ;;  %v1177_v31 = vmul.f32 0.10936069, %v1174_v27  ;;  %v1185_v62 = vsel %vm369_vm4, %v1183_v32, %v1184_v41  ;;  %v1187_v12 = vsel %vm369_vm4, %v1184_v41, %v1182_v2 }
 0x200   : > { %v1158_v39 = vadd.f32 %v1155_v24, %v1137_v54  ;;  %v1159_v26 = vadd.f32 %v1156_v30, %v1138_v60  ;;  %v1191_v14 = vsel %vm376_vm5, %v1189_v13, %v1190_v17  ;;  %v1192_v28 = vsel %vm376_vm5, %v1188_v52, %v1189_v13 }
 0x201   : > { %v1193_v36 = vsel %vm376_vm5, %v1190_v17, %v1188_v52  ;;  %v1194_v3 = vadd.f32 %v1192_v28, %v1187_v12  ;;  %v1195_v42 = vadd.f32 %v1191_v14, %v1186_v6  ;;  %v1204_v48 = vrot.slane %v1135_v59, 4 }
 0x202   : > { %v1179_v0 = vadd.f32 %v1176_v46, %v1158_v39  ;;  %v1180_v58 = vadd.f32 %v1177_v31, %v1159_v26  ;;  %v1205_v22 = vrot.slane %v1136_v21, 4  ;;  %v1218_v34 = vadd.f32 %v1193_v36, %v1186_v6 }
 0x203   : > { %v1197_v63 = vmul.f32 0.036000773, %v1194_v3  ;;  %v1198_v18 = vmul.f32 0.036000773, %v1195_v42  ;;  %v1207_v54 = vsel %vm392_vm6, %v1203_v35, %v1204_v48  ;;  %v1219_v57 = vadd.f32 %v1192_v28, %v1185_v62 }
 0x204   : > { %v1206_v44 = vsel %vm392_vm6, %v1204_v48, %v1205_v22  ;;  %v1208_v2 = vsel %vm392_vm6, %v1205_v22, %v1203_v35  ;;  %v1221_v50 = vmul.f32 0.0010283801, %v1218_v34  ;;  %v1227_v37 = vmul.f32 %v2521_v61, %v2783_v55 }
 0x205   : > { %v1200_v52 = vadd.f32 %v1197_v63, %v1179_v0  ;;  %v1201_v1 = vadd.f32 %v1198_v18, %v1180_v58  ;;  %v1209_v38 = vadd.f32 %v1208_v2, %v1207_v54  ;;  %v1210_v59 = vadd.f32 %v1207_v54, %v1206_v44 }
 0x206   : > { %v1222_v11 = vmul.f32 0.0010283801, %v1219_v57  ;;  %v1228_v45 = vmul.f32 %v2524_v7, %v2785_v16  ;;  %v1233_v56 = vmul.f32 2.0, %v2783_v55  ;;  %v1269_v32 = vmul.f32 %v2846_v53, %v2799_v19 }
 0x207   : > { %v1212_v5 = vmul.f32 0.007598758, %v1209_v38  ;;  %v1213_v43 = vmul.f32 0.007598758, %v1210_v59  ;;  %v1270_v33 = vmul.f32 %v1492_v8, %v2801_v9  ;;  %v1237_v15 = vmul.f32 %v1234_v49, %v2524_v7 }
 0x208   : > { %v1236_v4 = vmul.f32 %v1233_v56, %v2521_v61  ;;  %v1272_v23 = vsub.f32 2.0, %v1269_v32  ;;  %v1284_v16 = vand.u32 127, %v321_v40 }
 0x209   : > { %v1215_v21 = vadd.f32 %v1212_v5, %v1200_v52  ;;  %v1216_v60 = vadd.f32 %v1213_v43, %v1201_v1  ;;  %v1273_v29 = vsub.f32 2.0, %v1270_v33  ;;  %v1240_v27 = vadd.f32 0.0001, %v1237_v15 }
 0x20a   : > { %v1239_v55 = vadd.f32 0.0001, %v1236_v4  ;;  %v1275_v9 = vmul.f32 %v2846_v53, %v1272_v23  ;;  %vm1288_vm7 = vcmp.lt.s32.totalorder %v1284_v16, 16 }
 0x20b   : > { %v1224_v35 = vadd.f32 %v1221_v50, %v1215_v21  ;;  %v1225_v10 = vadd.f32 %v1222_v11, %v1216_v60  ;;  %v1276_v30 = vmul.f32 %v1492_v8, %v1273_v29 }
 0x20d   : > { %v1230_v25 = vsub.f32 %v1224_v35, %v1227_v37  ;;  %v1231_v20 = vsub.f32 %v1225_v10, %v1228_v45 }
 0x20f   : > { %v1242_v51 = vmul.f32 2.0, %v1230_v25  ;;  %v1243_v47 = vmul.f32 2.0, %v1231_v20 }
 0x211   : > { %v1245_v41 = vadd.f32 0.0009, %v1242_v51  ;;  %v1246_v6 = vadd.f32 0.0009, %v1243_v47 }
 0x213   : > { %v1248_v24 = vmul.f32 %v1245_v41, %v1239_v55  ;;  %v1249_v19 = vmul.f32 %v1246_v6, %v1240_v27 }
 0x215   : > { %v1278_v61 = vmul.f32 %v1275_v9, %v1248_v24  ;;  %v1279_v7 = vmul.f32 %v1276_v30, %v1249_v19 }
 0x217   : > { %v1292_v13 = vsel %vm1288_vm7, %v1278_v61, 0.0  ;;  %v1293_v17 = vsel %vm1288_vm7, %v1279_v7, 0.0 }
 0x218   : > { %v1295_v46 = vadd.f32 %v1293_v17, %v1292_v13 }
 0x21a   : > { %1297 = vadd.xlane.f32.xlu0 %v1295_v46 }
 0x2a7   : > { %v1298_v31 = vpop.xlane.xlu0 %1297 }
 0x2a8   : > { %v1299_v40 = vrot.slane %v1298_v31, 4 }
 0x2aa   : > { %v1300_v62 = vadd.f32 %v1299_v40, %v1298_v31 }
 0x2ac   : > { %v1301_v12 = vrot.slane %v1300_v62, 2 }
 0x2ae   : > { %v1302_v39 = vadd.f32 %v1301_v12, %v1300_v62 }
 0x2b0   : > { %v1303_v26 = vrot.slane %v1302_v39, 1 }
 0x2b2   : > { %v1304_v14 = vadd.f32 %v1303_v26, %v1302_v39 }
 0x2b4   : > { %1424 = vpush %v1304_v14 }
 0x2e5   : > { %s1425_s3 = spop %1424 }
 0x2e6   : > { %v1306_v53 = vstv %s1425_s3 }
 0x2e7   : > { %1307 = vst [vmem:[%s200_s6] sm:$0x1] %v1306_v53 }
 0x2e8   : > { %1566 = shalt.err (!%p1563_p11)
}
 0x2e9   : > { %s1567_s30 = scalar_lea.hbm %s2886_s22, 16  ;;  %s1571_s27 = scalar_lea.hbm %s2929_s2, 192 }
 0x2ea   : > { %p1568_p7 = scmp.ne.s32.totalorder %s2886_s22, %s1567_s30  ;;  %p1572_p1 = scmp.lt.u32.totalorder %s2886_s22, %s2929_s2 }
 0x2eb   : > { %p1573_p3 = scmp.lt.u32.totalorder %s1571_s27, %s1567_s30  ;;  %p1575_p12 = scmp.lt.u32.totalorder %s1567_s30, %s2886_s22 }
 0x2ec   : > { %p1569_p8 = pnand %p1568_p7, %p2985_p0 }
 0x2ed   : > { %p1574_p6 = por %p1573_p3, %p1572_p1 }
 0x2ee   : > { %p1570_p13 = pneg %p1569_p8 }
 0x2ef   : > { %p1576_p2 = por %p1575_p12, %p1574_p6 }
 0x2f1   : > { %p1577_p9 = pnand %p1576_p2, %p1570_p13 }
 0x2f3   : > { %1580 = shalt.err (!%p1577_p9)
}
 0x2f4   : > { %1430 = dma.vmem_to_hbm [thread:$0]  (%p2985_p0), %s2881_s7, 16, %s2886_s22, %s1309_s29  }
 0x2f5 PF: > { %p1444_p4 = scmp.ge.s32.totalorder %s1623_s12, 2  ;;  %s1333_s26 = sand.u32 1, %s1611_s9  }
 0x2f6   : > { %p2986_p5 = scmp.ne.s32.totalorder %s2935_s21, 0  ;;  %s1334_s24 = scalar_lea.sflag [#allocation4], %s1333_s26 }
 0x2f8   : > { %p1440_p10 = pnand %p1444_p4, %p2986_p5 }
 0x2fa   : > { %1606 = dma.done.wait (!%p1440_p10), %s1334_s24, 16  }
 0x2fb   : > { %1608 = vsyncadd (!%p1440_p10), %s1334_s24, 4294967280  ;;  %p18_p11 = scmp.ge.s32.totalorder %s1680_s15, 14   ;;  %s2987_s9 = smov %s1615_s10 }
 0x2fc   : > { %s2988_s10 = smov %s1619_s11  ;;  %s2989_s11 = smov %s1692_s18 }
 0x2fd   : > { %s2990_s12 = smov %s1680_s15  ;;  %20 = sbr.rel (!%p18_p11) target bundleno = 7 (0x7), region = 86 }
 0x304   :  { %1338 = vsyncpa [#allocation3], 1 }
 0x305   :  { %1340 = vsyncpa [#allocation3 + $0x1], 1 }
 0x306   :  { %1341 = vsyncpa [#allocation6], 1 }
 0x307   :  { %1343 = vsyncpa [#allocation6 + $0x1], 1 }
 0x308   :  { %1344 = vsyncpa [#allocation4], 1 }
 0x309   :  { %1346 = vsyncpa [#allocation4 + $0x1], 1 }

// kernel: enhance_loss.5
= control target key start
LH: loop header
LB: loop body
LE: loop exit
PB: predicated region body
PF: predicated region fallthrough
CT: control target
= control target key end

     0   :  { %s399_s9 = smov 0   ;;  %s463_s0 = inlined_call_operand.vmem [shape: f32[4,16,128], index: 0, kind: input, shape index: {}]   ;;  %s464_s1 = inlined_call_operand.vmem [shape: f32[4,16,128], index: 1, kind: input, shape index: {}]   ;;  %s465_s2 = inlined_call_operand.vmem [shape: f32[4,1,128], index: 2, kind: output, shape index: {}]  }
   0x1 LB: > { %s341_s10 = sadd.s32 4294967295, %s380_s9   ;;  %p345_p0 = scmp.ge.s32.totalorder %s380_s9, 1  ;;  %s380_s9 = sphi %s399_s9, %s12_s9  }
   0x2   : > { %p122_p1 = scmp.lt.s32.totalorder %s380_s9, 5 }
   0x4   : > { %p123_p2 = pnand %p345_p0, %p122_p1 }
   0x5   : > { %p147_p3 = scmp.lt.s32.totalorder (!%p123_p2), %s341_s10, 3  ;;  %v182_v0 = vlaneseq (!%p123_p2)  ;;  %s382_s15 = smov (!%p123_p2), 1  }
   0x6   : > { %126 = sbr.rel (%p123_p2) target bundleno = 505 (0x1f9), region = 28  ;;  %s383_s16 = smov (!%p123_p2), 127  }
   0x7   : > { %v409_v1 = vshrl.u32 (!%p123_p2), %v182_v0, 7 }
   0x9   : > { %vm184_vm0 = vcmp.lt.s32.totalorder (!%p123_p2), %v409_v1, 1  ;;  %vm191_vm1 = vcmp.lt.s32.totalorder (!%p123_p2), %v409_v1, 7 }
   0xd   : > { %s467_s10 = smov (!%p147_p3, %s341_s10), 3 }
   0xe   : > { %s352_s11 = sshll.u32 %s467_s10, 4  ;;  %s159_s22 = scalar_lea.vmem %s465_s2, %s467_s10 }
   0xf   : > { %s156_s14 = scalar_lea.vmem %s464_s1, %s352_s11  ;;  %s151_s19 = scalar_lea.vmem %s463_s0, %s352_s11 }
  0x10   : > { %v162_v2 = vld [vmem:[%s156_s14] sm:$0xff]  ;;  %v163_v3 = vld [vmem:[%s156_s14 + $0x8] sm:$0xff] }
  0x11   : > { %172 = vrot.lane.b32.xlu0 %v162_v2, %s382_s15  ;;  %v226_v4 = vrot.slane %v162_v2, 7  ;;  %v227_v5 = vrot.slane %v163_v3, 7  ;;  %v160_v42 = vld [vmem:[%s151_s19] sm:$0xff]  ;;  %v161_v43 = vld [vmem:[%s151_s19 + $0x8] sm:$0xff] }
  0x13   : > { %v228_v6 = vsel %vm184_vm0, %v226_v4, %v227_v5  ;;  %v229_v7 = vsel %vm184_vm0, %v227_v5, %v226_v4  ;;  %v218_v5 = vrot.slane %v160_v42, 7 }
  0x14   : > { %v231_v8 = vsub.f32 %v163_v3, %v228_v6  ;;  %v230_v9 = vsub.f32 %v162_v2, %v229_v7  ;;  %v219_v6 = vrot.slane %v161_v43, 7 }
  0x15   : > { %174 = vrot.lane.b32.xlu0 %v163_v3, %s382_s15 }
  0x16   : > { %v233_v10 = vand.u32 2147483647, %v231_v8  ;;  %v232_v11 = vand.u32 2147483647, %v230_v9 }
  0x18   : > { %v234_v12 = vrot.slane %v232_v11, 7  ;;  %v235_v13 = vrot.slane %v233_v10, 7  ;;  %v240_v14 = vrot.slane %v232_v11, 1  ;;  %v241_v15 = vrot.slane %v233_v10, 1 }
  0x1a   : > { %v237_v16 = vsel %vm184_vm0, %v235_v13, %v234_v12  ;;  %v242_v17 = vsel %vm191_vm1, %v240_v14, %v241_v15  ;;  %v236_v18 = vsel %vm184_vm0, %v234_v12, %v235_v13  ;;  %v243_v19 = vsel %vm191_vm1, %v241_v15, %v240_v14 }
  0x1b   : > { %v238_v20 = vadd.f32 %v237_v16, %v232_v11  ;;  %v239_v21 = vadd.f32 %v236_v18, %v233_v10  ;;  %v221_v11 = vsel %vm184_vm0, %v219_v6, %v218_v5  ;;  %v220_v12 = vsel %vm184_vm0, %v218_v5, %v219_v6 }
  0x1c   : > { %v222_v15 = vsub.f32 %v160_v42, %v221_v11  ;;  %v223_v16 = vsub.f32 %v161_v43, %v220_v12 }
  0x1d   : > { %v244_v22 = vadd.f32 %v242_v17, %v238_v20  ;;  %v245_v23 = vadd.f32 %v243_v19, %v239_v21 }
  0x1e   : > { %v224_v19 = vand.u32 2147483647, %v222_v15 }
  0x1f   : > { %246 = vrot.lane.b32.xlu0 %v244_v22, %s382_s15  ;;  %248 = vrot.lane.b32.xlu1 %v245_v23, %s382_s15 }
  0x83   : > { %v173_v24 = vpop.permute.xlu0 %172 }
  0x84   : > { %v176_v25 = vsub.f32 %v162_v2, %v173_v24  ;;  %v225_v24 = vand.u32 2147483647, %v223_v16 }
  0x86   : > { %v178_v27 = vand.u32 2147483647, %v176_v25 }
  0x87   : > { %v175_v26 = vpop.permute.xlu0 %174 }
  0x88   : > { %v177_v28 = vsub.f32 %v163_v3, %v175_v26  ;;  %v180_v30 = vrot.slane %v178_v27, 7  ;;  %v189_v33 = vrot.slane %v178_v27, 1 }
  0x8a   : > { %v179_v29 = vand.u32 2147483647, %v177_v28 }
  0x8c   : > { %v181_v31 = vrot.slane %v179_v29, 7  ;;  %v190_v32 = vrot.slane %v179_v29, 1 }
  0x8e   : > { %v185_v34 = vsel %vm184_vm0, %v180_v30, %v181_v31  ;;  %v186_v35 = vsel %vm184_vm0, %v181_v31, %v180_v30  ;;  %v192_v37 = vsel %vm191_vm1, %v189_v33, %v190_v32  ;;  %v193_v40 = vsel %vm191_vm1, %v190_v32, %v189_v33 }
  0x8f   : > { %v187_v36 = vadd.f32 %v186_v35, %v178_v27  ;;  %v188_v38 = vadd.f32 %v185_v34, %v179_v29 }
  0x91   : > { %v194_v39 = vadd.f32 %v192_v37, %v187_v36  ;;  %v195_v41 = vadd.f32 %v193_v40, %v188_v38  ;;  %v247_v44 = vpop.permute.xlu0 %246  ;;  %v249_v45 = vpop.permute.xlu1 %248 }
  0x92   : > { %v250_v48 = vadd.f32 %v247_v44, %v244_v22  ;;  %v251_v61 = vadd.f32 %v249_v45, %v245_v23 }
  0x93   : > { %202 = vrot.lane.b32.xlu0 %v194_v39, %s383_s16  ;;  %196 = vrot.lane.b32.xlu1 %v194_v39, %s382_s15 }
  0x97   : > { %252 = vrot.lane.b32.xlu0 %v244_v22, %s383_s16  ;;  %198 = vrot.lane.b32.xlu1 %v195_v41, %s382_s15 }
  0x9b   : > { %204 = vrot.lane.b32.xlu1 %v195_v41, %s383_s16  ;;  %164 = vrot.lane.b32.xlu0 %v160_v42, %s382_s15 }
  0x9f   : > { %254 = vrot.lane.b32.xlu1 %v245_v23, %s383_s16 }
  0xa3   : > { %166 = vrot.lane.b32.xlu1 %v161_v43, %s382_s15 }
 0x105   : > { %v203_v46 = vpop.permute.xlu0 %202  ;;  %v197_v47 = vpop.permute.xlu1 %196 }
 0x106   : > { %v200_v49 = vadd.f32 %v197_v47, %v194_v39 }
 0x108   : > { %v206_v50 = vadd.f32 %v203_v46, %v200_v49 }
 0x109   : > { %v253_v51 = vpop.permute.xlu0 %252  ;;  %v199_v52 = vpop.permute.xlu1 %198 }
 0x10a   : > { %v256_v53 = vadd.f32 %v253_v51, %v250_v48  ;;  %v208_v54 = vmul.f32 0.11111111, %v206_v50  ;;  %v201_v56 = vadd.f32 %v199_v52, %v195_v41 }
 0x10c   : > { %v258_v55 = vmul.f32 0.11111111, %v256_v53  ;;  %v210_v60 = vmul.f32 -10.0, %v208_v54 }
 0x10d   : > { %v205_v57 = vpop.permute.xlu1 %204  ;;  %v165_v13 = vpop.permute.xlu0 %164 }
 0x10e   : > { %v260_v58 = vmul.f32 -10.0, %v258_v55  ;;  %v207_v59 = vadd.f32 %v205_v57, %v201_v56  ;;  %v212_v4 = vmul.f32 1.442695, %v210_v60  ;;  %v168_v17 = vsub.f32 %v160_v42, %v165_v13 }
 0x110   : > { %v209_v62 = vmul.f32 0.11111111, %v207_v59  ;;  %v262_v0 = vmul.f32 1.442695, %v260_v58  ;;  %v170_v22 = vand.u32 2147483647, %v168_v17 }
 0x111   : > { %v255_v63 = vpop.permute.xlu1 %254 }
 0x112   : > { %v211_v2 = vmul.f32 -10.0, %v209_v62  ;;  %v257_v3 = vadd.f32 %v255_v63, %v251_v61  ;;  %366 = vpow2.f32 %v262_v0 }
 0x113   : > { %368 = vpow2.f32 %v212_v4 }
 0x114   : > { %v214_v7 = vmul.f32 1.442695, %v211_v2  ;;  %v259_v8 = vmul.f32 0.11111111, %v257_v3 }
 0x115   : > { %v167_v14 = vpop.permute.xlu1 %166 }
 0x116   : > { %v261_v9 = vmul.f32 -10.0, %v259_v8  ;;  %370 = vpow2.f32 %v214_v7  ;;  %v169_v18 = vsub.f32 %v161_v43, %v167_v14 }
 0x118   : > { %v264_v10 = vmul.f32 1.442695, %v261_v9  ;;  %v171_v23 = vand.u32 2147483647, %v169_v18 }
 0x11a   : > { %372 = vpow2.f32 %v264_v10 }
 0x11c   : > { %v367_v20 = vpop.eup %366 }
 0x11d   : > { %v369_v21 = vpop.eup %368  ;;  %v266_v26 = vmul.f32 %v367_v20, %v224_v19 }
 0x11e   : > { %v216_v28 = vmul.f32 %v369_v21, %v170_v22 }
 0x120   : > { %v371_v25 = vpop.eup %370  ;;  %v268_v30 = vadd.f32 %v266_v26, %v216_v28 }
 0x121   : > { %v217_v1 = vmul.f32 %v371_v25, %v171_v23 }
 0x124   : > { %v373_v27 = vpop.eup %372 }
 0x125   : > { %v267_v29 = vmul.f32 %v373_v27, %v225_v24 }
 0x127   : > { %v269_v31 = vadd.f32 %v267_v29, %v217_v1 }
 0x129   : > { %v270_v32 = vadd.f32 %v269_v31, %v268_v30 }
 0x12b   : > { %271 = vadd.xlane.f32.xlu0 %v270_v32 }
 0x1b8   : > { %v272_v33 = vpop.xlane.xlu0 %271 }
 0x1b9   : > { %v273_v34 = vrot.slane %v272_v33, 4 }
 0x1bb   : > { %v274_v35 = vadd.f32 %v273_v34, %v272_v33 }
 0x1bd   : > { %v275_v36 = vrot.slane %v274_v35, 2 }
 0x1bf   : > { %v276_v37 = vadd.f32 %v275_v36, %v274_v35 }
 0x1c1   : > { %v277_v38 = vrot.slane %v276_v37, 1 }
 0x1c3   : > { %v278_v39 = vadd.f32 %v277_v38, %v276_v37 }
 0x1c5   : > { %354 = vpush %v278_v39 }
 0x1f6   : > { %s355_s23 = spop %354 }
 0x1f7   : > { %v280_v40 = vstv %s355_s23 }
 0x1f8   : > { %281 = vst [vmem:[%s159_s22] sm:$0x1] %v280_v40 }
 0x1f9 PF: > { %s12_s9 = sadd.s32 1, %s380_s9  }
 0x1fa   : > { %p9_p4 = scmp.ge.s32.totalorder %s12_s9, 6  }
 0x1fc   :  { %11 = sbr.rel (!%p9_p4) target bundleno = 1 (0x1), region = 61 }

</bundles_post_ra>
